<compile_context>
chip_gen: v7x
topology: tpu7x:2x2x1
jax: 0.10.0
libtpu: 0.0.40
codegen_flags: <defaults>
</compile_context>

<pallas_src>
import jax
import jax.numpy as jnp
from jax.experimental import pallas as pl
from jax.experimental.pallas import tpu as pltpu


def _round_up(n, m):
    return (n + m - 1) // m * m


def _sublane_multiple(itemsize):
    # Native sublane packing: f32 -> 8, bf16/f16 -> 16, int8/fp8 -> 32.
    return {4: 8, 2: 16, 1: 32}.get(itemsize, 8)


def _vmem_capacity_bytes():
    try:
        cap = getattr(pltpu.get_tpu_info(), "vmem_capacity_bytes", None)
        if cap:
            return int(cap)
    except Exception:
        pass
    return 64 << 20  # conservative default (v7x per-TensorCore VMEM)


def _patchify_kernel_lane_dense(x_ref, o_ref):
    # x_ref: (h_blk, p1, w, p2*C)   o_ref: (p1, p2, h_blk, w*C)
    p = o_ref.shape[0]
    h_blk, _, w, p_c = x_ref.shape
    c = p_c // p
    for i in range(p):          # p1 (static unroll)
        for j in range(p):      # p2 (static unroll)
            # out[i, j, ih, iw*C + cc] = x[ih, i, iw, j*C + cc]
            o_ref[i, j] = x_ref[:, i, :, j * c:(j + 1) * c].reshape(h_blk, w * c)


def _patchify_kernel_sliced(x_ref, o_ref):
    # Lane-sparse but guaranteed-to-lower fallback.
    # x_ref: (h_blk, p1, w, p2, C)   o_ref: (p1, p2, h_blk, w, C)
    p = o_ref.shape[0]
    for i in range(p):
        for j in range(p):
            o_ref[i, j] = x_ref[:, i, :, j, :]


_LANE_DENSE_OK = {}  # (shape, dtype, p) -> bool, filled on first use per shape


def patchify(x, p=8):
    """x: (B, h*p, w*p, C) -> (B, p*p, h, w, C).  Pure layout op (no FLOPs)."""
    B, H, W, C = x.shape
    assert H % p == 0 and W % p == 0, "spatial dims must be multiples of p"
    h, w = H // p, W // p
    itemsize = jnp.dtype(x.dtype).itemsize
    sub = _sublane_multiple(itemsize)

    vmem_cap = _vmem_capacity_bytes()
    vmem_limit_cap = max(int(vmem_cap * 0.8), 16 << 20)    # headroom for scratch
    db_budget = max(vmem_limit_cap - (8 << 20), 8 << 20)   # double-buffer budget

    def padded_block_bytes(h_blk, lane_dense):
        # (sublane, 128)-tile padding on the last two dims of each VMEM block.
        if lane_dense:
            in_e = h_blk * p * _round_up(w, sub) * _round_up(p * C, 128)
            out_e = p * p * _round_up(h_blk, sub) * _round_up(w * C, 128)
        else:
            in_e = h_blk * p * w * _round_up(p, sub) * _round_up(C, 128)
            out_e = p * p * h_blk * _round_up(w, sub) * _round_up(C, 128)
        return (in_e + out_e) * itemsize

    def real_block_bytes(h_blk):
        return 2 * h_blk * p * w * p * C * itemsize      # in + out, unpadded

    def out_run_bytes(h_blk):
        return h_blk * w * C * itemsize                  # HBM run per (p1,p2) slab

    # --- choose h_blk -------------------------------------------------------
    # Candidates keep the output block's second-to-last dim either the full
    # extent (h_blk == h) or a multiple of the native sublane count.
    cands = [d for d in range(h, 0, -1) if h % d == 0 and (d == h or d % sub == 0)]
    fitting = [d for d in cands if 2 * padded_block_bytes(d, True) <= db_budget]
    if not fitting:
        fitting = [cands[-1]]
    # Largest fitting block that stays <= ~2 MiB real and keeps >= 1 KiB output
    # runs (roofline saturates well below that; smaller blocks buy DMA overlap).
    h_blk = fitting[0]
    for d in fitting:
        if real_block_bytes(d) <= (2 << 20) and out_run_bytes(d) >= 1024:
            h_blk = d
            break
    # Guarantee >= 2 steps on a "parallel" axis even when B == 1 (v7x megacore).
    if B * (h // h_blk) < 2:
        smaller = [d for d in fitting if d < h_blk and out_run_bytes(d) >= 1024]
        if smaller:
            h_blk = smaller[0]
    n_hb = h // h_blk

    def run(lane_dense):
        vmem_limit = int(min(
            max(2 * padded_block_bytes(h_blk, lane_dense) + (4 << 20), 16 << 20),
            vmem_limit_cap))
        if lane_dense:
            xin = x.reshape(B, h, p, w, p * C)               # free row-major view
            kernel = _patchify_kernel_lane_dense
            in_spec = pl.BlockSpec((None, h_blk, p, w, p * C),
                                   lambda b, hb: (b, hb, 0, 0, 0))
            out_spec = pl.BlockSpec((None, p, p, h_blk, w * C),
                                    lambda b, hb: (b, 0, 0, hb, 0))
            out_shape = jax.ShapeDtypeStruct((B, p, p, h, w * C), x.dtype)
        else:
            xin = x.reshape(B, h, p, w, p, C)
            kernel = _patchify_kernel_sliced
            in_spec = pl.BlockSpec((None, h_blk, p, w, p, C),
                                   lambda b, hb: (b, hb, 0, 0, 0, 0))
            out_spec = pl.BlockSpec((None, p, p, h_blk, w, C),
                                    lambda b, hb: (b, 0, 0, hb, 0, 0))
            out_shape = jax.ShapeDtypeStruct((B, p, p, h, w, C), x.dtype)
        out = pl.pallas_call(
            kernel,
            out_shape=out_shape,
            grid=(B, n_hb),
            in_specs=[in_spec],
            out_specs=out_spec,
            compiler_params=pltpu.CompilerParams(
                dimension_semantics=("parallel", "parallel"),
                vmem_limit_bytes=vmem_limit),
        )(xin)
        return out.reshape(B, p * p, h, w, C)                # free row-major view

    key = (tuple(x.shape), str(x.dtype), int(p))
    if _LANE_DENSE_OK.get(key, True):
        try:
            out = run(lane_dense=True)
            if key not in _LANE_DENSE_OK:
                jax.block_until_ready(out)                   # surface compile errors once
                _LANE_DENSE_OK[key] = True
            return out
        except Exception:
            _LANE_DENSE_OK[key] = False
    return run(lane_dense=False)


def patchify_reference(x, p=8):
    B, H, W, C = x.shape
    h, w = H // p, W // p
    return (x.reshape(B, h, p, w, p, C)
             .transpose(0, 2, 4, 1, 3, 5)
             .reshape(B, p * p, h, w, C))


if __name__ == "__main__":
    key = jax.random.PRNGKey(0)
    k0, k1 = jax.random.split(key)

    # Small shapes consistent with the module: p=8, h=w=2 -> H=W=16, C=4, B=2.
    B, H, W, C = 2, 16, 16, 4
    x = jax.random.normal(k0, (B, H, W, C), dtype=jnp.float32)
    out = jax.block_until_ready(patchify(x, p=8))
    ref = patchify_reference(x, p=8)
    assert out.shape == (B, 64, 2, 2, C), out.shape
    assert jnp.array_equal(out, ref), "Pallas patchify mismatch vs reference"

    # Second case: odd channel count (C=3), B=1, more patches (h=w=4).
    x2 = jax.random.normal(k1, (1, 32, 32, 3), dtype=jnp.float32)
    out2 = jax.block_until_ready(patchify(x2, p=8))
    ref2 = patchify_reference(x2, p=8)
    assert out2.shape == (1, 64, 4, 4, 3), out2.shape
    assert jnp.array_equal(out2, ref2), "Pallas patchify mismatch (case 2)"

    print("KERNEL_OK")
</pallas_src>

<mosaic_0001>
module attributes {stable_mosaic.version = 11 : i64} {
  func.func @_patchify_kernel_lane_dense(%arg0: i32, %arg1: i32, %arg2: memref<1x2x8x2x32xf32, #tpu.memory_space<vmem>>, %arg3: memref<1x8x8x2x8xf32, #tpu.memory_space<vmem>>) attributes {dimension_semantics = [#tpu.dimension_semantics<parallel>, #tpu.dimension_semantics<parallel>], iteration_bounds = array<i64: 2, 1>, scalar_prefetch = 0 : i64, scratch_operands = 0 : i64, tpu.core_type = #tpu.core_type<tc>, window_params = [{transform_indices = @transform_0, window_bounds = array<i64: 1, 2, 8, 2, 32>}, {transform_indices = @transform_1, window_bounds = array<i64: 1, 8, 8, 2, 8>}]} {
    %c0 = arith.constant 0 : index
    %c0_0 = arith.constant 0 : index
    %c0_1 = arith.constant 0 : index
    %c0_2 = arith.constant 0 : index
    %c0_3 = arith.constant 0 : index
    %0 = vector.load %arg2[%c0, %c0_0, %c0_1, %c0_2, %c0_3] : memref<1x2x8x2x32xf32, #tpu.memory_space<vmem>>, vector<1x2x1x2x4xf32>
    %1 = vector.shape_cast %0 : vector<1x2x1x2x4xf32> to vector<2x2x4xf32>
    %2 = vector.shape_cast %1 : vector<2x2x4xf32> to vector<2x8xf32>
    %c0_4 = arith.constant 0 : index
    %c0_5 = arith.constant 0 : index
    %c0_6 = arith.constant 0 : index
    %c0_7 = arith.constant 0 : index
    %c0_8 = arith.constant 0 : index
    %3 = vector.load %arg3[%c0_4, %c0_5, %c0_6, %c0_7, %c0_8] : memref<1x8x8x2x8xf32, #tpu.memory_space<vmem>>, vector<1x1x1x2x8xf32>
    %4 = vector.shape_cast %3 : vector<1x1x1x2x8xf32> to vector<2x8xf32>
    %5 = vector.shape_cast %2 : vector<2x8xf32> to vector<1x1x1x2x8xf32>
    tpu.vector_store %arg3[%c0_4, %c0_5, %c0_6, %c0_7, %c0_8], %5 {strides = array<i32>} : memref<1x8x8x2x8xf32, #tpu.memory_space<vmem>>, vector<1x1x1x2x8xf32>,
    %c0_9 = arith.constant 0 : index
    %c0_10 = arith.constant 0 : index
    %c0_11 = arith.constant 0 : index
    %c0_12 = arith.constant 0 : index
    %c4 = arith.constant 4 : index
    %6 = vector.load %arg2[%c0_9, %c0_10, %c0_11, %c0_12, %c4] : memref<1x2x8x2x32xf32, #tpu.memory_space<vmem>>, vector<1x2x1x2x4xf32>
    %7 = vector.shape_cast %6 : vector<1x2x1x2x4xf32> to vector<2x2x4xf32>
    %8 = vector.shape_cast %7 : vector<2x2x4xf32> to vector<2x8xf32>
    %c0_13 = arith.constant 0 : index
    %c0_14 = arith.constant 0 : index
    %c1 = arith.constant 1 : index
    %c0_15 = arith.constant 0 : index
    %c0_16 = arith.constant 0 : index
    %9 = vector.load %arg3[%c0_13, %c0_14, %c1, %c0_15, %c0_16] : memref<1x8x8x2x8xf32, #tpu.memory_space<vmem>>, vector<1x1x1x2x8xf32>
    %10 = vector.shape_cast %9 : vector<1x1x1x2x8xf32> to vector<2x8xf32>
    %11 = vector.shape_cast %8 : vector<2x8xf32> to vector<1x1x1x2x8xf32>
    tpu.vector_store %arg3[%c0_13, %c0_14, %c1, %c0_15, %c0_16], %11 {strides = array<i32>} : memref<1x8x8x2x8xf32, #tpu.memory_space<vmem>>, vector<1x1x1x2x8xf32>,
    %c0_17 = arith.constant 0 : index
    %c0_18 = arith.constant 0 : index
    %c0_19 = arith.constant 0 : index
    %c0_20 = arith.constant 0 : index
    %c8 = arith.constant 8 : index
    %12 = vector.load %arg2[%c0_17, %c0_18, %c0_19, %c0_20, %c8] : memref<1x2x8x2x32xf32, #tpu.memory_space<vmem>>, vector<1x2x1x2x4xf32>
    %13 = vector.shape_cast %12 : vector<1x2x1x2x4xf32> to vector<2x2x4xf32>
    %14 = vector.shape_cast %13 : vector<2x2x4xf32> to vector<2x8xf32>
    %c0_21 = arith.constant 0 : index
    %c0_22 = arith.constant 0 : index
    %c2 = arith.constant 2 : index
    %c0_23 = arith.constant 0 : index
    %c0_24 = arith.constant 0 : index
    %15 = vector.load %arg3[%c0_21, %c0_22, %c2, %c0_23, %c0_24] : memref<1x8x8x2x8xf32, #tpu.memory_space<vmem>>, vector<1x1x1x2x8xf32>
    %16 = vector.shape_cast %15 : vector<1x1x1x2x8xf32> to vector<2x8xf32>
    %17 = vector.shape_cast %14 : vector<2x8xf32> to vector<1x1x1x2x8xf32>
    tpu.vector_store %arg3[%c0_21, %c0_22, %c2, %c0_23, %c0_24], %17 {strides = array<i32>} : memref<1x8x8x2x8xf32, #tpu.memory_space<vmem>>, vector<1x1x1x2x8xf32>,
    %c0_25 = arith.constant 0 : index
    %c0_26 = arith.constant 0 : index
    %c0_27 = arith.constant 0 : index
    %c0_28 = arith.constant 0 : index
    %c12 = arith.constant 12 : index
    %18 = vector.load %arg2[%c0_25, %c0_26, %c0_27, %c0_28, %c12] : memref<1x2x8x2x32xf32, #tpu.memory_space<vmem>>, vector<1x2x1x2x4xf32>
    %19 = vector.shape_cast %18 : vector<1x2x1x2x4xf32> to vector<2x2x4xf32>
    %20 = vector.shape_cast %19 : vector<2x2x4xf32> to vector<2x8xf32>
    %c0_29 = arith.constant 0 : index
    %c0_30 = arith.constant 0 : index
    %c3 = arith.constant 3 : index
    %c0_31 = arith.constant 0 : index
    %c0_32 = arith.constant 0 : index
    %21 = vector.load %arg3[%c0_29, %c0_30, %c3, %c0_31, %c0_32] : memref<1x8x8x2x8xf32, #tpu.memory_space<vmem>>, vector<1x1x1x2x8xf32>
    %22 = vector.shape_cast %21 : vector<1x1x1x2x8xf32> to vector<2x8xf32>
    %23 = vector.shape_cast %20 : vector<2x8xf32> to vector<1x1x1x2x8xf32>
    tpu.vector_store %arg3[%c0_29, %c0_30, %c3, %c0_31, %c0_32], %23 {strides = array<i32>} : memref<1x8x8x2x8xf32, #tpu.memory_space<vmem>>, vector<1x1x1x2x8xf32>,
    %c0_33 = arith.constant 0 : index
    %c0_34 = arith.constant 0 : index
    %c0_35 = arith.constant 0 : index
    %c0_36 = arith.constant 0 : index
    %c16 = arith.constant 16 : index
    %24 = vector.load %arg2[%c0_33, %c0_34, %c0_35, %c0_36, %c16] : memref<1x2x8x2x32xf32, #tpu.memory_space<vmem>>, vector<1x2x1x2x4xf32>
    %25 = vector.shape_cast %24 : vector<1x2x1x2x4xf32> to vector<2x2x4xf32>
    %26 = vector.shape_cast %25 : vector<2x2x4xf32> to vector<2x8xf32>
    %c0_37 = arith.constant 0 : index
    %c0_38 = arith.constant 0 : index
    %c4_39 = arith.constant 4 : index
    %c0_40 = arith.constant 0 : index
    %c0_41 = arith.constant 0 : index
    %27 = vector.load %arg3[%c0_37, %c0_38, %c4_39, %c0_40, %c0_41] : memref<1x8x8x2x8xf32, #tpu.memory_space<vmem>>, vector<1x1x1x2x8xf32>
    %28 = vector.shape_cast %27 : vector<1x1x1x2x8xf32> to vector<2x8xf32>
    %29 = vector.shape_cast %26 : vector<2x8xf32> to vector<1x1x1x2x8xf32>
    tpu.vector_store %arg3[%c0_37, %c0_38, %c4_39, %c0_40, %c0_41], %29 {strides = array<i32>} : memref<1x8x8x2x8xf32, #tpu.memory_space<vmem>>, vector<1x1x1x2x8xf32>,
    %c0_42 = arith.constant 0 : index
    %c0_43 = arith.constant 0 : index
    %c0_44 = arith.constant 0 : index
    %c0_45 = arith.constant 0 : index
    %c20 = arith.constant 20 : index
    %30 = vector.load %arg2[%c0_42, %c0_43, %c0_44, %c0_45, %c20] : memref<1x2x8x2x32xf32, #tpu.memory_space<vmem>>, vector<1x2x1x2x4xf32>
    %31 = vector.shape_cast %30 : vector<1x2x1x2x4xf32> to vector<2x2x4xf32>
    %32 = vector.shape_cast %31 : vector<2x2x4xf32> to vector<2x8xf32>
    %c0_46 = arith.constant 0 : index
    %c0_47 = arith.constant 0 : index
    %c5 = arith.constant 5 : index
    %c0_48 = arith.constant 0 : index
    %c0_49 = arith.constant 0 : index
    %33 = vector.load %arg3[%c0_46, %c0_47, %c5, %c0_48, %c0_49] : memref<1x8x8x2x8xf32, #tpu.memory_space<vmem>>, vector<1x1x1x2x8xf32>
    %34 = vector.shape_cast %33 : vector<1x1x1x2x8xf32> to vector<2x8xf32>
    %35 = vector.shape_cast %32 : vector<2x8xf32> to vector<1x1x1x2x8xf32>
    tpu.vector_store %arg3[%c0_46, %c0_47, %c5, %c0_48, %c0_49], %35 {strides = array<i32>} : memref<1x8x8x2x8xf32, #tpu.memory_space<vmem>>, vector<1x1x1x2x8xf32>,
    %c0_50 = arith.constant 0 : index
    %c0_51 = arith.constant 0 : index
    %c0_52 = arith.constant 0 : index
    %c0_53 = arith.constant 0 : index
    %c24 = arith.constant 24 : index
    %36 = vector.load %arg2[%c0_50, %c0_51, %c0_52, %c0_53, %c24] : memref<1x2x8x2x32xf32, #tpu.memory_space<vmem>>, vector<1x2x1x2x4xf32>
    %37 = vector.shape_cast %36 : vector<1x2x1x2x4xf32> to vector<2x2x4xf32>
    %38 = vector.shape_cast %37 : vector<2x2x4xf32> to vector<2x8xf32>
    %c0_54 = arith.constant 0 : index
    %c0_55 = arith.constant 0 : index
    %c6 = arith.constant 6 : index
    %c0_56 = arith.constant 0 : index
    %c0_57 = arith.constant 0 : index
    %39 = vector.load %arg3[%c0_54, %c0_55, %c6, %c0_56, %c0_57] : memref<1x8x8x2x8xf32, #tpu.memory_space<vmem>>, vector<1x1x1x2x8xf32>
    %40 = vector.shape_cast %39 : vector<1x1x1x2x8xf32> to vector<2x8xf32>
    %41 = vector.shape_cast %38 : vector<2x8xf32> to vector<1x1x1x2x8xf32>
    tpu.vector_store %arg3[%c0_54, %c0_55, %c6, %c0_56, %c0_57], %41 {strides = array<i32>} : memref<1x8x8x2x8xf32, #tpu.memory_space<vmem>>, vector<1x1x1x2x8xf32>,
    %c0_58 = arith.constant 0 : index
    %c0_59 = arith.constant 0 : index
    %c0_60 = arith.constant 0 : index
    %c0_61 = arith.constant 0 : index
    %c28 = arith.constant 28 : index
    %42 = vector.load %arg2[%c0_58, %c0_59, %c0_60, %c0_61, %c28] : memref<1x2x8x2x32xf32, #tpu.memory_space<vmem>>, vector<1x2x1x2x4xf32>
    %43 = vector.shape_cast %42 : vector<1x2x1x2x4xf32> to vector<2x2x4xf32>
    %44 = vector.shape_cast %43 : vector<2x2x4xf32> to vector<2x8xf32>
    %c0_62 = arith.constant 0 : index
    %c0_63 = arith.constant 0 : index
    %c7 = arith.constant 7 : index
    %c0_64 = arith.constant 0 : index
    %c0_65 = arith.constant 0 : index
    %45 = vector.load %arg3[%c0_62, %c0_63, %c7, %c0_64, %c0_65] : memref<1x8x8x2x8xf32, #tpu.memory_space<vmem>>, vector<1x1x1x2x8xf32>
    %46 = vector.shape_cast %45 : vector<1x1x1x2x8xf32> to vector<2x8xf32>
    %47 = vector.shape_cast %44 : vector<2x8xf32> to vector<1x1x1x2x8xf32>
    tpu.vector_store %arg3[%c0_62, %c0_63, %c7, %c0_64, %c0_65], %47 {strides = array<i32>} : memref<1x8x8x2x8xf32, #tpu.memory_space<vmem>>, vector<1x1x1x2x8xf32>,
    %c0_66 = arith.constant 0 : index
    %c0_67 = arith.constant 0 : index
    %c1_68 = arith.constant 1 : index
    %c0_69 = arith.constant 0 : index
    %c0_70 = arith.constant 0 : index
    %48 = vector.load %arg2[%c0_66, %c0_67, %c1_68, %c0_69, %c0_70] : memref<1x2x8x2x32xf32, #tpu.memory_space<vmem>>, vector<1x2x1x2x4xf32>
    %49 = vector.shape_cast %48 : vector<1x2x1x2x4xf32> to vector<2x2x4xf32>
    %50 = vector.shape_cast %49 : vector<2x2x4xf32> to vector<2x8xf32>
    %c0_71 = arith.constant 0 : index
    %c1_72 = arith.constant 1 : index
    %c0_73 = arith.constant 0 : index
    %c0_74 = arith.constant 0 : index
    %c0_75 = arith.constant 0 : index
    %51 = vector.load %arg3[%c0_71, %c1_72, %c0_73, %c0_74, %c0_75] : memref<1x8x8x2x8xf32, #tpu.memory_space<vmem>>, vector<1x1x1x2x8xf32>
    %52 = vector.shape_cast %51 : vector<1x1x1x2x8xf32> to vector<2x8xf32>
    %53 = vector.shape_cast %50 : vector<2x8xf32> to vector<1x1x1x2x8xf32>
    tpu.vector_store %arg3[%c0_71, %c1_72, %c0_73, %c0_74, %c0_75], %53 {strides = array<i32>} : memref<1x8x8x2x8xf32, #tpu.memory_space<vmem>>, vector<1x1x1x2x8xf32>,
    %c0_76 = arith.constant 0 : index
    %c0_77 = arith.constant 0 : index
    %c1_78 = arith.constant 1 : index
    %c0_79 = arith.constant 0 : index
    %c4_80 = arith.constant 4 : index
    %54 = vector.load %arg2[%c0_76, %c0_77, %c1_78, %c0_79, %c4_80] : memref<1x2x8x2x32xf32, #tpu.memory_space<vmem>>, vector<1x2x1x2x4xf32>
    %55 = vector.shape_cast %54 : vector<1x2x1x2x4xf32> to vector<2x2x4xf32>
    %56 = vector.shape_cast %55 : vector<2x2x4xf32> to vector<2x8xf32>
    %c0_81 = arith.constant 0 : index
    %c1_82 = arith.constant 1 : index
    %c1_83 = arith.constant 1 : index
    %c0_84 = arith.constant 0 : index
    %c0_85 = arith.constant 0 : index
    %57 = vector.load %arg3[%c0_81, %c1_82, %c1_83, %c0_84, %c0_85] : memref<1x8x8x2x8xf32, #tpu.memory_space<vmem>>, vector<1x1x1x2x8xf32>
    %58 = vector.shape_cast %57 : vector<1x1x1x2x8xf32> to vector<2x8xf32>
    %59 = vector.shape_cast %56 : vector<2x8xf32> to vector<1x1x1x2x8xf32>
    tpu.vector_store %arg3[%c0_81, %c1_82, %c1_83, %c0_84, %c0_85], %59 {strides = array<i32>} : memref<1x8x8x2x8xf32, #tpu.memory_space<vmem>>, vector<1x1x1x2x8xf32>,
    %c0_86 = arith.constant 0 : index
    %c0_87 = arith.constant 0 : index
    %c1_88 = arith.constant 1 : index
    %c0_89 = arith.constant 0 : index
    %c8_90 = arith.constant 8 : index
    %60 = vector.load %arg2[%c0_86, %c0_87, %c1_88, %c0_89, %c8_90] : memref<1x2x8x2x32xf32, #tpu.memory_space<vmem>>, vector<1x2x1x2x4xf32>
    %61 = vector.shape_cast %60 : vector<1x2x1x2x4xf32> to vector<2x2x4xf32>
    %62 = vector.shape_cast %61 : vector<2x2x4xf32> to vector<2x8xf32>
    %c0_91 = arith.constant 0 : index
    %c1_92 = arith.constant 1 : index
    %c2_93 = arith.constant 2 : index
    %c0_94 = arith.constant 0 : index
    %c0_95 = arith.constant 0 : index
    %63 = vector.load %arg3[%c0_91, %c1_92, %c2_93, %c0_94, %c0_95] : memref<1x8x8x2x8xf32, #tpu.memory_space<vmem>>, vector<1x1x1x2x8xf32>
    %64 = vector.shape_cast %63 : vector<1x1x1x2x8xf32> to vector<2x8xf32>
    %65 = vector.shape_cast %62 : vector<2x8xf32> to vector<1x1x1x2x8xf32>
    tpu.vector_store %arg3[%c0_91, %c1_92, %c2_93, %c0_94, %c0_95], %65 {strides = array<i32>} : memref<1x8x8x2x8xf32, #tpu.memory_space<vmem>>, vector<1x1x1x2x8xf32>,
    %c0_96 = arith.constant 0 : index
    %c0_97 = arith.constant 0 : index
    %c1_98 = arith.constant 1 : index
    %c0_99 = arith.constant 0 : index
    %c12_100 = arith.constant 12 : index
    %66 = vector.load %arg2[%c0_96, %c0_97, %c1_98, %c0_99, %c12_100] : memref<1x2x8x2x32xf32, #tpu.memory_space<vmem>>, vector<1x2x1x2x4xf32>
    %67 = vector.shape_cast %66 : vector<1x2x1x2x4xf32> to vector<2x2x4xf32>
    %68 = vector.shape_cast %67 : vector<2x2x4xf32> to vector<2x8xf32>
    %c0_101 = arith.constant 0 : index
    %c1_102 = arith.constant 1 : index
    %c3_103 = arith.constant 3 : index
    %c0_104 = arith.constant 0 : index
    %c0_105 = arith.constant 0 : index
    %69 = vector.load %arg3[%c0_101, %c1_102, %c3_103, %c0_104, %c0_105] : memref<1x8x8x2x8xf32, #tpu.memory_space<vmem>>, vector<1x1x1x2x8xf32>
    %70 = vector.shape_cast %69 : vector<1x1x1x2x8xf32> to vector<2x8xf32>
    %71 = vector.shape_cast %68 : vector<2x8xf32> to vector<1x1x1x2x8xf32>
    tpu.vector_store %arg3[%c0_101, %c1_102, %c3_103, %c0_104, %c0_105], %71 {strides = array<i32>} : memref<1x8x8x2x8xf32, #tpu.memory_space<vmem>>, vector<1x1x1x2x8xf32>,
    %c0_106 = arith.constant 0 : index
    %c0_107 = arith.constant 0 : index
    %c1_108 = arith.constant 1 : index
    %c0_109 = arith.constant 0 : index
    %c16_110 = arith.constant 16 : index
    %72 = vector.load %arg2[%c0_106, %c0_107, %c1_108, %c0_109, %c16_110] : memref<1x2x8x2x32xf32, #tpu.memory_space<vmem>>, vector<1x2x1x2x4xf32>
    %73 = vector.shape_cast %72 : vector<1x2x1x2x4xf32> to vector<2x2x4xf32>
    %74 = vector.shape_cast %73 : vector<2x2x4xf32> to vector<2x8xf32>
    %c0_111 = arith.constant 0 : index
    %c1_112 = arith.constant 1 : index
    %c4_113 = arith.constant 4 : index
    %c0_114 = arith.constant 0 : index
    %c0_115 = arith.constant 0 : index
    %75 = vector.load %arg3[%c0_111, %c1_112, %c4_113, %c0_114, %c0_115] : memref<1x8x8x2x8xf32, #tpu.memory_space<vmem>>, vector<1x1x1x2x8xf32>
    %76 = vector.shape_cast %75 : vector<1x1x1x2x8xf32> to vector<2x8xf32>
    %77 = vector.shape_cast %74 : vector<2x8xf32> to vector<1x1x1x2x8xf32>
    tpu.vector_store %arg3[%c0_111, %c1_112, %c4_113, %c0_114, %c0_115], %77 {strides = array<i32>} : memref<1x8x8x2x8xf32, #tpu.memory_space<vmem>>, vector<1x1x1x2x8xf32>,
    %c0_116 = arith.constant 0 : index
    %c0_117 = arith.constant 0 : index
    %c1_118 = arith.constant 1 : index
    %c0_119 = arith.constant 0 : index
    %c20_120 = arith.constant 20 : index
    %78 = vector.load %arg2[%c0_116, %c0_117, %c1_118, %c0_119, %c20_120] : memref<1x2x8x2x32xf32, #tpu.memory_space<vmem>>, vector<1x2x1x2x4xf32>
    %79 = vector.shape_cast %78 : vector<1x2x1x2x4xf32> to vector<2x2x4xf32>
    %80 = vector.shape_cast %79 : vector<2x2x4xf32> to vector<2x8xf32>
    %c0_121 = arith.constant 0 : index
    %c1_122 = arith.constant 1 : index
    %c5_123 = arith.constant 5 : index
    %c0_124 = arith.constant 0 : index
    %c0_125 = arith.constant 0 : index
    %81 = vector.load %arg3[%c0_121, %c1_122, %c5_123, %c0_124, %c0_125] : memref<1x8x8x2x8xf32, #tpu.memory_space<vmem>>, vector<1x1x1x2x8xf32>
    %82 = vector.shape_cast %81 : vector<1x1x1x2x8xf32> to vector<2x8xf32>
    %83 = vector.shape_cast %80 : vector<2x8xf32> to vector<1x1x1x2x8xf32>
    tpu.vector_store %arg3[%c0_121, %c1_122, %c5_123, %c0_124, %c0_125], %83 {strides = array<i32>} : memref<1x8x8x2x8xf32, #tpu.memory_space<vmem>>, vector<1x1x1x2x8xf32>,
    %c0_126 = arith.constant 0 : index
    %c0_127 = arith.constant 0 : index
    %c1_128 = arith.constant 1 : index
    %c0_129 = arith.constant 0 : index
    %c24_130 = arith.constant 24 : index
    %84 = vector.load %arg2[%c0_126, %c0_127, %c1_128, %c0_129, %c24_130] : memref<1x2x8x2x32xf32, #tpu.memory_space<vmem>>, vector<1x2x1x2x4xf32>
    %85 = vector.shape_cast %84 : vector<1x2x1x2x4xf32> to vector<2x2x4xf32>
    %86 = vector.shape_cast %85 : vector<2x2x4xf32> to vector<2x8xf32>
    %c0_131 = arith.constant 0 : index
    %c1_132 = arith.constant 1 : index
    %c6_133 = arith.constant 6 : index
    %c0_134 = arith.constant 0 : index
    %c0_135 = arith.constant 0 : index
    %87 = vector.load %arg3[%c0_131, %c1_132, %c6_133, %c0_134, %c0_135] : memref<1x8x8x2x8xf32, #tpu.memory_space<vmem>>, vector<1x1x1x2x8xf32>
    %88 = vector.shape_cast %87 : vector<1x1x1x2x8xf32> to vector<2x8xf32>
    %89 = vector.shape_cast %86 : vector<2x8xf32> to vector<1x1x1x2x8xf32>
    tpu.vector_store %arg3[%c0_131, %c1_132, %c6_133, %c0_134, %c0_135], %89 {strides = array<i32>} : memref<1x8x8x2x8xf32, #tpu.memory_space<vmem>>, vector<1x1x1x2x8xf32>,
    %c0_136 = arith.constant 0 : index
    %c0_137 = arith.constant 0 : index
    %c1_138 = arith.constant 1 : index
    %c0_139 = arith.constant 0 : index
    %c28_140 = arith.constant 28 : index
    %90 = vector.load %arg2[%c0_136, %c0_137, %c1_138, %c0_139, %c28_140] : memref<1x2x8x2x32xf32, #tpu.memory_space<vmem>>, vector<1x2x1x2x4xf32>
    %91 = vector.shape_cast %90 : vector<1x2x1x2x4xf32> to vector<2x2x4xf32>
    %92 = vector.shape_cast %91 : vector<2x2x4xf32> to vector<2x8xf32>
    %c0_141 = arith.constant 0 : index
    %c1_142 = arith.constant 1 : index
    %c7_143 = arith.constant 7 : index
    %c0_144 = arith.constant 0 : index
    %c0_145 = arith.constant 0 : index
    %93 = vector.load %arg3[%c0_141, %c1_142, %c7_143, %c0_144, %c0_145] : memref<1x8x8x2x8xf32, #tpu.memory_space<vmem>>, vector<1x1x1x2x8xf32>
    %94 = vector.shape_cast %93 : vector<1x1x1x2x8xf32> to vector<2x8xf32>
    %95 = vector.shape_cast %92 : vector<2x8xf32> to vector<1x1x1x2x8xf32>
    tpu.vector_store %arg3[%c0_141, %c1_142, %c7_143, %c0_144, %c0_145], %95 {strides = array<i32>} : memref<1x8x8x2x8xf32, #tpu.memory_space<vmem>>, vector<1x1x1x2x8xf32>,
    %c0_146 = arith.constant 0 : index
    %c0_147 = arith.constant 0 : index
    %c2_148 = arith.constant 2 : index
    %c0_149 = arith.constant 0 : index
    %c0_150 = arith.constant 0 : index
    %96 = vector.load %arg2[%c0_146, %c0_147, %c2_148, %c0_149, %c0_150] : memref<1x2x8x2x32xf32, #tpu.memory_space<vmem>>, vector<1x2x1x2x4xf32>
    %97 = vector.shape_cast %96 : vector<1x2x1x2x4xf32> to vector<2x2x4xf32>
    %98 = vector.shape_cast %97 : vector<2x2x4xf32> to vector<2x8xf32>
    %c0_151 = arith.constant 0 : index
    %c2_152 = arith.constant 2 : index
    %c0_153 = arith.constant 0 : index
    %c0_154 = arith.constant 0 : index
    %c0_155 = arith.constant 0 : index
    %99 = vector.load %arg3[%c0_151, %c2_152, %c0_153, %c0_154, %c0_155] : memref<1x8x8x2x8xf32, #tpu.memory_space<vmem>>, vector<1x1x1x2x8xf32>
    %100 = vector.shape_cast %99 : vector<1x1x1x2x8xf32> to vector<2x8xf32>
    %101 = vector.shape_cast %98 : vector<2x8xf32> to vector<1x1x1x2x8xf32>
    tpu.vector_store %arg3[%c0_151, %c2_152, %c0_153, %c0_154, %c0_155], %101 {strides = array<i32>} : memref<1x8x8x2x8xf32, #tpu.memory_space<vmem>>, vector<1x1x1x2x8xf32>,
    %c0_156 = arith.constant 0 : index
    %c0_157 = arith.constant 0 : index
    %c2_158 = arith.constant 2 : index
    %c0_159 = arith.constant 0 : index
    %c4_160 = arith.constant 4 : index
    %102 = vector.load %arg2[%c0_156, %c0_157, %c2_158, %c0_159, %c4_160] : memref<1x2x8x2x32xf32, #tpu.memory_space<vmem>>, vector<1x2x1x2x4xf32>
    %103 = vector.shape_cast %102 : vector<1x2x1x2x4xf32> to vector<2x2x4xf32>
    %104 = vector.shape_cast %103 : vector<2x2x4xf32> to vector<2x8xf32>
    %c0_161 = arith.constant 0 : index
    %c2_162 = arith.constant 2 : index
    %c1_163 = arith.constant 1 : index
    %c0_164 = arith.constant 0 : index
    %c0_165 = arith.constant 0 : index
    %105 = vector.load %arg3[%c0_161, %c2_162, %c1_163, %c0_164, %c0_165] : memref<1x8x8x2x8xf32, #tpu.memory_space<vmem>>, vector<1x1x1x2x8xf32>
    %106 = vector.shape_cast %105 : vector<1x1x1x2x8xf32> to vector<2x8xf32>
    %107 = vector.shape_cast %104 : vector<2x8xf32> to vector<1x1x1x2x8xf32>
    tpu.vector_store %arg3[%c0_161, %c2_162, %c1_163, %c0_164, %c0_165], %107 {strides = array<i32>} : memref<1x8x8x2x8xf32, #tpu.memory_space<vmem>>, vector<1x1x1x2x8xf32>,
    %c0_166 = arith.constant 0 : index
    %c0_167 = arith.constant 0 : index
    %c2_168 = arith.constant 2 : index
    %c0_169 = arith.constant 0 : index
    %c8_170 = arith.constant 8 : index
    %108 = vector.load %arg2[%c0_166, %c0_167, %c2_168, %c0_169, %c8_170] : memref<1x2x8x2x32xf32, #tpu.memory_space<vmem>>, vector<1x2x1x2x4xf32>
    %109 = vector.shape_cast %108 : vector<1x2x1x2x4xf32> to vector<2x2x4xf32>
    %110 = vector.shape_cast %109 : vector<2x2x4xf32> to vector<2x8xf32>
    %c0_171 = arith.constant 0 : index
    %c2_172 = arith.constant 2 : index
    %c2_173 = arith.constant 2 : index
    %c0_174 = arith.constant 0 : index
    %c0_175 = arith.constant 0 : index
    %111 = vector.load %arg3[%c0_171, %c2_172, %c2_173, %c0_174, %c0_175] : memref<1x8x8x2x8xf32, #tpu.memory_space<vmem>>, vector<1x1x1x2x8xf32>
    %112 = vector.shape_cast %111 : vector<1x1x1x2x8xf32> to vector<2x8xf32>
    %113 = vector.shape_cast %110 : vector<2x8xf32> to vector<1x1x1x2x8xf32>
    tpu.vector_store %arg3[%c0_171, %c2_172, %c2_173, %c0_174, %c0_175], %113 {strides = array<i32>} : memref<1x8x8x2x8xf32, #tpu.memory_space<vmem>>, vector<1x1x1x2x8xf32>,
    %c0_176 = arith.constant 0 : index
    %c0_177 = arith.constant 0 : index
    %c2_178 = arith.constant 2 : index
    %c0_179 = arith.constant 0 : index
    %c12_180 = arith.constant 12 : index
    %114 = vector.load %arg2[%c0_176, %c0_177, %c2_178, %c0_179, %c12_180] : memref<1x2x8x2x32xf32, #tpu.memory_space<vmem>>, vector<1x2x1x2x4xf32>
    %115 = vector.shape_cast %114 : vector<1x2x1x2x4xf32> to vector<2x2x4xf32>
    %116 = vector.shape_cast %115 : vector<2x2x4xf32> to vector<2x8xf32>
    %c0_181 = arith.constant 0 : index
    %c2_182 = arith.constant 2 : index
    %c3_183 = arith.constant 3 : index
    %c0_184 = arith.constant 0 : index
    %c0_185 = arith.constant 0 : index
    %117 = vector.load %arg3[%c0_181, %c2_182, %c3_183, %c0_184, %c0_185] : memref<1x8x8x2x8xf32, #tpu.memory_space<vmem>>, vector<1x1x1x2x8xf32>
    %118 = vector.shape_cast %117 : vector<1x1x1x2x8xf32> to vector<2x8xf32>
    %119 = vector.shape_cast %116 : vector<2x8xf32> to vector<1x1x1x2x8xf32>
    tpu.vector_store %arg3[%c0_181, %c2_182, %c3_183, %c0_184, %c0_185], %119 {strides = array<i32>} : memref<1x8x8x2x8xf32, #tpu.memory_space<vmem>>, vector<1x1x1x2x8xf32>,
    %c0_186 = arith.constant 0 : index
    %c0_187 = arith.constant 0 : index
    %c2_188 = arith.constant 2 : index
    %c0_189 = arith.constant 0 : index
    %c16_190 = arith.constant 16 : index
    %120 = vector.load %arg2[%c0_186, %c0_187, %c2_188, %c0_189, %c16_190] : memref<1x2x8x2x32xf32, #tpu.memory_space<vmem>>, vector<1x2x1x2x4xf32>
    %121 = vector.shape_cast %120 : vector<1x2x1x2x4xf32> to vector<2x2x4xf32>
    %122 = vector.shape_cast %121 : vector<2x2x4xf32> to vector<2x8xf32>
    %c0_191 = arith.constant 0 : index
    %c2_192 = arith.constant 2 : index
    %c4_193 = arith.constant 4 : index
    %c0_194 = arith.constant 0 : index
    %c0_195 = arith.constant 0 : index
    %123 = vector.load %arg3[%c0_191, %c2_192, %c4_193, %c0_194, %c0_195] : memref<1x8x8x2x8xf32, #tpu.memory_space<vmem>>, vector<1x1x1x2x8xf32>
    %124 = vector.shape_cast %123 : vector<1x1x1x2x8xf32> to vector<2x8xf32>
    %125 = vector.shape_cast %122 : vector<2x8xf32> to vector<1x1x1x2x8xf32>
    tpu.vector_store %arg3[%c0_191, %c2_192, %c4_193, %c0_194, %c0_195], %125 {strides = array<i32>} : memref<1x8x8x2x8xf32, #tpu.memory_space<vmem>>, vector<1x1x1x2x8xf32>,
    %c0_196 = arith.constant 0 : index
    %c0_197 = arith.constant 0 : index
    %c2_198 = arith.constant 2 : index
    %c0_199 = arith.constant 0 : index
    %c20_200 = arith.constant 20 : index
    %126 = vector.load %arg2[%c0_196, %c0_197, %c2_198, %c0_199, %c20_200] : memref<1x2x8x2x32xf32, #tpu.memory_space<vmem>>, vector<1x2x1x2x4xf32>
    %127 = vector.shape_cast %126 : vector<1x2x1x2x4xf32> to vector<2x2x4xf32>
    %128 = vector.shape_cast %127 : vector<2x2x4xf32> to vector<2x8xf32>
    %c0_201 = arith.constant 0 : index
    %c2_202 = arith.constant 2 : index
    %c5_203 = arith.constant 5 : index
    %c0_204 = arith.constant 0 : index
    %c0_205 = arith.constant 0 : index
    %129 = vector.load %arg3[%c0_201, %c2_202, %c5_203, %c0_204, %c0_205] : memref<1x8x8x2x8xf32, #tpu.memory_space<vmem>>, vector<1x1x1x2x8xf32>
    %130 = vector.shape_cast %129 : vector<1x1x1x2x8xf32> to vector<2x8xf32>
    %131 = vector.shape_cast %128 : vector<2x8xf32> to vector<1x1x1x2x8xf32>
    tpu.vector_store %arg3[%c0_201, %c2_202, %c5_203, %c0_204, %c0_205], %131 {strides = array<i32>} : memref<1x8x8x2x8xf32, #tpu.memory_space<vmem>>, vector<1x1x1x2x8xf32>,
    %c0_206 = arith.constant 0 : index
    %c0_207 = arith.constant 0 : index
    %c2_208 = arith.constant 2 : index
    %c0_209 = arith.constant 0 : index
    %c24_210 = arith.constant 24 : index
    %132 = vector.load %arg2[%c0_206, %c0_207, %c2_208, %c0_209, %c24_210] : memref<1x2x8x2x32xf32, #tpu.memory_space<vmem>>, vector<1x2x1x2x4xf32>
    %133 = vector.shape_cast %132 : vector<1x2x1x2x4xf32> to vector<2x2x4xf32>
    %134 = vector.shape_cast %133 : vector<2x2x4xf32> to vector<2x8xf32>
    %c0_211 = arith.constant 0 : index
    %c2_212 = arith.constant 2 : index
    %c6_213 = arith.constant 6 : index
    %c0_214 = arith.constant 0 : index
    %c0_215 = arith.constant 0 : index
    %135 = vector.load %arg3[%c0_211, %c2_212, %c6_213, %c0_214, %c0_215] : memref<1x8x8x2x8xf32, #tpu.memory_space<vmem>>, vector<1x1x1x2x8xf32>
    %136 = vector.shape_cast %135 : vector<1x1x1x2x8xf32> to vector<2x8xf32>
    %137 = vector.shape_cast %134 : vector<2x8xf32> to vector<1x1x1x2x8xf32>
    tpu.vector_store %arg3[%c0_211, %c2_212, %c6_213, %c0_214, %c0_215], %137 {strides = array<i32>} : memref<1x8x8x2x8xf32, #tpu.memory_space<vmem>>, vector<1x1x1x2x8xf32>,
    %c0_216 = arith.constant 0 : index
    %c0_217 = arith.constant 0 : index
    %c2_218 = arith.constant 2 : index
    %c0_219 = arith.constant 0 : index
    %c28_220 = arith.constant 28 : index
    %138 = vector.load %arg2[%c0_216, %c0_217, %c2_218, %c0_219, %c28_220] : memref<1x2x8x2x32xf32, #tpu.memory_space<vmem>>, vector<1x2x1x2x4xf32>
    %139 = vector.shape_cast %138 : vector<1x2x1x2x4xf32> to vector<2x2x4xf32>
    %140 = vector.shape_cast %139 : vector<2x2x4xf32> to vector<2x8xf32>
    %c0_221 = arith.constant 0 : index
    %c2_222 = arith.constant 2 : index
    %c7_223 = arith.constant 7 : index
    %c0_224 = arith.constant 0 : index
    %c0_225 = arith.constant 0 : index
    %141 = vector.load %arg3[%c0_221, %c2_222, %c7_223, %c0_224, %c0_225] : memref<1x8x8x2x8xf32, #tpu.memory_space<vmem>>, vector<1x1x1x2x8xf32>
    %142 = vector.shape_cast %141 : vector<1x1x1x2x8xf32> to vector<2x8xf32>
    %143 = vector.shape_cast %140 : vector<2x8xf32> to vector<1x1x1x2x8xf32>
    tpu.vector_store %arg3[%c0_221, %c2_222, %c7_223, %c0_224, %c0_225], %143 {strides = array<i32>} : memref<1x8x8x2x8xf32, #tpu.memory_space<vmem>>, vector<1x1x1x2x8xf32>,
    %c0_226 = arith.constant 0 : index
    %c0_227 = arith.constant 0 : index
    %c3_228 = arith.constant 3 : index
    %c0_229 = arith.constant 0 : index
    %c0_230 = arith.constant 0 : index
    %144 = vector.load %arg2[%c0_226, %c0_227, %c3_228, %c0_229, %c0_230] : memref<1x2x8x2x32xf32, #tpu.memory_space<vmem>>, vector<1x2x1x2x4xf32>
    %145 = vector.shape_cast %144 : vector<1x2x1x2x4xf32> to vector<2x2x4xf32>
    %146 = vector.shape_cast %145 : vector<2x2x4xf32> to vector<2x8xf32>
    %c0_231 = arith.constant 0 : index
    %c3_232 = arith.constant 3 : index
    %c0_233 = arith.constant 0 : index
    %c0_234 = arith.constant 0 : index
    %c0_235 = arith.constant 0 : index
    %147 = vector.load %arg3[%c0_231, %c3_232, %c0_233, %c0_234, %c0_235] : memref<1x8x8x2x8xf32, #tpu.memory_space<vmem>>, vector<1x1x1x2x8xf32>
    %148 = vector.shape_cast %147 : vector<1x1x1x2x8xf32> to vector<2x8xf32>
    %149 = vector.shape_cast %146 : vector<2x8xf32> to vector<1x1x1x2x8xf32>
    tpu.vector_store %arg3[%c0_231, %c3_232, %c0_233, %c0_234, %c0_235], %149 {strides = array<i32>} : memref<1x8x8x2x8xf32, #tpu.memory_space<vmem>>, vector<1x1x1x2x8xf32>,
    %c0_236 = arith.constant 0 : index
    %c0_237 = arith.constant 0 : index
    %c3_238 = arith.constant 3 : index
    %c0_239 = arith.constant 0 : index
    %c4_240 = arith.constant 4 : index
    %150 = vector.load %arg2[%c0_236, %c0_237, %c3_238, %c0_239, %c4_240] : memref<1x2x8x2x32xf32, #tpu.memory_space<vmem>>, vector<1x2x1x2x4xf32>
    %151 = vector.shape_cast %150 : vector<1x2x1x2x4xf32> to vector<2x2x4xf32>
    %152 = vector.shape_cast %151 : vector<2x2x4xf32> to vector<2x8xf32>
    %c0_241 = arith.constant 0 : index
    %c3_242 = arith.constant 3 : index
    %c1_243 = arith.constant 1 : index
    %c0_244 = arith.constant 0 : index
    %c0_245 = arith.constant 0 : index
    %153 = vector.load %arg3[%c0_241, %c3_242, %c1_243, %c0_244, %c0_245] : memref<1x8x8x2x8xf32, #tpu.memory_space<vmem>>, vector<1x1x1x2x8xf32>
    %154 = vector.shape_cast %153 : vector<1x1x1x2x8xf32> to vector<2x8xf32>
    %155 = vector.shape_cast %152 : vector<2x8xf32> to vector<1x1x1x2x8xf32>
    tpu.vector_store %arg3[%c0_241, %c3_242, %c1_243, %c0_244, %c0_245], %155 {strides = array<i32>} : memref<1x8x8x2x8xf32, #tpu.memory_space<vmem>>, vector<1x1x1x2x8xf32>,
    %c0_246 = arith.constant 0 : index
    %c0_247 = arith.constant 0 : index
    %c3_248 = arith.constant 3 : index
    %c0_249 = arith.constant 0 : index
    %c8_250 = arith.constant 8 : index
    %156 = vector.load %arg2[%c0_246, %c0_247, %c3_248, %c0_249, %c8_250] : memref<1x2x8x2x32xf32, #tpu.memory_space<vmem>>, vector<1x2x1x2x4xf32>
    %157 = vector.shape_cast %156 : vector<1x2x1x2x4xf32> to vector<2x2x4xf32>
    %158 = vector.shape_cast %157 : vector<2x2x4xf32> to vector<2x8xf32>
    %c0_251 = arith.constant 0 : index
    %c3_252 = arith.constant 3 : index
    %c2_253 = arith.constant 2 : index
    %c0_254 = arith.constant 0 : index
    %c0_255 = arith.constant 0 : index
    %159 = vector.load %arg3[%c0_251, %c3_252, %c2_253, %c0_254, %c0_255] : memref<1x8x8x2x8xf32, #tpu.memory_space<vmem>>, vector<1x1x1x2x8xf32>
    %160 = vector.shape_cast %159 : vector<1x1x1x2x8xf32> to vector<2x8xf32>
    %161 = vector.shape_cast %158 : vector<2x8xf32> to vector<1x1x1x2x8xf32>
    tpu.vector_store %arg3[%c0_251, %c3_252, %c2_253, %c0_254, %c0_255], %161 {strides = array<i32>} : memref<1x8x8x2x8xf32, #tpu.memory_space<vmem>>, vector<1x1x1x2x8xf32>,
    %c0_256 = arith.constant 0 : index
    %c0_257 = arith.constant 0 : index
    %c3_258 = arith.constant 3 : index
    %c0_259 = arith.constant 0 : index
    %c12_260 = arith.constant 12 : index
    %162 = vector.load %arg2[%c0_256, %c0_257, %c3_258, %c0_259, %c12_260] : memref<1x2x8x2x32xf32, #tpu.memory_space<vmem>>, vector<1x2x1x2x4xf32>
    %163 = vector.shape_cast %162 : vector<1x2x1x2x4xf32> to vector<2x2x4xf32>
    %164 = vector.shape_cast %163 : vector<2x2x4xf32> to vector<2x8xf32>
    %c0_261 = arith.constant 0 : index
    %c3_262 = arith.constant 3 : index
    %c3_263 = arith.constant 3 : index
    %c0_264 = arith.constant 0 : index
    %c0_265 = arith.constant 0 : index
    %165 = vector.load %arg3[%c0_261, %c3_262, %c3_263, %c0_264, %c0_265] : memref<1x8x8x2x8xf32, #tpu.memory_space<vmem>>, vector<1x1x1x2x8xf32>
    %166 = vector.shape_cast %165 : vector<1x1x1x2x8xf32> to vector<2x8xf32>
    %167 = vector.shape_cast %164 : vector<2x8xf32> to vector<1x1x1x2x8xf32>
    tpu.vector_store %arg3[%c0_261, %c3_262, %c3_263, %c0_264, %c0_265], %167 {strides = array<i32>} : memref<1x8x8x2x8xf32, #tpu.memory_space<vmem>>, vector<1x1x1x2x8xf32>,
    %c0_266 = arith.constant 0 : index
    %c0_267 = arith.constant 0 : index
    %c3_268 = arith.constant 3 : index
    %c0_269 = arith.constant 0 : index
    %c16_270 = arith.constant 16 : index
    %168 = vector.load %arg2[%c0_266, %c0_267, %c3_268, %c0_269, %c16_270] : memref<1x2x8x2x32xf32, #tpu.memory_space<vmem>>, vector<1x2x1x2x4xf32>
    %169 = vector.shape_cast %168 : vector<1x2x1x2x4xf32> to vector<2x2x4xf32>
    %170 = vector.shape_cast %169 : vector<2x2x4xf32> to vector<2x8xf32>
    %c0_271 = arith.constant 0 : index
    %c3_272 = arith.constant 3 : index
    %c4_273 = arith.constant 4 : index
    %c0_274 = arith.constant 0 : index
    %c0_275 = arith.constant 0 : index
    %171 = vector.load %arg3[%c0_271, %c3_272, %c4_273, %c0_274, %c0_275] : memref<1x8x8x2x8xf32, #tpu.memory_space<vmem>>, vector<1x1x1x2x8xf32>
    %172 = vector.shape_cast %171 : vector<1x1x1x2x8xf32> to vector<2x8xf32>
    %173 = vector.shape_cast %170 : vector<2x8xf32> to vector<1x1x1x2x8xf32>
    tpu.vector_store %arg3[%c0_271, %c3_272, %c4_273, %c0_274, %c0_275], %173 {strides = array<i32>} : memref<1x8x8x2x8xf32, #tpu.memory_space<vmem>>, vector<1x1x1x2x8xf32>,
    %c0_276 = arith.constant 0 : index
    %c0_277 = arith.constant 0 : index
    %c3_278 = arith.constant 3 : index
    %c0_279 = arith.constant 0 : index
    %c20_280 = arith.constant 20 : index
    %174 = vector.load %arg2[%c0_276, %c0_277, %c3_278, %c0_279, %c20_280] : memref<1x2x8x2x32xf32, #tpu.memory_space<vmem>>, vector<1x2x1x2x4xf32>
    %175 = vector.shape_cast %174 : vector<1x2x1x2x4xf32> to vector<2x2x4xf32>
    %176 = vector.shape_cast %175 : vector<2x2x4xf32> to vector<2x8xf32>
    %c0_281 = arith.constant 0 : index
    %c3_282 = arith.constant 3 : index
    %c5_283 = arith.constant 5 : index
    %c0_284 = arith.constant 0 : index
    %c0_285 = arith.constant 0 : index
    %177 = vector.load %arg3[%c0_281, %c3_282, %c5_283, %c0_284, %c0_285] : memref<1x8x8x2x8xf32, #tpu.memory_space<vmem>>, vector<1x1x1x2x8xf32>
    %178 = vector.shape_cast %177 : vector<1x1x1x2x8xf32> to vector<2x8xf32>
    %179 = vector.shape_cast %176 : vector<2x8xf32> to vector<1x1x1x2x8xf32>
    tpu.vector_store %arg3[%c0_281, %c3_282, %c5_283, %c0_284, %c0_285], %179 {strides = array<i32>} : memref<1x8x8x2x8xf32, #tpu.memory_space<vmem>>, vector<1x1x1x2x8xf32>,
    %c0_286 = arith.constant 0 : index
    %c0_287 = arith.constant 0 : index
    %c3_288 = arith.constant 3 : index
    %c0_289 = arith.constant 0 : index
    %c24_290 = arith.constant 24 : index
    %180 = vector.load %arg2[%c0_286, %c0_287, %c3_288, %c0_289, %c24_290] : memref<1x2x8x2x32xf32, #tpu.memory_space<vmem>>, vector<1x2x1x2x4xf32>
    %181 = vector.shape_cast %180 : vector<1x2x1x2x4xf32> to vector<2x2x4xf32>
    %182 = vector.shape_cast %181 : vector<2x2x4xf32> to vector<2x8xf32>
    %c0_291 = arith.constant 0 : index
    %c3_292 = arith.constant 3 : index
    %c6_293 = arith.constant 6 : index
    %c0_294 = arith.constant 0 : index
    %c0_295 = arith.constant 0 : index
    %183 = vector.load %arg3[%c0_291, %c3_292, %c6_293, %c0_294, %c0_295] : memref<1x8x8x2x8xf32, #tpu.memory_space<vmem>>, vector<1x1x1x2x8xf32>
    %184 = vector.shape_cast %183 : vector<1x1x1x2x8xf32> to vector<2x8xf32>
    %185 = vector.shape_cast %182 : vector<2x8xf32> to vector<1x1x1x2x8xf32>
    tpu.vector_store %arg3[%c0_291, %c3_292, %c6_293, %c0_294, %c0_295], %185 {strides = array<i32>} : memref<1x8x8x2x8xf32, #tpu.memory_space<vmem>>, vector<1x1x1x2x8xf32>,
    %c0_296 = arith.constant 0 : index
    %c0_297 = arith.constant 0 : index
    %c3_298 = arith.constant 3 : index
    %c0_299 = arith.constant 0 : index
    %c28_300 = arith.constant 28 : index
    %186 = vector.load %arg2[%c0_296, %c0_297, %c3_298, %c0_299, %c28_300] : memref<1x2x8x2x32xf32, #tpu.memory_space<vmem>>, vector<1x2x1x2x4xf32>
    %187 = vector.shape_cast %186 : vector<1x2x1x2x4xf32> to vector<2x2x4xf32>
    %188 = vector.shape_cast %187 : vector<2x2x4xf32> to vector<2x8xf32>
    %c0_301 = arith.constant 0 : index
    %c3_302 = arith.constant 3 : index
    %c7_303 = arith.constant 7 : index
    %c0_304 = arith.constant 0 : index
    %c0_305 = arith.constant 0 : index
    %189 = vector.load %arg3[%c0_301, %c3_302, %c7_303, %c0_304, %c0_305] : memref<1x8x8x2x8xf32, #tpu.memory_space<vmem>>, vector<1x1x1x2x8xf32>
    %190 = vector.shape_cast %189 : vector<1x1x1x2x8xf32> to vector<2x8xf32>
    %191 = vector.shape_cast %188 : vector<2x8xf32> to vector<1x1x1x2x8xf32>
    tpu.vector_store %arg3[%c0_301, %c3_302, %c7_303, %c0_304, %c0_305], %191 {strides = array<i32>} : memref<1x8x8x2x8xf32, #tpu.memory_space<vmem>>, vector<1x1x1x2x8xf32>,
    %c0_306 = arith.constant 0 : index
    %c0_307 = arith.constant 0 : index
    %c4_308 = arith.constant 4 : index
    %c0_309 = arith.constant 0 : index
    %c0_310 = arith.constant 0 : index
    %192 = vector.load %arg2[%c0_306, %c0_307, %c4_308, %c0_309, %c0_310] : memref<1x2x8x2x32xf32, #tpu.memory_space<vmem>>, vector<1x2x1x2x4xf32>
    %193 = vector.shape_cast %192 : vector<1x2x1x2x4xf32> to vector<2x2x4xf32>
    %194 = vector.shape_cast %193 : vector<2x2x4xf32> to vector<2x8xf32>
    %c0_311 = arith.constant 0 : index
    %c4_312 = arith.constant 4 : index
    %c0_313 = arith.constant 0 : index
    %c0_314 = arith.constant 0 : index
    %c0_315 = arith.constant 0 : index
    %195 = vector.load %arg3[%c0_311, %c4_312, %c0_313, %c0_314, %c0_315] : memref<1x8x8x2x8xf32, #tpu.memory_space<vmem>>, vector<1x1x1x2x8xf32>
    %196 = vector.shape_cast %195 : vector<1x1x1x2x8xf32> to vector<2x8xf32>
    %197 = vector.shape_cast %194 : vector<2x8xf32> to vector<1x1x1x2x8xf32>
    tpu.vector_store %arg3[%c0_311, %c4_312, %c0_313, %c0_314, %c0_315], %197 {strides = array<i32>} : memref<1x8x8x2x8xf32, #tpu.memory_space<vmem>>, vector<1x1x1x2x8xf32>,
    %c0_316 = arith.constant 0 : index
    %c0_317 = arith.constant 0 : index
    %c4_318 = arith.constant 4 : index
    %c0_319 = arith.constant 0 : index
    %c4_320 = arith.constant 4 : index
    %198 = vector.load %arg2[%c0_316, %c0_317, %c4_318, %c0_319, %c4_320] : memref<1x2x8x2x32xf32, #tpu.memory_space<vmem>>, vector<1x2x1x2x4xf32>
    %199 = vector.shape_cast %198 : vector<1x2x1x2x4xf32> to vector<2x2x4xf32>
    %200 = vector.shape_cast %199 : vector<2x2x4xf32> to vector<2x8xf32>
    %c0_321 = arith.constant 0 : index
    %c4_322 = arith.constant 4 : index
    %c1_323 = arith.constant 1 : index
    %c0_324 = arith.constant 0 : index
    %c0_325 = arith.constant 0 : index
    %201 = vector.load %arg3[%c0_321, %c4_322, %c1_323, %c0_324, %c0_325] : memref<1x8x8x2x8xf32, #tpu.memory_space<vmem>>, vector<1x1x1x2x8xf32>
    %202 = vector.shape_cast %201 : vector<1x1x1x2x8xf32> to vector<2x8xf32>
    %203 = vector.shape_cast %200 : vector<2x8xf32> to vector<1x1x1x2x8xf32>
    tpu.vector_store %arg3[%c0_321, %c4_322, %c1_323, %c0_324, %c0_325], %203 {strides = array<i32>} : memref<1x8x8x2x8xf32, #tpu.memory_space<vmem>>, vector<1x1x1x2x8xf32>,
    %c0_326 = arith.constant 0 : index
    %c0_327 = arith.constant 0 : index
    %c4_328 = arith.constant 4 : index
    %c0_329 = arith.constant 0 : index
    %c8_330 = arith.constant 8 : index
    %204 = vector.load %arg2[%c0_326, %c0_327, %c4_328, %c0_329, %c8_330] : memref<1x2x8x2x32xf32, #tpu.memory_space<vmem>>, vector<1x2x1x2x4xf32>
    %205 = vector.shape_cast %204 : vector<1x2x1x2x4xf32> to vector<2x2x4xf32>
    %206 = vector.shape_cast %205 : vector<2x2x4xf32> to vector<2x8xf32>
    %c0_331 = arith.constant 0 : index
    %c4_332 = arith.constant 4 : index
    %c2_333 = arith.constant 2 : index
    %c0_334 = arith.constant 0 : index
    %c0_335 = arith.constant 0 : index
    %207 = vector.load %arg3[%c0_331, %c4_332, %c2_333, %c0_334, %c0_335] : memref<1x8x8x2x8xf32, #tpu.memory_space<vmem>>, vector<1x1x1x2x8xf32>
    %208 = vector.shape_cast %207 : vector<1x1x1x2x8xf32> to vector<2x8xf32>
    %209 = vector.shape_cast %206 : vector<2x8xf32> to vector<1x1x1x2x8xf32>
    tpu.vector_store %arg3[%c0_331, %c4_332, %c2_333, %c0_334, %c0_335], %209 {strides = array<i32>} : memref<1x8x8x2x8xf32, #tpu.memory_space<vmem>>, vector<1x1x1x2x8xf32>,
    %c0_336 = arith.constant 0 : index
    %c0_337 = arith.constant 0 : index
    %c4_338 = arith.constant 4 : index
    %c0_339 = arith.constant 0 : index
    %c12_340 = arith.constant 12 : index
    %210 = vector.load %arg2[%c0_336, %c0_337, %c4_338, %c0_339, %c12_340] : memref<1x2x8x2x32xf32, #tpu.memory_space<vmem>>, vector<1x2x1x2x4xf32>
    %211 = vector.shape_cast %210 : vector<1x2x1x2x4xf32> to vector<2x2x4xf32>
    %212 = vector.shape_cast %211 : vector<2x2x4xf32> to vector<2x8xf32>
    %c0_341 = arith.constant 0 : index
    %c4_342 = arith.constant 4 : index
    %c3_343 = arith.constant 3 : index
    %c0_344 = arith.constant 0 : index
    %c0_345 = arith.constant 0 : index
    %213 = vector.load %arg3[%c0_341, %c4_342, %c3_343, %c0_344, %c0_345] : memref<1x8x8x2x8xf32, #tpu.memory_space<vmem>>, vector<1x1x1x2x8xf32>
    %214 = vector.shape_cast %213 : vector<1x1x1x2x8xf32> to vector<2x8xf32>
    %215 = vector.shape_cast %212 : vector<2x8xf32> to vector<1x1x1x2x8xf32>
    tpu.vector_store %arg3[%c0_341, %c4_342, %c3_343, %c0_344, %c0_345], %215 {strides = array<i32>} : memref<1x8x8x2x8xf32, #tpu.memory_space<vmem>>, vector<1x1x1x2x8xf32>,
    %c0_346 = arith.constant 0 : index
    %c0_347 = arith.constant 0 : index
    %c4_348 = arith.constant 4 : index
    %c0_349 = arith.constant 0 : index
    %c16_350 = arith.constant 16 : index
    %216 = vector.load %arg2[%c0_346, %c0_347, %c4_348, %c0_349, %c16_350] : memref<1x2x8x2x32xf32, #tpu.memory_space<vmem>>, vector<1x2x1x2x4xf32>
    %217 = vector.shape_cast %216 : vector<1x2x1x2x4xf32> to vector<2x2x4xf32>
    %218 = vector.shape_cast %217 : vector<2x2x4xf32> to vector<2x8xf32>
    %c0_351 = arith.constant 0 : index
    %c4_352 = arith.constant 4 : index
    %c4_353 = arith.constant 4 : index
    %c0_354 = arith.constant 0 : index
    %c0_355 = arith.constant 0 : index
    %219 = vector.load %arg3[%c0_351, %c4_352, %c4_353, %c0_354, %c0_355] : memref<1x8x8x2x8xf32, #tpu.memory_space<vmem>>, vector<1x1x1x2x8xf32>
    %220 = vector.shape_cast %219 : vector<1x1x1x2x8xf32> to vector<2x8xf32>
    %221 = vector.shape_cast %218 : vector<2x8xf32> to vector<1x1x1x2x8xf32>
    tpu.vector_store %arg3[%c0_351, %c4_352, %c4_353, %c0_354, %c0_355], %221 {strides = array<i32>} : memref<1x8x8x2x8xf32, #tpu.memory_space<vmem>>, vector<1x1x1x2x8xf32>,
    %c0_356 = arith.constant 0 : index
    %c0_357 = arith.constant 0 : index
    %c4_358 = arith.constant 4 : index
    %c0_359 = arith.constant 0 : index
    %c20_360 = arith.constant 20 : index
    %222 = vector.load %arg2[%c0_356, %c0_357, %c4_358, %c0_359, %c20_360] : memref<1x2x8x2x32xf32, #tpu.memory_space<vmem>>, vector<1x2x1x2x4xf32>
    %223 = vector.shape_cast %222 : vector<1x2x1x2x4xf32> to vector<2x2x4xf32>
    %224 = vector.shape_cast %223 : vector<2x2x4xf32> to vector<2x8xf32>
    %c0_361 = arith.constant 0 : index
    %c4_362 = arith.constant 4 : index
    %c5_363 = arith.constant 5 : index
    %c0_364 = arith.constant 0 : index
    %c0_365 = arith.constant 0 : index
    %225 = vector.load %arg3[%c0_361, %c4_362, %c5_363, %c0_364, %c0_365] : memref<1x8x8x2x8xf32, #tpu.memory_space<vmem>>, vector<1x1x1x2x8xf32>
    %226 = vector.shape_cast %225 : vector<1x1x1x2x8xf32> to vector<2x8xf32>
    %227 = vector.shape_cast %224 : vector<2x8xf32> to vector<1x1x1x2x8xf32>
    tpu.vector_store %arg3[%c0_361, %c4_362, %c5_363, %c0_364, %c0_365], %227 {strides = array<i32>} : memref<1x8x8x2x8xf32, #tpu.memory_space<vmem>>, vector<1x1x1x2x8xf32>,
    %c0_366 = arith.constant 0 : index
    %c0_367 = arith.constant 0 : index
    %c4_368 = arith.constant 4 : index
    %c0_369 = arith.constant 0 : index
    %c24_370 = arith.constant 24 : index
    %228 = vector.load %arg2[%c0_366, %c0_367, %c4_368, %c0_369, %c24_370] : memref<1x2x8x2x32xf32, #tpu.memory_space<vmem>>, vector<1x2x1x2x4xf32>
    %229 = vector.shape_cast %228 : vector<1x2x1x2x4xf32> to vector<2x2x4xf32>
    %230 = vector.shape_cast %229 : vector<2x2x4xf32> to vector<2x8xf32>
    %c0_371 = arith.constant 0 : index
    %c4_372 = arith.constant 4 : index
    %c6_373 = arith.constant 6 : index
    %c0_374 = arith.constant 0 : index
    %c0_375 = arith.constant 0 : index
    %231 = vector.load %arg3[%c0_371, %c4_372, %c6_373, %c0_374, %c0_375] : memref<1x8x8x2x8xf32, #tpu.memory_space<vmem>>, vector<1x1x1x2x8xf32>
    %232 = vector.shape_cast %231 : vector<1x1x1x2x8xf32> to vector<2x8xf32>
    %233 = vector.shape_cast %230 : vector<2x8xf32> to vector<1x1x1x2x8xf32>
    tpu.vector_store %arg3[%c0_371, %c4_372, %c6_373, %c0_374, %c0_375], %233 {strides = array<i32>} : memref<1x8x8x2x8xf32, #tpu.memory_space<vmem>>, vector<1x1x1x2x8xf32>,
    %c0_376 = arith.constant 0 : index
    %c0_377 = arith.constant 0 : index
    %c4_378 = arith.constant 4 : index
    %c0_379 = arith.constant 0 : index
    %c28_380 = arith.constant 28 : index
    %234 = vector.load %arg2[%c0_376, %c0_377, %c4_378, %c0_379, %c28_380] : memref<1x2x8x2x32xf32, #tpu.memory_space<vmem>>, vector<1x2x1x2x4xf32>
    %235 = vector.shape_cast %234 : vector<1x2x1x2x4xf32> to vector<2x2x4xf32>
    %236 = vector.shape_cast %235 : vector<2x2x4xf32> to vector<2x8xf32>
    %c0_381 = arith.constant 0 : index
    %c4_382 = arith.constant 4 : index
    %c7_383 = arith.constant 7 : index
    %c0_384 = arith.constant 0 : index
    %c0_385 = arith.constant 0 : index
    %237 = vector.load %arg3[%c0_381, %c4_382, %c7_383, %c0_384, %c0_385] : memref<1x8x8x2x8xf32, #tpu.memory_space<vmem>>, vector<1x1x1x2x8xf32>
    %238 = vector.shape_cast %237 : vector<1x1x1x2x8xf32> to vector<2x8xf32>
    %239 = vector.shape_cast %236 : vector<2x8xf32> to vector<1x1x1x2x8xf32>
    tpu.vector_store %arg3[%c0_381, %c4_382, %c7_383, %c0_384, %c0_385], %239 {strides = array<i32>} : memref<1x8x8x2x8xf32, #tpu.memory_space<vmem>>, vector<1x1x1x2x8xf32>,
    %c0_386 = arith.constant 0 : index
    %c0_387 = arith.constant 0 : index
    %c5_388 = arith.constant 5 : index
    %c0_389 = arith.constant 0 : index
    %c0_390 = arith.constant 0 : index
    %240 = vector.load %arg2[%c0_386, %c0_387, %c5_388, %c0_389, %c0_390] : memref<1x2x8x2x32xf32, #tpu.memory_space<vmem>>, vector<1x2x1x2x4xf32>
    %241 = vector.shape_cast %240 : vector<1x2x1x2x4xf32> to vector<2x2x4xf32>
    %242 = vector.shape_cast %241 : vector<2x2x4xf32> to vector<2x8xf32>
    %c0_391 = arith.constant 0 : index
    %c5_392 = arith.constant 5 : index
    %c0_393 = arith.constant 0 : index
    %c0_394 = arith.constant 0 : index
    %c0_395 = arith.constant 0 : index
    %243 = vector.load %arg3[%c0_391, %c5_392, %c0_393, %c0_394, %c0_395] : memref<1x8x8x2x8xf32, #tpu.memory_space<vmem>>, vector<1x1x1x2x8xf32>
    %244 = vector.shape_cast %243 : vector<1x1x1x2x8xf32> to vector<2x8xf32>
    %245 = vector.shape_cast %242 : vector<2x8xf32> to vector<1x1x1x2x8xf32>
    tpu.vector_store %arg3[%c0_391, %c5_392, %c0_393, %c0_394, %c0_395], %245 {strides = array<i32>} : memref<1x8x8x2x8xf32, #tpu.memory_space<vmem>>, vector<1x1x1x2x8xf32>,
    %c0_396 = arith.constant 0 : index
    %c0_397 = arith.constant 0 : index
    %c5_398 = arith.constant 5 : index
    %c0_399 = arith.constant 0 : index
    %c4_400 = arith.constant 4 : index
    %246 = vector.load %arg2[%c0_396, %c0_397, %c5_398, %c0_399, %c4_400] : memref<1x2x8x2x32xf32, #tpu.memory_space<vmem>>, vector<1x2x1x2x4xf32>
    %247 = vector.shape_cast %246 : vector<1x2x1x2x4xf32> to vector<2x2x4xf32>
    %248 = vector.shape_cast %247 : vector<2x2x4xf32> to vector<2x8xf32>
    %c0_401 = arith.constant 0 : index
    %c5_402 = arith.constant 5 : index
    %c1_403 = arith.constant 1 : index
    %c0_404 = arith.constant 0 : index
    %c0_405 = arith.constant 0 : index
    %249 = vector.load %arg3[%c0_401, %c5_402, %c1_403, %c0_404, %c0_405] : memref<1x8x8x2x8xf32, #tpu.memory_space<vmem>>, vector<1x1x1x2x8xf32>
    %250 = vector.shape_cast %249 : vector<1x1x1x2x8xf32> to vector<2x8xf32>
    %251 = vector.shape_cast %248 : vector<2x8xf32> to vector<1x1x1x2x8xf32>
    tpu.vector_store %arg3[%c0_401, %c5_402, %c1_403, %c0_404, %c0_405], %251 {strides = array<i32>} : memref<1x8x8x2x8xf32, #tpu.memory_space<vmem>>, vector<1x1x1x2x8xf32>,
    %c0_406 = arith.constant 0 : index
    %c0_407 = arith.constant 0 : index
    %c5_408 = arith.constant 5 : index
    %c0_409 = arith.constant 0 : index
    %c8_410 = arith.constant 8 : index
    %252 = vector.load %arg2[%c0_406, %c0_407, %c5_408, %c0_409, %c8_410] : memref<1x2x8x2x32xf32, #tpu.memory_space<vmem>>, vector<1x2x1x2x4xf32>
    %253 = vector.shape_cast %252 : vector<1x2x1x2x4xf32> to vector<2x2x4xf32>
    %254 = vector.shape_cast %253 : vector<2x2x4xf32> to vector<2x8xf32>
    %c0_411 = arith.constant 0 : index
    %c5_412 = arith.constant 5 : index
    %c2_413 = arith.constant 2 : index
    %c0_414 = arith.constant 0 : index
    %c0_415 = arith.constant 0 : index
    %255 = vector.load %arg3[%c0_411, %c5_412, %c2_413, %c0_414, %c0_415] : memref<1x8x8x2x8xf32, #tpu.memory_space<vmem>>, vector<1x1x1x2x8xf32>
    %256 = vector.shape_cast %255 : vector<1x1x1x2x8xf32> to vector<2x8xf32>
    %257 = vector.shape_cast %254 : vector<2x8xf32> to vector<1x1x1x2x8xf32>
    tpu.vector_store %arg3[%c0_411, %c5_412, %c2_413, %c0_414, %c0_415], %257 {strides = array<i32>} : memref<1x8x8x2x8xf32, #tpu.memory_space<vmem>>, vector<1x1x1x2x8xf32>,
    %c0_416 = arith.constant 0 : index
    %c0_417 = arith.constant 0 : index
    %c5_418 = arith.constant 5 : index
    %c0_419 = arith.constant 0 : index
    %c12_420 = arith.constant 12 : index
    %258 = vector.load %arg2[%c0_416, %c0_417, %c5_418, %c0_419, %c12_420] : memref<1x2x8x2x32xf32, #tpu.memory_space<vmem>>, vector<1x2x1x2x4xf32>
    %259 = vector.shape_cast %258 : vector<1x2x1x2x4xf32> to vector<2x2x4xf32>
    %260 = vector.shape_cast %259 : vector<2x2x4xf32> to vector<2x8xf32>
    %c0_421 = arith.constant 0 : index
    %c5_422 = arith.constant 5 : index
    %c3_423 = arith.constant 3 : index
    %c0_424 = arith.constant 0 : index
    %c0_425 = arith.constant 0 : index
    %261 = vector.load %arg3[%c0_421, %c5_422, %c3_423, %c0_424, %c0_425] : memref<1x8x8x2x8xf32, #tpu.memory_space<vmem>>, vector<1x1x1x2x8xf32>
    %262 = vector.shape_cast %261 : vector<1x1x1x2x8xf32> to vector<2x8xf32>
    %263 = vector.shape_cast %260 : vector<2x8xf32> to vector<1x1x1x2x8xf32>
    tpu.vector_store %arg3[%c0_421, %c5_422, %c3_423, %c0_424, %c0_425], %263 {strides = array<i32>} : memref<1x8x8x2x8xf32, #tpu.memory_space<vmem>>, vector<1x1x1x2x8xf32>,
    %c0_426 = arith.constant 0 : index
    %c0_427 = arith.constant 0 : index
    %c5_428 = arith.constant 5 : index
    %c0_429 = arith.constant 0 : index
    %c16_430 = arith.constant 16 : index
    %264 = vector.load %arg2[%c0_426, %c0_427, %c5_428, %c0_429, %c16_430] : memref<1x2x8x2x32xf32, #tpu.memory_space<vmem>>, vector<1x2x1x2x4xf32>
    %265 = vector.shape_cast %264 : vector<1x2x1x2x4xf32> to vector<2x2x4xf32>
    %266 = vector.shape_cast %265 : vector<2x2x4xf32> to vector<2x8xf32>
    %c0_431 = arith.constant 0 : index
    %c5_432 = arith.constant 5 : index
    %c4_433 = arith.constant 4 : index
    %c0_434 = arith.constant 0 : index
    %c0_435 = arith.constant 0 : index
    %267 = vector.load %arg3[%c0_431, %c5_432, %c4_433, %c0_434, %c0_435] : memref<1x8x8x2x8xf32, #tpu.memory_space<vmem>>, vector<1x1x1x2x8xf32>
    %268 = vector.shape_cast %267 : vector<1x1x1x2x8xf32> to vector<2x8xf32>
    %269 = vector.shape_cast %266 : vector<2x8xf32> to vector<1x1x1x2x8xf32>
    tpu.vector_store %arg3[%c0_431, %c5_432, %c4_433, %c0_434, %c0_435], %269 {strides = array<i32>} : memref<1x8x8x2x8xf32, #tpu.memory_space<vmem>>, vector<1x1x1x2x8xf32>,
    %c0_436 = arith.constant 0 : index
    %c0_437 = arith.constant 0 : index
    %c5_438 = arith.constant 5 : index
    %c0_439 = arith.constant 0 : index
    %c20_440 = arith.constant 20 : index
    %270 = vector.load %arg2[%c0_436, %c0_437, %c5_438, %c0_439, %c20_440] : memref<1x2x8x2x32xf32, #tpu.memory_space<vmem>>, vector<1x2x1x2x4xf32>
    %271 = vector.shape_cast %270 : vector<1x2x1x2x4xf32> to vector<2x2x4xf32>
    %272 = vector.shape_cast %271 : vector<2x2x4xf32> to vector<2x8xf32>
    %c0_441 = arith.constant 0 : index
    %c5_442 = arith.constant 5 : index
    %c5_443 = arith.constant 5 : index
    %c0_444 = arith.constant 0 : index
    %c0_445 = arith.constant 0 : index
    %273 = vector.load %arg3[%c0_441, %c5_442, %c5_443, %c0_444, %c0_445] : memref<1x8x8x2x8xf32, #tpu.memory_space<vmem>>, vector<1x1x1x2x8xf32>
    %274 = vector.shape_cast %273 : vector<1x1x1x2x8xf32> to vector<2x8xf32>
    %275 = vector.shape_cast %272 : vector<2x8xf32> to vector<1x1x1x2x8xf32>
    tpu.vector_store %arg3[%c0_441, %c5_442, %c5_443, %c0_444, %c0_445], %275 {strides = array<i32>} : memref<1x8x8x2x8xf32, #tpu.memory_space<vmem>>, vector<1x1x1x2x8xf32>,
    %c0_446 = arith.constant 0 : index
    %c0_447 = arith.constant 0 : index
    %c5_448 = arith.constant 5 : index
    %c0_449 = arith.constant 0 : index
    %c24_450 = arith.constant 24 : index
    %276 = vector.load %arg2[%c0_446, %c0_447, %c5_448, %c0_449, %c24_450] : memref<1x2x8x2x32xf32, #tpu.memory_space<vmem>>, vector<1x2x1x2x4xf32>
    %277 = vector.shape_cast %276 : vector<1x2x1x2x4xf32> to vector<2x2x4xf32>
    %278 = vector.shape_cast %277 : vector<2x2x4xf32> to vector<2x8xf32>
    %c0_451 = arith.constant 0 : index
    %c5_452 = arith.constant 5 : index
    %c6_453 = arith.constant 6 : index
    %c0_454 = arith.constant 0 : index
    %c0_455 = arith.constant 0 : index
    %279 = vector.load %arg3[%c0_451, %c5_452, %c6_453, %c0_454, %c0_455] : memref<1x8x8x2x8xf32, #tpu.memory_space<vmem>>, vector<1x1x1x2x8xf32>
    %280 = vector.shape_cast %279 : vector<1x1x1x2x8xf32> to vector<2x8xf32>
    %281 = vector.shape_cast %278 : vector<2x8xf32> to vector<1x1x1x2x8xf32>
    tpu.vector_store %arg3[%c0_451, %c5_452, %c6_453, %c0_454, %c0_455], %281 {strides = array<i32>} : memref<1x8x8x2x8xf32, #tpu.memory_space<vmem>>, vector<1x1x1x2x8xf32>,
    %c0_456 = arith.constant 0 : index
    %c0_457 = arith.constant 0 : index
    %c5_458 = arith.constant 5 : index
    %c0_459 = arith.constant 0 : index
    %c28_460 = arith.constant 28 : index
    %282 = vector.load %arg2[%c0_456, %c0_457, %c5_458, %c0_459, %c28_460] : memref<1x2x8x2x32xf32, #tpu.memory_space<vmem>>, vector<1x2x1x2x4xf32>
    %283 = vector.shape_cast %282 : vector<1x2x1x2x4xf32> to vector<2x2x4xf32>
    %284 = vector.shape_cast %283 : vector<2x2x4xf32> to vector<2x8xf32>
    %c0_461 = arith.constant 0 : index
    %c5_462 = arith.constant 5 : index
    %c7_463 = arith.constant 7 : index
    %c0_464 = arith.constant 0 : index
    %c0_465 = arith.constant 0 : index
    %285 = vector.load %arg3[%c0_461, %c5_462, %c7_463, %c0_464, %c0_465] : memref<1x8x8x2x8xf32, #tpu.memory_space<vmem>>, vector<1x1x1x2x8xf32>
    %286 = vector.shape_cast %285 : vector<1x1x1x2x8xf32> to vector<2x8xf32>
    %287 = vector.shape_cast %284 : vector<2x8xf32> to vector<1x1x1x2x8xf32>
    tpu.vector_store %arg3[%c0_461, %c5_462, %c7_463, %c0_464, %c0_465], %287 {strides = array<i32>} : memref<1x8x8x2x8xf32, #tpu.memory_space<vmem>>, vector<1x1x1x2x8xf32>,
    %c0_466 = arith.constant 0 : index
    %c0_467 = arith.constant 0 : index
    %c6_468 = arith.constant 6 : index
    %c0_469 = arith.constant 0 : index
    %c0_470 = arith.constant 0 : index
    %288 = vector.load %arg2[%c0_466, %c0_467, %c6_468, %c0_469, %c0_470] : memref<1x2x8x2x32xf32, #tpu.memory_space<vmem>>, vector<1x2x1x2x4xf32>
    %289 = vector.shape_cast %288 : vector<1x2x1x2x4xf32> to vector<2x2x4xf32>
    %290 = vector.shape_cast %289 : vector<2x2x4xf32> to vector<2x8xf32>
    %c0_471 = arith.constant 0 : index
    %c6_472 = arith.constant 6 : index
    %c0_473 = arith.constant 0 : index
    %c0_474 = arith.constant 0 : index
    %c0_475 = arith.constant 0 : index
    %291 = vector.load %arg3[%c0_471, %c6_472, %c0_473, %c0_474, %c0_475] : memref<1x8x8x2x8xf32, #tpu.memory_space<vmem>>, vector<1x1x1x2x8xf32>
    %292 = vector.shape_cast %291 : vector<1x1x1x2x8xf32> to vector<2x8xf32>
    %293 = vector.shape_cast %290 : vector<2x8xf32> to vector<1x1x1x2x8xf32>
    tpu.vector_store %arg3[%c0_471, %c6_472, %c0_473, %c0_474, %c0_475], %293 {strides = array<i32>} : memref<1x8x8x2x8xf32, #tpu.memory_space<vmem>>, vector<1x1x1x2x8xf32>,
    %c0_476 = arith.constant 0 : index
    %c0_477 = arith.constant 0 : index
    %c6_478 = arith.constant 6 : index
    %c0_479 = arith.constant 0 : index
    %c4_480 = arith.constant 4 : index
    %294 = vector.load %arg2[%c0_476, %c0_477, %c6_478, %c0_479, %c4_480] : memref<1x2x8x2x32xf32, #tpu.memory_space<vmem>>, vector<1x2x1x2x4xf32>
    %295 = vector.shape_cast %294 : vector<1x2x1x2x4xf32> to vector<2x2x4xf32>
    %296 = vector.shape_cast %295 : vector<2x2x4xf32> to vector<2x8xf32>
    %c0_481 = arith.constant 0 : index
    %c6_482 = arith.constant 6 : index
    %c1_483 = arith.constant 1 : index
    %c0_484 = arith.constant 0 : index
    %c0_485 = arith.constant 0 : index
    %297 = vector.load %arg3[%c0_481, %c6_482, %c1_483, %c0_484, %c0_485] : memref<1x8x8x2x8xf32, #tpu.memory_space<vmem>>, vector<1x1x1x2x8xf32>
    %298 = vector.shape_cast %297 : vector<1x1x1x2x8xf32> to vector<2x8xf32>
    %299 = vector.shape_cast %296 : vector<2x8xf32> to vector<1x1x1x2x8xf32>
    tpu.vector_store %arg3[%c0_481, %c6_482, %c1_483, %c0_484, %c0_485], %299 {strides = array<i32>} : memref<1x8x8x2x8xf32, #tpu.memory_space<vmem>>, vector<1x1x1x2x8xf32>,
    %c0_486 = arith.constant 0 : index
    %c0_487 = arith.constant 0 : index
    %c6_488 = arith.constant 6 : index
    %c0_489 = arith.constant 0 : index
    %c8_490 = arith.constant 8 : index
    %300 = vector.load %arg2[%c0_486, %c0_487, %c6_488, %c0_489, %c8_490] : memref<1x2x8x2x32xf32, #tpu.memory_space<vmem>>, vector<1x2x1x2x4xf32>
    %301 = vector.shape_cast %300 : vector<1x2x1x2x4xf32> to vector<2x2x4xf32>
    %302 = vector.shape_cast %301 : vector<2x2x4xf32> to vector<2x8xf32>
    %c0_491 = arith.constant 0 : index
    %c6_492 = arith.constant 6 : index
    %c2_493 = arith.constant 2 : index
    %c0_494 = arith.constant 0 : index
    %c0_495 = arith.constant 0 : index
    %303 = vector.load %arg3[%c0_491, %c6_492, %c2_493, %c0_494, %c0_495] : memref<1x8x8x2x8xf32, #tpu.memory_space<vmem>>, vector<1x1x1x2x8xf32>
    %304 = vector.shape_cast %303 : vector<1x1x1x2x8xf32> to vector<2x8xf32>
    %305 = vector.shape_cast %302 : vector<2x8xf32> to vector<1x1x1x2x8xf32>
    tpu.vector_store %arg3[%c0_491, %c6_492, %c2_493, %c0_494, %c0_495], %305 {strides = array<i32>} : memref<1x8x8x2x8xf32, #tpu.memory_space<vmem>>, vector<1x1x1x2x8xf32>,
    %c0_496 = arith.constant 0 : index
    %c0_497 = arith.constant 0 : index
    %c6_498 = arith.constant 6 : index
    %c0_499 = arith.constant 0 : index
    %c12_500 = arith.constant 12 : index
    %306 = vector.load %arg2[%c0_496, %c0_497, %c6_498, %c0_499, %c12_500] : memref<1x2x8x2x32xf32, #tpu.memory_space<vmem>>, vector<1x2x1x2x4xf32>
    %307 = vector.shape_cast %306 : vector<1x2x1x2x4xf32> to vector<2x2x4xf32>
    %308 = vector.shape_cast %307 : vector<2x2x4xf32> to vector<2x8xf32>
    %c0_501 = arith.constant 0 : index
    %c6_502 = arith.constant 6 : index
    %c3_503 = arith.constant 3 : index
    %c0_504 = arith.constant 0 : index
    %c0_505 = arith.constant 0 : index
    %309 = vector.load %arg3[%c0_501, %c6_502, %c3_503, %c0_504, %c0_505] : memref<1x8x8x2x8xf32, #tpu.memory_space<vmem>>, vector<1x1x1x2x8xf32>
    %310 = vector.shape_cast %309 : vector<1x1x1x2x8xf32> to vector<2x8xf32>
    %311 = vector.shape_cast %308 : vector<2x8xf32> to vector<1x1x1x2x8xf32>
    tpu.vector_store %arg3[%c0_501, %c6_502, %c3_503, %c0_504, %c0_505], %311 {strides = array<i32>} : memref<1x8x8x2x8xf32, #tpu.memory_space<vmem>>, vector<1x1x1x2x8xf32>,
    %c0_506 = arith.constant 0 : index
    %c0_507 = arith.constant 0 : index
    %c6_508 = arith.constant 6 : index
    %c0_509 = arith.constant 0 : index
    %c16_510 = arith.constant 16 : index
    %312 = vector.load %arg2[%c0_506, %c0_507, %c6_508, %c0_509, %c16_510] : memref<1x2x8x2x32xf32, #tpu.memory_space<vmem>>, vector<1x2x1x2x4xf32>
    %313 = vector.shape_cast %312 : vector<1x2x1x2x4xf32> to vector<2x2x4xf32>
    %314 = vector.shape_cast %313 : vector<2x2x4xf32> to vector<2x8xf32>
    %c0_511 = arith.constant 0 : index
    %c6_512 = arith.constant 6 : index
    %c4_513 = arith.constant 4 : index
    %c0_514 = arith.constant 0 : index
    %c0_515 = arith.constant 0 : index
    %315 = vector.load %arg3[%c0_511, %c6_512, %c4_513, %c0_514, %c0_515] : memref<1x8x8x2x8xf32, #tpu.memory_space<vmem>>, vector<1x1x1x2x8xf32>
    %316 = vector.shape_cast %315 : vector<1x1x1x2x8xf32> to vector<2x8xf32>
    %317 = vector.shape_cast %314 : vector<2x8xf32> to vector<1x1x1x2x8xf32>
    tpu.vector_store %arg3[%c0_511, %c6_512, %c4_513, %c0_514, %c0_515], %317 {strides = array<i32>} : memref<1x8x8x2x8xf32, #tpu.memory_space<vmem>>, vector<1x1x1x2x8xf32>,
    %c0_516 = arith.constant 0 : index
    %c0_517 = arith.constant 0 : index
    %c6_518 = arith.constant 6 : index
    %c0_519 = arith.constant 0 : index
    %c20_520 = arith.constant 20 : index
    %318 = vector.load %arg2[%c0_516, %c0_517, %c6_518, %c0_519, %c20_520] : memref<1x2x8x2x32xf32, #tpu.memory_space<vmem>>, vector<1x2x1x2x4xf32>
    %319 = vector.shape_cast %318 : vector<1x2x1x2x4xf32> to vector<2x2x4xf32>
    %320 = vector.shape_cast %319 : vector<2x2x4xf32> to vector<2x8xf32>
    %c0_521 = arith.constant 0 : index
    %c6_522 = arith.constant 6 : index
    %c5_523 = arith.constant 5 : index
    %c0_524 = arith.constant 0 : index
    %c0_525 = arith.constant 0 : index
    %321 = vector.load %arg3[%c0_521, %c6_522, %c5_523, %c0_524, %c0_525] : memref<1x8x8x2x8xf32, #tpu.memory_space<vmem>>, vector<1x1x1x2x8xf32>
    %322 = vector.shape_cast %321 : vector<1x1x1x2x8xf32> to vector<2x8xf32>
    %323 = vector.shape_cast %320 : vector<2x8xf32> to vector<1x1x1x2x8xf32>
    tpu.vector_store %arg3[%c0_521, %c6_522, %c5_523, %c0_524, %c0_525], %323 {strides = array<i32>} : memref<1x8x8x2x8xf32, #tpu.memory_space<vmem>>, vector<1x1x1x2x8xf32>,
    %c0_526 = arith.constant 0 : index
    %c0_527 = arith.constant 0 : index
    %c6_528 = arith.constant 6 : index
    %c0_529 = arith.constant 0 : index
    %c24_530 = arith.constant 24 : index
    %324 = vector.load %arg2[%c0_526, %c0_527, %c6_528, %c0_529, %c24_530] : memref<1x2x8x2x32xf32, #tpu.memory_space<vmem>>, vector<1x2x1x2x4xf32>
    %325 = vector.shape_cast %324 : vector<1x2x1x2x4xf32> to vector<2x2x4xf32>
    %326 = vector.shape_cast %325 : vector<2x2x4xf32> to vector<2x8xf32>
    %c0_531 = arith.constant 0 : index
    %c6_532 = arith.constant 6 : index
    %c6_533 = arith.constant 6 : index
    %c0_534 = arith.constant 0 : index
    %c0_535 = arith.constant 0 : index
    %327 = vector.load %arg3[%c0_531, %c6_532, %c6_533, %c0_534, %c0_535] : memref<1x8x8x2x8xf32, #tpu.memory_space<vmem>>, vector<1x1x1x2x8xf32>
    %328 = vector.shape_cast %327 : vector<1x1x1x2x8xf32> to vector<2x8xf32>
    %329 = vector.shape_cast %326 : vector<2x8xf32> to vector<1x1x1x2x8xf32>
    tpu.vector_store %arg3[%c0_531, %c6_532, %c6_533, %c0_534, %c0_535], %329 {strides = array<i32>} : memref<1x8x8x2x8xf32, #tpu.memory_space<vmem>>, vector<1x1x1x2x8xf32>,
    %c0_536 = arith.constant 0 : index
    %c0_537 = arith.constant 0 : index
    %c6_538 = arith.constant 6 : index
    %c0_539 = arith.constant 0 : index
    %c28_540 = arith.constant 28 : index
    %330 = vector.load %arg2[%c0_536, %c0_537, %c6_538, %c0_539, %c28_540] : memref<1x2x8x2x32xf32, #tpu.memory_space<vmem>>, vector<1x2x1x2x4xf32>
    %331 = vector.shape_cast %330 : vector<1x2x1x2x4xf32> to vector<2x2x4xf32>
    %332 = vector.shape_cast %331 : vector<2x2x4xf32> to vector<2x8xf32>
    %c0_541 = arith.constant 0 : index
    %c6_542 = arith.constant 6 : index
    %c7_543 = arith.constant 7 : index
    %c0_544 = arith.constant 0 : index
    %c0_545 = arith.constant 0 : index
    %333 = vector.load %arg3[%c0_541, %c6_542, %c7_543, %c0_544, %c0_545] : memref<1x8x8x2x8xf32, #tpu.memory_space<vmem>>, vector<1x1x1x2x8xf32>
    %334 = vector.shape_cast %333 : vector<1x1x1x2x8xf32> to vector<2x8xf32>
    %335 = vector.shape_cast %332 : vector<2x8xf32> to vector<1x1x1x2x8xf32>
    tpu.vector_store %arg3[%c0_541, %c6_542, %c7_543, %c0_544, %c0_545], %335 {strides = array<i32>} : memref<1x8x8x2x8xf32, #tpu.memory_space<vmem>>, vector<1x1x1x2x8xf32>,
    %c0_546 = arith.constant 0 : index
    %c0_547 = arith.constant 0 : index
    %c7_548 = arith.constant 7 : index
    %c0_549 = arith.constant 0 : index
    %c0_550 = arith.constant 0 : index
    %336 = vector.load %arg2[%c0_546, %c0_547, %c7_548, %c0_549, %c0_550] : memref<1x2x8x2x32xf32, #tpu.memory_space<vmem>>, vector<1x2x1x2x4xf32>
    %337 = vector.shape_cast %336 : vector<1x2x1x2x4xf32> to vector<2x2x4xf32>
    %338 = vector.shape_cast %337 : vector<2x2x4xf32> to vector<2x8xf32>
    %c0_551 = arith.constant 0 : index
    %c7_552 = arith.constant 7 : index
    %c0_553 = arith.constant 0 : index
    %c0_554 = arith.constant 0 : index
    %c0_555 = arith.constant 0 : index
    %339 = vector.load %arg3[%c0_551, %c7_552, %c0_553, %c0_554, %c0_555] : memref<1x8x8x2x8xf32, #tpu.memory_space<vmem>>, vector<1x1x1x2x8xf32>
    %340 = vector.shape_cast %339 : vector<1x1x1x2x8xf32> to vector<2x8xf32>
    %341 = vector.shape_cast %338 : vector<2x8xf32> to vector<1x1x1x2x8xf32>
    tpu.vector_store %arg3[%c0_551, %c7_552, %c0_553, %c0_554, %c0_555], %341 {strides = array<i32>} : memref<1x8x8x2x8xf32, #tpu.memory_space<vmem>>, vector<1x1x1x2x8xf32>,
    %c0_556 = arith.constant 0 : index
    %c0_557 = arith.constant 0 : index
    %c7_558 = arith.constant 7 : index
    %c0_559 = arith.constant 0 : index
    %c4_560 = arith.constant 4 : index
    %342 = vector.load %arg2[%c0_556, %c0_557, %c7_558, %c0_559, %c4_560] : memref<1x2x8x2x32xf32, #tpu.memory_space<vmem>>, vector<1x2x1x2x4xf32>
    %343 = vector.shape_cast %342 : vector<1x2x1x2x4xf32> to vector<2x2x4xf32>
    %344 = vector.shape_cast %343 : vector<2x2x4xf32> to vector<2x8xf32>
    %c0_561 = arith.constant 0 : index
    %c7_562 = arith.constant 7 : index
    %c1_563 = arith.constant 1 : index
    %c0_564 = arith.constant 0 : index
    %c0_565 = arith.constant 0 : index
    %345 = vector.load %arg3[%c0_561, %c7_562, %c1_563, %c0_564, %c0_565] : memref<1x8x8x2x8xf32, #tpu.memory_space<vmem>>, vector<1x1x1x2x8xf32>
    %346 = vector.shape_cast %345 : vector<1x1x1x2x8xf32> to vector<2x8xf32>
    %347 = vector.shape_cast %344 : vector<2x8xf32> to vector<1x1x1x2x8xf32>
    tpu.vector_store %arg3[%c0_561, %c7_562, %c1_563, %c0_564, %c0_565], %347 {strides = array<i32>} : memref<1x8x8x2x8xf32, #tpu.memory_space<vmem>>, vector<1x1x1x2x8xf32>,
    %c0_566 = arith.constant 0 : index
    %c0_567 = arith.constant 0 : index
    %c7_568 = arith.constant 7 : index
    %c0_569 = arith.constant 0 : index
    %c8_570 = arith.constant 8 : index
    %348 = vector.load %arg2[%c0_566, %c0_567, %c7_568, %c0_569, %c8_570] : memref<1x2x8x2x32xf32, #tpu.memory_space<vmem>>, vector<1x2x1x2x4xf32>
    %349 = vector.shape_cast %348 : vector<1x2x1x2x4xf32> to vector<2x2x4xf32>
    %350 = vector.shape_cast %349 : vector<2x2x4xf32> to vector<2x8xf32>
    %c0_571 = arith.constant 0 : index
    %c7_572 = arith.constant 7 : index
    %c2_573 = arith.constant 2 : index
    %c0_574 = arith.constant 0 : index
    %c0_575 = arith.constant 0 : index
    %351 = vector.load %arg3[%c0_571, %c7_572, %c2_573, %c0_574, %c0_575] : memref<1x8x8x2x8xf32, #tpu.memory_space<vmem>>, vector<1x1x1x2x8xf32>
    %352 = vector.shape_cast %351 : vector<1x1x1x2x8xf32> to vector<2x8xf32>
    %353 = vector.shape_cast %350 : vector<2x8xf32> to vector<1x1x1x2x8xf32>
    tpu.vector_store %arg3[%c0_571, %c7_572, %c2_573, %c0_574, %c0_575], %353 {strides = array<i32>} : memref<1x8x8x2x8xf32, #tpu.memory_space<vmem>>, vector<1x1x1x2x8xf32>,
    %c0_576 = arith.constant 0 : index
    %c0_577 = arith.constant 0 : index
    %c7_578 = arith.constant 7 : index
    %c0_579 = arith.constant 0 : index
    %c12_580 = arith.constant 12 : index
    %354 = vector.load %arg2[%c0_576, %c0_577, %c7_578, %c0_579, %c12_580] : memref<1x2x8x2x32xf32, #tpu.memory_space<vmem>>, vector<1x2x1x2x4xf32>
    %355 = vector.shape_cast %354 : vector<1x2x1x2x4xf32> to vector<2x2x4xf32>
    %356 = vector.shape_cast %355 : vector<2x2x4xf32> to vector<2x8xf32>
    %c0_581 = arith.constant 0 : index
    %c7_582 = arith.constant 7 : index
    %c3_583 = arith.constant 3 : index
    %c0_584 = arith.constant 0 : index
    %c0_585 = arith.constant 0 : index
    %357 = vector.load %arg3[%c0_581, %c7_582, %c3_583, %c0_584, %c0_585] : memref<1x8x8x2x8xf32, #tpu.memory_space<vmem>>, vector<1x1x1x2x8xf32>
    %358 = vector.shape_cast %357 : vector<1x1x1x2x8xf32> to vector<2x8xf32>
    %359 = vector.shape_cast %356 : vector<2x8xf32> to vector<1x1x1x2x8xf32>
    tpu.vector_store %arg3[%c0_581, %c7_582, %c3_583, %c0_584, %c0_585], %359 {strides = array<i32>} : memref<1x8x8x2x8xf32, #tpu.memory_space<vmem>>, vector<1x1x1x2x8xf32>,
    %c0_586 = arith.constant 0 : index
    %c0_587 = arith.constant 0 : index
    %c7_588 = arith.constant 7 : index
    %c0_589 = arith.constant 0 : index
    %c16_590 = arith.constant 16 : index
    %360 = vector.load %arg2[%c0_586, %c0_587, %c7_588, %c0_589, %c16_590] : memref<1x2x8x2x32xf32, #tpu.memory_space<vmem>>, vector<1x2x1x2x4xf32>
    %361 = vector.shape_cast %360 : vector<1x2x1x2x4xf32> to vector<2x2x4xf32>
    %362 = vector.shape_cast %361 : vector<2x2x4xf32> to vector<2x8xf32>
    %c0_591 = arith.constant 0 : index
    %c7_592 = arith.constant 7 : index
    %c4_593 = arith.constant 4 : index
    %c0_594 = arith.constant 0 : index
    %c0_595 = arith.constant 0 : index
    %363 = vector.load %arg3[%c0_591, %c7_592, %c4_593, %c0_594, %c0_595] : memref<1x8x8x2x8xf32, #tpu.memory_space<vmem>>, vector<1x1x1x2x8xf32>
    %364 = vector.shape_cast %363 : vector<1x1x1x2x8xf32> to vector<2x8xf32>
    %365 = vector.shape_cast %362 : vector<2x8xf32> to vector<1x1x1x2x8xf32>
    tpu.vector_store %arg3[%c0_591, %c7_592, %c4_593, %c0_594, %c0_595], %365 {strides = array<i32>} : memref<1x8x8x2x8xf32, #tpu.memory_space<vmem>>, vector<1x1x1x2x8xf32>,
    %c0_596 = arith.constant 0 : index
    %c0_597 = arith.constant 0 : index
    %c7_598 = arith.constant 7 : index
    %c0_599 = arith.constant 0 : index
    %c20_600 = arith.constant 20 : index
    %366 = vector.load %arg2[%c0_596, %c0_597, %c7_598, %c0_599, %c20_600] : memref<1x2x8x2x32xf32, #tpu.memory_space<vmem>>, vector<1x2x1x2x4xf32>
    %367 = vector.shape_cast %366 : vector<1x2x1x2x4xf32> to vector<2x2x4xf32>
    %368 = vector.shape_cast %367 : vector<2x2x4xf32> to vector<2x8xf32>
    %c0_601 = arith.constant 0 : index
    %c7_602 = arith.constant 7 : index
    %c5_603 = arith.constant 5 : index
    %c0_604 = arith.constant 0 : index
    %c0_605 = arith.constant 0 : index
    %369 = vector.load %arg3[%c0_601, %c7_602, %c5_603, %c0_604, %c0_605] : memref<1x8x8x2x8xf32, #tpu.memory_space<vmem>>, vector<1x1x1x2x8xf32>
    %370 = vector.shape_cast %369 : vector<1x1x1x2x8xf32> to vector<2x8xf32>
    %371 = vector.shape_cast %368 : vector<2x8xf32> to vector<1x1x1x2x8xf32>
    tpu.vector_store %arg3[%c0_601, %c7_602, %c5_603, %c0_604, %c0_605], %371 {strides = array<i32>} : memref<1x8x8x2x8xf32, #tpu.memory_space<vmem>>, vector<1x1x1x2x8xf32>,
    %c0_606 = arith.constant 0 : index
    %c0_607 = arith.constant 0 : index
    %c7_608 = arith.constant 7 : index
    %c0_609 = arith.constant 0 : index
    %c24_610 = arith.constant 24 : index
    %372 = vector.load %arg2[%c0_606, %c0_607, %c7_608, %c0_609, %c24_610] : memref<1x2x8x2x32xf32, #tpu.memory_space<vmem>>, vector<1x2x1x2x4xf32>
    %373 = vector.shape_cast %372 : vector<1x2x1x2x4xf32> to vector<2x2x4xf32>
    %374 = vector.shape_cast %373 : vector<2x2x4xf32> to vector<2x8xf32>
    %c0_611 = arith.constant 0 : index
    %c7_612 = arith.constant 7 : index
    %c6_613 = arith.constant 6 : index
    %c0_614 = arith.constant 0 : index
    %c0_615 = arith.constant 0 : index
    %375 = vector.load %arg3[%c0_611, %c7_612, %c6_613, %c0_614, %c0_615] : memref<1x8x8x2x8xf32, #tpu.memory_space<vmem>>, vector<1x1x1x2x8xf32>
    %376 = vector.shape_cast %375 : vector<1x1x1x2x8xf32> to vector<2x8xf32>
    %377 = vector.shape_cast %374 : vector<2x8xf32> to vector<1x1x1x2x8xf32>
    tpu.vector_store %arg3[%c0_611, %c7_612, %c6_613, %c0_614, %c0_615], %377 {strides = array<i32>} : memref<1x8x8x2x8xf32, #tpu.memory_space<vmem>>, vector<1x1x1x2x8xf32>,
    %c0_616 = arith.constant 0 : index
    %c0_617 = arith.constant 0 : index
    %c7_618 = arith.constant 7 : index
    %c0_619 = arith.constant 0 : index
    %c28_620 = arith.constant 28 : index
    %378 = vector.load %arg2[%c0_616, %c0_617, %c7_618, %c0_619, %c28_620] : memref<1x2x8x2x32xf32, #tpu.memory_space<vmem>>, vector<1x2x1x2x4xf32>
    %379 = vector.shape_cast %378 : vector<1x2x1x2x4xf32> to vector<2x2x4xf32>
    %380 = vector.shape_cast %379 : vector<2x2x4xf32> to vector<2x8xf32>
    %c0_621 = arith.constant 0 : index
    %c7_622 = arith.constant 7 : index
    %c7_623 = arith.constant 7 : index
    %c0_624 = arith.constant 0 : index
    %c0_625 = arith.constant 0 : index
    %381 = vector.load %arg3[%c0_621, %c7_622, %c7_623, %c0_624, %c0_625] : memref<1x8x8x2x8xf32, #tpu.memory_space<vmem>>, vector<1x1x1x2x8xf32>
    %382 = vector.shape_cast %381 : vector<1x1x1x2x8xf32> to vector<2x8xf32>
    %383 = vector.shape_cast %380 : vector<2x8xf32> to vector<1x1x1x2x8xf32>
    tpu.vector_store %arg3[%c0_621, %c7_622, %c7_623, %c0_624, %c0_625], %383 {strides = array<i32>} : memref<1x8x8x2x8xf32, #tpu.memory_space<vmem>>, vector<1x1x1x2x8xf32>,
    return
  }
  func.func @transform_0(%arg0: i32, %arg1: i32) -> (i32, i32, i32, i32, i32) {
    %c0_i32 = arith.constant 0 : i32
    %c0_i32_0 = arith.constant 0 : i32
    %c0_i32_1 = arith.constant 0 : i32
    %c0_i32_2 = arith.constant 0 : i32
    return %arg0, %arg1, %c0_i32, %c0_i32_0, %c0_i32_1 : i32, i32, i32, i32, i32
  }
  func.func @transform_1(%arg0: i32, %arg1: i32) -> (i32, i32, i32, i32, i32) {
    %c0_i32 = arith.constant 0 : i32
    %c0_i32_0 = arith.constant 0 : i32
    %c0_i32_1 = arith.constant 0 : i32
    %c0_i32_2 = arith.constant 0 : i32
    return %arg0, %c0_i32, %c0_i32_0, %arg1, %c0_i32_1 : i32, i32, i32, i32, i32
  }
}

module attributes {stable_mosaic.version = 11 : i64} {
  func.func @_patchify_kernel_sliced(%arg0: i32, %arg1: i32, %arg2: memref<1x2x8x2x8x4xf32, #tpu.memory_space<vmem>>, %arg3: memref<1x8x8x2x2x4xf32, #tpu.memory_space<vmem>>) attributes {dimension_semantics = [#tpu.dimension_semantics<parallel>, #tpu.dimension_semantics<parallel>], iteration_bounds = array<i64: 2, 1>, scalar_prefetch = 0 : i64, scratch_operands = 0 : i64, tpu.core_type = #tpu.core_type<tc>, window_params = [{transform_indices = @transform_0, window_bounds = array<i64: 1, 2, 8, 2, 8, 4>}, {transform_indices = @transform_1, window_bounds = array<i64: 1, 8, 8, 2, 2, 4>}]} {
    %c0 = arith.constant 0 : index
    %c0_0 = arith.constant 0 : index
    %c0_1 = arith.constant 0 : index
    %c0_2 = arith.constant 0 : index
    %c0_3 = arith.constant 0 : index
    %c0_4 = arith.constant 0 : index
    %0 = vector.load %arg2[%c0, %c0_0, %c0_1, %c0_2, %c0_3, %c0_4] : memref<1x2x8x2x8x4xf32, #tpu.memory_space<vmem>>, vector<1x2x1x2x1x4xf32>
    %1 = vector.shape_cast %0 : vector<1x2x1x2x1x4xf32> to vector<2x2x4xf32>
    %c0_5 = arith.constant 0 : index
    %c0_6 = arith.constant 0 : index
    %c0_7 = arith.constant 0 : index
    %c0_8 = arith.constant 0 : index
    %c0_9 = arith.constant 0 : index
    %c0_10 = arith.constant 0 : index
    %2 = vector.load %arg3[%c0_5, %c0_6, %c0_7, %c0_8, %c0_9, %c0_10] : memref<1x8x8x2x2x4xf32, #tpu.memory_space<vmem>>, vector<1x1x1x2x2x4xf32>
    %3 = vector.shape_cast %2 : vector<1x1x1x2x2x4xf32> to vector<2x2x4xf32>
    %4 = vector.shape_cast %1 : vector<2x2x4xf32> to vector<1x1x1x2x2x4xf32>
    tpu.vector_store %arg3[%c0_5, %c0_6, %c0_7, %c0_8, %c0_9, %c0_10], %4 {strides = array<i32>} : memref<1x8x8x2x2x4xf32, #tpu.memory_space<vmem>>, vector<1x1x1x2x2x4xf32>,
    %c0_11 = arith.constant 0 : index
    %c0_12 = arith.constant 0 : index
    %c0_13 = arith.constant 0 : index
    %c0_14 = arith.constant 0 : index
    %c1 = arith.constant 1 : index
    %c0_15 = arith.constant 0 : index
    %5 = vector.load %arg2[%c0_11, %c0_12, %c0_13, %c0_14, %c1, %c0_15] : memref<1x2x8x2x8x4xf32, #tpu.memory_space<vmem>>, vector<1x2x1x2x1x4xf32>
    %6 = vector.shape_cast %5 : vector<1x2x1x2x1x4xf32> to vector<2x2x4xf32>
    %c0_16 = arith.constant 0 : index
    %c0_17 = arith.constant 0 : index
    %c1_18 = arith.constant 1 : index
    %c0_19 = arith.constant 0 : index
    %c0_20 = arith.constant 0 : index
    %c0_21 = arith.constant 0 : index
    %7 = vector.load %arg3[%c0_16, %c0_17, %c1_18, %c0_19, %c0_20, %c0_21] : memref<1x8x8x2x2x4xf32, #tpu.memory_space<vmem>>, vector<1x1x1x2x2x4xf32>
    %8 = vector.shape_cast %7 : vector<1x1x1x2x2x4xf32> to vector<2x2x4xf32>
    %9 = vector.shape_cast %6 : vector<2x2x4xf32> to vector<1x1x1x2x2x4xf32>
    tpu.vector_store %arg3[%c0_16, %c0_17, %c1_18, %c0_19, %c0_20, %c0_21], %9 {strides = array<i32>} : memref<1x8x8x2x2x4xf32, #tpu.memory_space<vmem>>, vector<1x1x1x2x2x4xf32>,
    %c0_22 = arith.constant 0 : index
    %c0_23 = arith.constant 0 : index
    %c0_24 = arith.constant 0 : index
    %c0_25 = arith.constant 0 : index
    %c2 = arith.constant 2 : index
    %c0_26 = arith.constant 0 : index
    %10 = vector.load %arg2[%c0_22, %c0_23, %c0_24, %c0_25, %c2, %c0_26] : memref<1x2x8x2x8x4xf32, #tpu.memory_space<vmem>>, vector<1x2x1x2x1x4xf32>
    %11 = vector.shape_cast %10 : vector<1x2x1x2x1x4xf32> to vector<2x2x4xf32>
    %c0_27 = arith.constant 0 : index
    %c0_28 = arith.constant 0 : index
    %c2_29 = arith.constant 2 : index
    %c0_30 = arith.constant 0 : index
    %c0_31 = arith.constant 0 : index
    %c0_32 = arith.constant 0 : index
    %12 = vector.load %arg3[%c0_27, %c0_28, %c2_29, %c0_30, %c0_31, %c0_32] : memref<1x8x8x2x2x4xf32, #tpu.memory_space<vmem>>, vector<1x1x1x2x2x4xf32>
    %13 = vector.shape_cast %12 : vector<1x1x1x2x2x4xf32> to vector<2x2x4xf32>
    %14 = vector.shape_cast %11 : vector<2x2x4xf32> to vector<1x1x1x2x2x4xf32>
    tpu.vector_store %arg3[%c0_27, %c0_28, %c2_29, %c0_30, %c0_31, %c0_32], %14 {strides = array<i32>} : memref<1x8x8x2x2x4xf32, #tpu.memory_space<vmem>>, vector<1x1x1x2x2x4xf32>,
    %c0_33 = arith.constant 0 : index
    %c0_34 = arith.constant 0 : index
    %c0_35 = arith.constant 0 : index
    %c0_36 = arith.constant 0 : index
    %c3 = arith.constant 3 : index
    %c0_37 = arith.constant 0 : index
    %15 = vector.load %arg2[%c0_33, %c0_34, %c0_35, %c0_36, %c3, %c0_37] : memref<1x2x8x2x8x4xf32, #tpu.memory_space<vmem>>, vector<1x2x1x2x1x4xf32>
    %16 = vector.shape_cast %15 : vector<1x2x1x2x1x4xf32> to vector<2x2x4xf32>
    %c0_38 = arith.constant 0 : index
    %c0_39 = arith.constant 0 : index
    %c3_40 = arith.constant 3 : index
    %c0_41 = arith.constant 0 : index
    %c0_42 = arith.constant 0 : index
    %c0_43 = arith.constant 0 : index
    %17 = vector.load %arg3[%c0_38, %c0_39, %c3_40, %c0_41, %c0_42, %c0_43] : memref<1x8x8x2x2x4xf32, #tpu.memory_space<vmem>>, vector<1x1x1x2x2x4xf32>
    %18 = vector.shape_cast %17 : vector<1x1x1x2x2x4xf32> to vector<2x2x4xf32>
    %19 = vector.shape_cast %16 : vector<2x2x4xf32> to vector<1x1x1x2x2x4xf32>
    tpu.vector_store %arg3[%c0_38, %c0_39, %c3_40, %c0_41, %c0_42, %c0_43], %19 {strides = array<i32>} : memref<1x8x8x2x2x4xf32, #tpu.memory_space<vmem>>, vector<1x1x1x2x2x4xf32>,
    %c0_44 = arith.constant 0 : index
    %c0_45 = arith.constant 0 : index
    %c0_46 = arith.constant 0 : index
    %c0_47 = arith.constant 0 : index
    %c4 = arith.constant 4 : index
    %c0_48 = arith.constant 0 : index
    %20 = vector.load %arg2[%c0_44, %c0_45, %c0_46, %c0_47, %c4, %c0_48] : memref<1x2x8x2x8x4xf32, #tpu.memory_space<vmem>>, vector<1x2x1x2x1x4xf32>
    %21 = vector.shape_cast %20 : vector<1x2x1x2x1x4xf32> to vector<2x2x4xf32>
    %c0_49 = arith.constant 0 : index
    %c0_50 = arith.constant 0 : index
    %c4_51 = arith.constant 4 : index
    %c0_52 = arith.constant 0 : index
    %c0_53 = arith.constant 0 : index
    %c0_54 = arith.constant 0 : index
    %22 = vector.load %arg3[%c0_49, %c0_50, %c4_51, %c0_52, %c0_53, %c0_54] : memref<1x8x8x2x2x4xf32, #tpu.memory_space<vmem>>, vector<1x1x1x2x2x4xf32>
    %23 = vector.shape_cast %22 : vector<1x1x1x2x2x4xf32> to vector<2x2x4xf32>
    %24 = vector.shape_cast %21 : vector<2x2x4xf32> to vector<1x1x1x2x2x4xf32>
    tpu.vector_store %arg3[%c0_49, %c0_50, %c4_51, %c0_52, %c0_53, %c0_54], %24 {strides = array<i32>} : memref<1x8x8x2x2x4xf32, #tpu.memory_space<vmem>>, vector<1x1x1x2x2x4xf32>,
    %c0_55 = arith.constant 0 : index
    %c0_56 = arith.constant 0 : index
    %c0_57 = arith.constant 0 : index
    %c0_58 = arith.constant 0 : index
    %c5 = arith.constant 5 : index
    %c0_59 = arith.constant 0 : index
    %25 = vector.load %arg2[%c0_55, %c0_56, %c0_57, %c0_58, %c5, %c0_59] : memref<1x2x8x2x8x4xf32, #tpu.memory_space<vmem>>, vector<1x2x1x2x1x4xf32>
    %26 = vector.shape_cast %25 : vector<1x2x1x2x1x4xf32> to vector<2x2x4xf32>
    %c0_60 = arith.constant 0 : index
    %c0_61 = arith.constant 0 : index
    %c5_62 = arith.constant 5 : index
    %c0_63 = arith.constant 0 : index
    %c0_64 = arith.constant 0 : index
    %c0_65 = arith.constant 0 : index
    %27 = vector.load %arg3[%c0_60, %c0_61, %c5_62, %c0_63, %c0_64, %c0_65] : memref<1x8x8x2x2x4xf32, #tpu.memory_space<vmem>>, vector<1x1x1x2x2x4xf32>
    %28 = vector.shape_cast %27 : vector<1x1x1x2x2x4xf32> to vector<2x2x4xf32>
    %29 = vector.shape_cast %26 : vector<2x2x4xf32> to vector<1x1x1x2x2x4xf32>
    tpu.vector_store %arg3[%c0_60, %c0_61, %c5_62, %c0_63, %c0_64, %c0_65], %29 {strides = array<i32>} : memref<1x8x8x2x2x4xf32, #tpu.memory_space<vmem>>, vector<1x1x1x2x2x4xf32>,
    %c0_66 = arith.constant 0 : index
    %c0_67 = arith.constant 0 : index
    %c0_68 = arith.constant 0 : index
    %c0_69 = arith.constant 0 : index
    %c6 = arith.constant 6 : index
    %c0_70 = arith.constant 0 : index
    %30 = vector.load %arg2[%c0_66, %c0_67, %c0_68, %c0_69, %c6, %c0_70] : memref<1x2x8x2x8x4xf32, #tpu.memory_space<vmem>>, vector<1x2x1x2x1x4xf32>
    %31 = vector.shape_cast %30 : vector<1x2x1x2x1x4xf32> to vector<2x2x4xf32>
    %c0_71 = arith.constant 0 : index
    %c0_72 = arith.constant 0 : index
    %c6_73 = arith.constant 6 : index
    %c0_74 = arith.constant 0 : index
    %c0_75 = arith.constant 0 : index
    %c0_76 = arith.constant 0 : index
    %32 = vector.load %arg3[%c0_71, %c0_72, %c6_73, %c0_74, %c0_75, %c0_76] : memref<1x8x8x2x2x4xf32, #tpu.memory_space<vmem>>, vector<1x1x1x2x2x4xf32>
    %33 = vector.shape_cast %32 : vector<1x1x1x2x2x4xf32> to vector<2x2x4xf32>
    %34 = vector.shape_cast %31 : vector<2x2x4xf32> to vector<1x1x1x2x2x4xf32>
    tpu.vector_store %arg3[%c0_71, %c0_72, %c6_73, %c0_74, %c0_75, %c0_76], %34 {strides = array<i32>} : memref<1x8x8x2x2x4xf32, #tpu.memory_space<vmem>>, vector<1x1x1x2x2x4xf32>,
    %c0_77 = arith.constant 0 : index
    %c0_78 = arith.constant 0 : index
    %c0_79 = arith.constant 0 : index
    %c0_80 = arith.constant 0 : index
    %c7 = arith.constant 7 : index
    %c0_81 = arith.constant 0 : index
    %35 = vector.load %arg2[%c0_77, %c0_78, %c0_79, %c0_80, %c7, %c0_81] : memref<1x2x8x2x8x4xf32, #tpu.memory_space<vmem>>, vector<1x2x1x2x1x4xf32>
    %36 = vector.shape_cast %35 : vector<1x2x1x2x1x4xf32> to vector<2x2x4xf32>
    %c0_82 = arith.constant 0 : index
    %c0_83 = arith.constant 0 : index
    %c7_84 = arith.constant 7 : index
    %c0_85 = arith.constant 0 : index
    %c0_86 = arith.constant 0 : index
    %c0_87 = arith.constant 0 : index
    %37 = vector.load %arg3[%c0_82, %c0_83, %c7_84, %c0_85, %c0_86, %c0_87] : memref<1x8x8x2x2x4xf32, #tpu.memory_space<vmem>>, vector<1x1x1x2x2x4xf32>
    %38 = vector.shape_cast %37 : vector<1x1x1x2x2x4xf32> to vector<2x2x4xf32>
    %39 = vector.shape_cast %36 : vector<2x2x4xf32> to vector<1x1x1x2x2x4xf32>
    tpu.vector_store %arg3[%c0_82, %c0_83, %c7_84, %c0_85, %c0_86, %c0_87], %39 {strides = array<i32>} : memref<1x8x8x2x2x4xf32, #tpu.memory_space<vmem>>, vector<1x1x1x2x2x4xf32>,
    %c0_88 = arith.constant 0 : index
    %c0_89 = arith.constant 0 : index
    %c1_90 = arith.constant 1 : index
    %c0_91 = arith.constant 0 : index
    %c0_92 = arith.constant 0 : index
    %c0_93 = arith.constant 0 : index
    %40 = vector.load %arg2[%c0_88, %c0_89, %c1_90, %c0_91, %c0_92, %c0_93] : memref<1x2x8x2x8x4xf32, #tpu.memory_space<vmem>>, vector<1x2x1x2x1x4xf32>
    %41 = vector.shape_cast %40 : vector<1x2x1x2x1x4xf32> to vector<2x2x4xf32>
    %c0_94 = arith.constant 0 : index
    %c1_95 = arith.constant 1 : index
    %c0_96 = arith.constant 0 : index
    %c0_97 = arith.constant 0 : index
    %c0_98 = arith.constant 0 : index
    %c0_99 = arith.constant 0 : index
    %42 = vector.load %arg3[%c0_94, %c1_95, %c0_96, %c0_97, %c0_98, %c0_99] : memref<1x8x8x2x2x4xf32, #tpu.memory_space<vmem>>, vector<1x1x1x2x2x4xf32>
    %43 = vector.shape_cast %42 : vector<1x1x1x2x2x4xf32> to vector<2x2x4xf32>
    %44 = vector.shape_cast %41 : vector<2x2x4xf32> to vector<1x1x1x2x2x4xf32>
    tpu.vector_store %arg3[%c0_94, %c1_95, %c0_96, %c0_97, %c0_98, %c0_99], %44 {strides = array<i32>} : memref<1x8x8x2x2x4xf32, #tpu.memory_space<vmem>>, vector<1x1x1x2x2x4xf32>,
    %c0_100 = arith.constant 0 : index
    %c0_101 = arith.constant 0 : index
    %c1_102 = arith.constant 1 : index
    %c0_103 = arith.constant 0 : index
    %c1_104 = arith.constant 1 : index
    %c0_105 = arith.constant 0 : index
    %45 = vector.load %arg2[%c0_100, %c0_101, %c1_102, %c0_103, %c1_104, %c0_105] : memref<1x2x8x2x8x4xf32, #tpu.memory_space<vmem>>, vector<1x2x1x2x1x4xf32>
    %46 = vector.shape_cast %45 : vector<1x2x1x2x1x4xf32> to vector<2x2x4xf32>
    %c0_106 = arith.constant 0 : index
    %c1_107 = arith.constant 1 : index
    %c1_108 = arith.constant 1 : index
    %c0_109 = arith.constant 0 : index
    %c0_110 = arith.constant 0 : index
    %c0_111 = arith.constant 0 : index
    %47 = vector.load %arg3[%c0_106, %c1_107, %c1_108, %c0_109, %c0_110, %c0_111] : memref<1x8x8x2x2x4xf32, #tpu.memory_space<vmem>>, vector<1x1x1x2x2x4xf32>
    %48 = vector.shape_cast %47 : vector<1x1x1x2x2x4xf32> to vector<2x2x4xf32>
    %49 = vector.shape_cast %46 : vector<2x2x4xf32> to vector<1x1x1x2x2x4xf32>
    tpu.vector_store %arg3[%c0_106, %c1_107, %c1_108, %c0_109, %c0_110, %c0_111], %49 {strides = array<i32>} : memref<1x8x8x2x2x4xf32, #tpu.memory_space<vmem>>, vector<1x1x1x2x2x4xf32>,
    %c0_112 = arith.constant 0 : index
    %c0_113 = arith.constant 0 : index
    %c1_114 = arith.constant 1 : index
    %c0_115 = arith.constant 0 : index
    %c2_116 = arith.constant 2 : index
    %c0_117 = arith.constant 0 : index
    %50 = vector.load %arg2[%c0_112, %c0_113, %c1_114, %c0_115, %c2_116, %c0_117] : memref<1x2x8x2x8x4xf32, #tpu.memory_space<vmem>>, vector<1x2x1x2x1x4xf32>
    %51 = vector.shape_cast %50 : vector<1x2x1x2x1x4xf32> to vector<2x2x4xf32>
    %c0_118 = arith.constant 0 : index
    %c1_119 = arith.constant 1 : index
    %c2_120 = arith.constant 2 : index
    %c0_121 = arith.constant 0 : index
    %c0_122 = arith.constant 0 : index
    %c0_123 = arith.constant 0 : index
    %52 = vector.load %arg3[%c0_118, %c1_119, %c2_120, %c0_121, %c0_122, %c0_123] : memref<1x8x8x2x2x4xf32, #tpu.memory_space<vmem>>, vector<1x1x1x2x2x4xf32>
    %53 = vector.shape_cast %52 : vector<1x1x1x2x2x4xf32> to vector<2x2x4xf32>
    %54 = vector.shape_cast %51 : vector<2x2x4xf32> to vector<1x1x1x2x2x4xf32>
    tpu.vector_store %arg3[%c0_118, %c1_119, %c2_120, %c0_121, %c0_122, %c0_123], %54 {strides = array<i32>} : memref<1x8x8x2x2x4xf32, #tpu.memory_space<vmem>>, vector<1x1x1x2x2x4xf32>,
    %c0_124 = arith.constant 0 : index
    %c0_125 = arith.constant 0 : index
    %c1_126 = arith.constant 1 : index
    %c0_127 = arith.constant 0 : index
    %c3_128 = arith.constant 3 : index
    %c0_129 = arith.constant 0 : index
    %55 = vector.load %arg2[%c0_124, %c0_125, %c1_126, %c0_127, %c3_128, %c0_129] : memref<1x2x8x2x8x4xf32, #tpu.memory_space<vmem>>, vector<1x2x1x2x1x4xf32>
    %56 = vector.shape_cast %55 : vector<1x2x1x2x1x4xf32> to vector<2x2x4xf32>
    %c0_130 = arith.constant 0 : index
    %c1_131 = arith.constant 1 : index
    %c3_132 = arith.constant 3 : index
    %c0_133 = arith.constant 0 : index
    %c0_134 = arith.constant 0 : index
    %c0_135 = arith.constant 0 : index
    %57 = vector.load %arg3[%c0_130, %c1_131, %c3_132, %c0_133, %c0_134, %c0_135] : memref<1x8x8x2x2x4xf32, #tpu.memory_space<vmem>>, vector<1x1x1x2x2x4xf32>
    %58 = vector.shape_cast %57 : vector<1x1x1x2x2x4xf32> to vector<2x2x4xf32>
    %59 = vector.shape_cast %56 : vector<2x2x4xf32> to vector<1x1x1x2x2x4xf32>
    tpu.vector_store %arg3[%c0_130, %c1_131, %c3_132, %c0_133, %c0_134, %c0_135], %59 {strides = array<i32>} : memref<1x8x8x2x2x4xf32, #tpu.memory_space<vmem>>, vector<1x1x1x2x2x4xf32>,
    %c0_136 = arith.constant 0 : index
    %c0_137 = arith.constant 0 : index
    %c1_138 = arith.constant 1 : index
    %c0_139 = arith.constant 0 : index
    %c4_140 = arith.constant 4 : index
    %c0_141 = arith.constant 0 : index
    %60 = vector.load %arg2[%c0_136, %c0_137, %c1_138, %c0_139, %c4_140, %c0_141] : memref<1x2x8x2x8x4xf32, #tpu.memory_space<vmem>>, vector<1x2x1x2x1x4xf32>
    %61 = vector.shape_cast %60 : vector<1x2x1x2x1x4xf32> to vector<2x2x4xf32>
    %c0_142 = arith.constant 0 : index
    %c1_143 = arith.constant 1 : index
    %c4_144 = arith.constant 4 : index
    %c0_145 = arith.constant 0 : index
    %c0_146 = arith.constant 0 : index
    %c0_147 = arith.constant 0 : index
    %62 = vector.load %arg3[%c0_142, %c1_143, %c4_144, %c0_145, %c0_146, %c0_147] : memref<1x8x8x2x2x4xf32, #tpu.memory_space<vmem>>, vector<1x1x1x2x2x4xf32>
    %63 = vector.shape_cast %62 : vector<1x1x1x2x2x4xf32> to vector<2x2x4xf32>
    %64 = vector.shape_cast %61 : vector<2x2x4xf32> to vector<1x1x1x2x2x4xf32>
    tpu.vector_store %arg3[%c0_142, %c1_143, %c4_144, %c0_145, %c0_146, %c0_147], %64 {strides = array<i32>} : memref<1x8x8x2x2x4xf32, #tpu.memory_space<vmem>>, vector<1x1x1x2x2x4xf32>,
    %c0_148 = arith.constant 0 : index
    %c0_149 = arith.constant 0 : index
    %c1_150 = arith.constant 1 : index
    %c0_151 = arith.constant 0 : index
    %c5_152 = arith.constant 5 : index
    %c0_153 = arith.constant 0 : index
    %65 = vector.load %arg2[%c0_148, %c0_149, %c1_150, %c0_151, %c5_152, %c0_153] : memref<1x2x8x2x8x4xf32, #tpu.memory_space<vmem>>, vector<1x2x1x2x1x4xf32>
    %66 = vector.shape_cast %65 : vector<1x2x1x2x1x4xf32> to vector<2x2x4xf32>
    %c0_154 = arith.constant 0 : index
    %c1_155 = arith.constant 1 : index
    %c5_156 = arith.constant 5 : index
    %c0_157 = arith.constant 0 : index
    %c0_158 = arith.constant 0 : index
    %c0_159 = arith.constant 0 : index
    %67 = vector.load %arg3[%c0_154, %c1_155, %c5_156, %c0_157, %c0_158, %c0_159] : memref<1x8x8x2x2x4xf32, #tpu.memory_space<vmem>>, vector<1x1x1x2x2x4xf32>
    %68 = vector.shape_cast %67 : vector<1x1x1x2x2x4xf32> to vector<2x2x4xf32>
    %69 = vector.shape_cast %66 : vector<2x2x4xf32> to vector<1x1x1x2x2x4xf32>
    tpu.vector_store %arg3[%c0_154, %c1_155, %c5_156, %c0_157, %c0_158, %c0_159], %69 {strides = array<i32>} : memref<1x8x8x2x2x4xf32, #tpu.memory_space<vmem>>, vector<1x1x1x2x2x4xf32>,
    %c0_160 = arith.constant 0 : index
    %c0_161 = arith.constant 0 : index
    %c1_162 = arith.constant 1 : index
    %c0_163 = arith.constant 0 : index
    %c6_164 = arith.constant 6 : index
    %c0_165 = arith.constant 0 : index
    %70 = vector.load %arg2[%c0_160, %c0_161, %c1_162, %c0_163, %c6_164, %c0_165] : memref<1x2x8x2x8x4xf32, #tpu.memory_space<vmem>>, vector<1x2x1x2x1x4xf32>
    %71 = vector.shape_cast %70 : vector<1x2x1x2x1x4xf32> to vector<2x2x4xf32>
    %c0_166 = arith.constant 0 : index
    %c1_167 = arith.constant 1 : index
    %c6_168 = arith.constant 6 : index
    %c0_169 = arith.constant 0 : index
    %c0_170 = arith.constant 0 : index
    %c0_171 = arith.constant 0 : index
    %72 = vector.load %arg3[%c0_166, %c1_167, %c6_168, %c0_169, %c0_170, %c0_171] : memref<1x8x8x2x2x4xf32, #tpu.memory_space<vmem>>, vector<1x1x1x2x2x4xf32>
    %73 = vector.shape_cast %72 : vector<1x1x1x2x2x4xf32> to vector<2x2x4xf32>
    %74 = vector.shape_cast %71 : vector<2x2x4xf32> to vector<1x1x1x2x2x4xf32>
    tpu.vector_store %arg3[%c0_166, %c1_167, %c6_168, %c0_169, %c0_170, %c0_171], %74 {strides = array<i32>} : memref<1x8x8x2x2x4xf32, #tpu.memory_space<vmem>>, vector<1x1x1x2x2x4xf32>,
    %c0_172 = arith.constant 0 : index
    %c0_173 = arith.constant 0 : index
    %c1_174 = arith.constant 1 : index
    %c0_175 = arith.constant 0 : index
    %c7_176 = arith.constant 7 : index
    %c0_177 = arith.constant 0 : index
    %75 = vector.load %arg2[%c0_172, %c0_173, %c1_174, %c0_175, %c7_176, %c0_177] : memref<1x2x8x2x8x4xf32, #tpu.memory_space<vmem>>, vector<1x2x1x2x1x4xf32>
    %76 = vector.shape_cast %75 : vector<1x2x1x2x1x4xf32> to vector<2x2x4xf32>
    %c0_178 = arith.constant 0 : index
    %c1_179 = arith.constant 1 : index
    %c7_180 = arith.constant 7 : index
    %c0_181 = arith.constant 0 : index
    %c0_182 = arith.constant 0 : index
    %c0_183 = arith.constant 0 : index
    %77 = vector.load %arg3[%c0_178, %c1_179, %c7_180, %c0_181, %c0_182, %c0_183] : memref<1x8x8x2x2x4xf32, #tpu.memory_space<vmem>>, vector<1x1x1x2x2x4xf32>
    %78 = vector.shape_cast %77 : vector<1x1x1x2x2x4xf32> to vector<2x2x4xf32>
    %79 = vector.shape_cast %76 : vector<2x2x4xf32> to vector<1x1x1x2x2x4xf32>
    tpu.vector_store %arg3[%c0_178, %c1_179, %c7_180, %c0_181, %c0_182, %c0_183], %79 {strides = array<i32>} : memref<1x8x8x2x2x4xf32, #tpu.memory_space<vmem>>, vector<1x1x1x2x2x4xf32>,
    %c0_184 = arith.constant 0 : index
    %c0_185 = arith.constant 0 : index
    %c2_186 = arith.constant 2 : index
    %c0_187 = arith.constant 0 : index
    %c0_188 = arith.constant 0 : index
    %c0_189 = arith.constant 0 : index
    %80 = vector.load %arg2[%c0_184, %c0_185, %c2_186, %c0_187, %c0_188, %c0_189] : memref<1x2x8x2x8x4xf32, #tpu.memory_space<vmem>>, vector<1x2x1x2x1x4xf32>
    %81 = vector.shape_cast %80 : vector<1x2x1x2x1x4xf32> to vector<2x2x4xf32>
    %c0_190 = arith.constant 0 : index
    %c2_191 = arith.constant 2 : index
    %c0_192 = arith.constant 0 : index
    %c0_193 = arith.constant 0 : index
    %c0_194 = arith.constant 0 : index
    %c0_195 = arith.constant 0 : index
    %82 = vector.load %arg3[%c0_190, %c2_191, %c0_192, %c0_193, %c0_194, %c0_195] : memref<1x8x8x2x2x4xf32, #tpu.memory_space<vmem>>, vector<1x1x1x2x2x4xf32>
    %83 = vector.shape_cast %82 : vector<1x1x1x2x2x4xf32> to vector<2x2x4xf32>
    %84 = vector.shape_cast %81 : vector<2x2x4xf32> to vector<1x1x1x2x2x4xf32>
    tpu.vector_store %arg3[%c0_190, %c2_191, %c0_192, %c0_193, %c0_194, %c0_195], %84 {strides = array<i32>} : memref<1x8x8x2x2x4xf32, #tpu.memory_space<vmem>>, vector<1x1x1x2x2x4xf32>,
    %c0_196 = arith.constant 0 : index
    %c0_197 = arith.constant 0 : index
    %c2_198 = arith.constant 2 : index
    %c0_199 = arith.constant 0 : index
    %c1_200 = arith.constant 1 : index
    %c0_201 = arith.constant 0 : index
    %85 = vector.load %arg2[%c0_196, %c0_197, %c2_198, %c0_199, %c1_200, %c0_201] : memref<1x2x8x2x8x4xf32, #tpu.memory_space<vmem>>, vector<1x2x1x2x1x4xf32>
    %86 = vector.shape_cast %85 : vector<1x2x1x2x1x4xf32> to vector<2x2x4xf32>
    %c0_202 = arith.constant 0 : index
    %c2_203 = arith.constant 2 : index
    %c1_204 = arith.constant 1 : index
    %c0_205 = arith.constant 0 : index
    %c0_206 = arith.constant 0 : index
    %c0_207 = arith.constant 0 : index
    %87 = vector.load %arg3[%c0_202, %c2_203, %c1_204, %c0_205, %c0_206, %c0_207] : memref<1x8x8x2x2x4xf32, #tpu.memory_space<vmem>>, vector<1x1x1x2x2x4xf32>
    %88 = vector.shape_cast %87 : vector<1x1x1x2x2x4xf32> to vector<2x2x4xf32>
    %89 = vector.shape_cast %86 : vector<2x2x4xf32> to vector<1x1x1x2x2x4xf32>
    tpu.vector_store %arg3[%c0_202, %c2_203, %c1_204, %c0_205, %c0_206, %c0_207], %89 {strides = array<i32>} : memref<1x8x8x2x2x4xf32, #tpu.memory_space<vmem>>, vector<1x1x1x2x2x4xf32>,
    %c0_208 = arith.constant 0 : index
    %c0_209 = arith.constant 0 : index
    %c2_210 = arith.constant 2 : index
    %c0_211 = arith.constant 0 : index
    %c2_212 = arith.constant 2 : index
    %c0_213 = arith.constant 0 : index
    %90 = vector.load %arg2[%c0_208, %c0_209, %c2_210, %c0_211, %c2_212, %c0_213] : memref<1x2x8x2x8x4xf32, #tpu.memory_space<vmem>>, vector<1x2x1x2x1x4xf32>
    %91 = vector.shape_cast %90 : vector<1x2x1x2x1x4xf32> to vector<2x2x4xf32>
    %c0_214 = arith.constant 0 : index
    %c2_215 = arith.constant 2 : index
    %c2_216 = arith.constant 2 : index
    %c0_217 = arith.constant 0 : index
    %c0_218 = arith.constant 0 : index
    %c0_219 = arith.constant 0 : index
    %92 = vector.load %arg3[%c0_214, %c2_215, %c2_216, %c0_217, %c0_218, %c0_219] : memref<1x8x8x2x2x4xf32, #tpu.memory_space<vmem>>, vector<1x1x1x2x2x4xf32>
    %93 = vector.shape_cast %92 : vector<1x1x1x2x2x4xf32> to vector<2x2x4xf32>
    %94 = vector.shape_cast %91 : vector<2x2x4xf32> to vector<1x1x1x2x2x4xf32>
    tpu.vector_store %arg3[%c0_214, %c2_215, %c2_216, %c0_217, %c0_218, %c0_219], %94 {strides = array<i32>} : memref<1x8x8x2x2x4xf32, #tpu.memory_space<vmem>>, vector<1x1x1x2x2x4xf32>,
    %c0_220 = arith.constant 0 : index
    %c0_221 = arith.constant 0 : index
    %c2_222 = arith.constant 2 : index
    %c0_223 = arith.constant 0 : index
    %c3_224 = arith.constant 3 : index
    %c0_225 = arith.constant 0 : index
    %95 = vector.load %arg2[%c0_220, %c0_221, %c2_222, %c0_223, %c3_224, %c0_225] : memref<1x2x8x2x8x4xf32, #tpu.memory_space<vmem>>, vector<1x2x1x2x1x4xf32>
    %96 = vector.shape_cast %95 : vector<1x2x1x2x1x4xf32> to vector<2x2x4xf32>
    %c0_226 = arith.constant 0 : index
    %c2_227 = arith.constant 2 : index
    %c3_228 = arith.constant 3 : index
    %c0_229 = arith.constant 0 : index
    %c0_230 = arith.constant 0 : index
    %c0_231 = arith.constant 0 : index
    %97 = vector.load %arg3[%c0_226, %c2_227, %c3_228, %c0_229, %c0_230, %c0_231] : memref<1x8x8x2x2x4xf32, #tpu.memory_space<vmem>>, vector<1x1x1x2x2x4xf32>
    %98 = vector.shape_cast %97 : vector<1x1x1x2x2x4xf32> to vector<2x2x4xf32>
    %99 = vector.shape_cast %96 : vector<2x2x4xf32> to vector<1x1x1x2x2x4xf32>
    tpu.vector_store %arg3[%c0_226, %c2_227, %c3_228, %c0_229, %c0_230, %c0_231], %99 {strides = array<i32>} : memref<1x8x8x2x2x4xf32, #tpu.memory_space<vmem>>, vector<1x1x1x2x2x4xf32>,
    %c0_232 = arith.constant 0 : index
    %c0_233 = arith.constant 0 : index
    %c2_234 = arith.constant 2 : index
    %c0_235 = arith.constant 0 : index
    %c4_236 = arith.constant 4 : index
    %c0_237 = arith.constant 0 : index
    %100 = vector.load %arg2[%c0_232, %c0_233, %c2_234, %c0_235, %c4_236, %c0_237] : memref<1x2x8x2x8x4xf32, #tpu.memory_space<vmem>>, vector<1x2x1x2x1x4xf32>
    %101 = vector.shape_cast %100 : vector<1x2x1x2x1x4xf32> to vector<2x2x4xf32>
    %c0_238 = arith.constant 0 : index
    %c2_239 = arith.constant 2 : index
    %c4_240 = arith.constant 4 : index
    %c0_241 = arith.constant 0 : index
    %c0_242 = arith.constant 0 : index
    %c0_243 = arith.constant 0 : index
    %102 = vector.load %arg3[%c0_238, %c2_239, %c4_240, %c0_241, %c0_242, %c0_243] : memref<1x8x8x2x2x4xf32, #tpu.memory_space<vmem>>, vector<1x1x1x2x2x4xf32>
    %103 = vector.shape_cast %102 : vector<1x1x1x2x2x4xf32> to vector<2x2x4xf32>
    %104 = vector.shape_cast %101 : vector<2x2x4xf32> to vector<1x1x1x2x2x4xf32>
    tpu.vector_store %arg3[%c0_238, %c2_239, %c4_240, %c0_241, %c0_242, %c0_243], %104 {strides = array<i32>} : memref<1x8x8x2x2x4xf32, #tpu.memory_space<vmem>>, vector<1x1x1x2x2x4xf32>,
    %c0_244 = arith.constant 0 : index
    %c0_245 = arith.constant 0 : index
    %c2_246 = arith.constant 2 : index
    %c0_247 = arith.constant 0 : index
    %c5_248 = arith.constant 5 : index
    %c0_249 = arith.constant 0 : index
    %105 = vector.load %arg2[%c0_244, %c0_245, %c2_246, %c0_247, %c5_248, %c0_249] : memref<1x2x8x2x8x4xf32, #tpu.memory_space<vmem>>, vector<1x2x1x2x1x4xf32>
    %106 = vector.shape_cast %105 : vector<1x2x1x2x1x4xf32> to vector<2x2x4xf32>
    %c0_250 = arith.constant 0 : index
    %c2_251 = arith.constant 2 : index
    %c5_252 = arith.constant 5 : index
    %c0_253 = arith.constant 0 : index
    %c0_254 = arith.constant 0 : index
    %c0_255 = arith.constant 0 : index
    %107 = vector.load %arg3[%c0_250, %c2_251, %c5_252, %c0_253, %c0_254, %c0_255] : memref<1x8x8x2x2x4xf32, #tpu.memory_space<vmem>>, vector<1x1x1x2x2x4xf32>
    %108 = vector.shape_cast %107 : vector<1x1x1x2x2x4xf32> to vector<2x2x4xf32>
    %109 = vector.shape_cast %106 : vector<2x2x4xf32> to vector<1x1x1x2x2x4xf32>
    tpu.vector_store %arg3[%c0_250, %c2_251, %c5_252, %c0_253, %c0_254, %c0_255], %109 {strides = array<i32>} : memref<1x8x8x2x2x4xf32, #tpu.memory_space<vmem>>, vector<1x1x1x2x2x4xf32>,
    %c0_256 = arith.constant 0 : index
    %c0_257 = arith.constant 0 : index
    %c2_258 = arith.constant 2 : index
    %c0_259 = arith.constant 0 : index
    %c6_260 = arith.constant 6 : index
    %c0_261 = arith.constant 0 : index
    %110 = vector.load %arg2[%c0_256, %c0_257, %c2_258, %c0_259, %c6_260, %c0_261] : memref<1x2x8x2x8x4xf32, #tpu.memory_space<vmem>>, vector<1x2x1x2x1x4xf32>
    %111 = vector.shape_cast %110 : vector<1x2x1x2x1x4xf32> to vector<2x2x4xf32>
    %c0_262 = arith.constant 0 : index
    %c2_263 = arith.constant 2 : index
    %c6_264 = arith.constant 6 : index
    %c0_265 = arith.constant 0 : index
    %c0_266 = arith.constant 0 : index
    %c0_267 = arith.constant 0 : index
    %112 = vector.load %arg3[%c0_262, %c2_263, %c6_264, %c0_265, %c0_266, %c0_267] : memref<1x8x8x2x2x4xf32, #tpu.memory_space<vmem>>, vector<1x1x1x2x2x4xf32>
    %113 = vector.shape_cast %112 : vector<1x1x1x2x2x4xf32> to vector<2x2x4xf32>
    %114 = vector.shape_cast %111 : vector<2x2x4xf32> to vector<1x1x1x2x2x4xf32>
    tpu.vector_store %arg3[%c0_262, %c2_263, %c6_264, %c0_265, %c0_266, %c0_267], %114 {strides = array<i32>} : memref<1x8x8x2x2x4xf32, #tpu.memory_space<vmem>>, vector<1x1x1x2x2x4xf32>,
    %c0_268 = arith.constant 0 : index
    %c0_269 = arith.constant 0 : index
    %c2_270 = arith.constant 2 : index
    %c0_271 = arith.constant 0 : index
    %c7_272 = arith.constant 7 : index
    %c0_273 = arith.constant 0 : index
    %115 = vector.load %arg2[%c0_268, %c0_269, %c2_270, %c0_271, %c7_272, %c0_273] : memref<1x2x8x2x8x4xf32, #tpu.memory_space<vmem>>, vector<1x2x1x2x1x4xf32>
    %116 = vector.shape_cast %115 : vector<1x2x1x2x1x4xf32> to vector<2x2x4xf32>
    %c0_274 = arith.constant 0 : index
    %c2_275 = arith.constant 2 : index
    %c7_276 = arith.constant 7 : index
    %c0_277 = arith.constant 0 : index
    %c0_278 = arith.constant 0 : index
    %c0_279 = arith.constant 0 : index
    %117 = vector.load %arg3[%c0_274, %c2_275, %c7_276, %c0_277, %c0_278, %c0_279] : memref<1x8x8x2x2x4xf32, #tpu.memory_space<vmem>>, vector<1x1x1x2x2x4xf32>
    %118 = vector.shape_cast %117 : vector<1x1x1x2x2x4xf32> to vector<2x2x4xf32>
    %119 = vector.shape_cast %116 : vector<2x2x4xf32> to vector<1x1x1x2x2x4xf32>
    tpu.vector_store %arg3[%c0_274, %c2_275, %c7_276, %c0_277, %c0_278, %c0_279], %119 {strides = array<i32>} : memref<1x8x8x2x2x4xf32, #tpu.memory_space<vmem>>, vector<1x1x1x2x2x4xf32>,
    %c0_280 = arith.constant 0 : index
    %c0_281 = arith.constant 0 : index
    %c3_282 = arith.constant 3 : index
    %c0_283 = arith.constant 0 : index
    %c0_284 = arith.constant 0 : index
    %c0_285 = arith.constant 0 : index
    %120 = vector.load %arg2[%c0_280, %c0_281, %c3_282, %c0_283, %c0_284, %c0_285] : memref<1x2x8x2x8x4xf32, #tpu.memory_space<vmem>>, vector<1x2x1x2x1x4xf32>
    %121 = vector.shape_cast %120 : vector<1x2x1x2x1x4xf32> to vector<2x2x4xf32>
    %c0_286 = arith.constant 0 : index
    %c3_287 = arith.constant 3 : index
    %c0_288 = arith.constant 0 : index
    %c0_289 = arith.constant 0 : index
    %c0_290 = arith.constant 0 : index
    %c0_291 = arith.constant 0 : index
    %122 = vector.load %arg3[%c0_286, %c3_287, %c0_288, %c0_289, %c0_290, %c0_291] : memref<1x8x8x2x2x4xf32, #tpu.memory_space<vmem>>, vector<1x1x1x2x2x4xf32>
    %123 = vector.shape_cast %122 : vector<1x1x1x2x2x4xf32> to vector<2x2x4xf32>
    %124 = vector.shape_cast %121 : vector<2x2x4xf32> to vector<1x1x1x2x2x4xf32>
    tpu.vector_store %arg3[%c0_286, %c3_287, %c0_288, %c0_289, %c0_290, %c0_291], %124 {strides = array<i32>} : memref<1x8x8x2x2x4xf32, #tpu.memory_space<vmem>>, vector<1x1x1x2x2x4xf32>,
    %c0_292 = arith.constant 0 : index
    %c0_293 = arith.constant 0 : index
    %c3_294 = arith.constant 3 : index
    %c0_295 = arith.constant 0 : index
    %c1_296 = arith.constant 1 : index
    %c0_297 = arith.constant 0 : index
    %125 = vector.load %arg2[%c0_292, %c0_293, %c3_294, %c0_295, %c1_296, %c0_297] : memref<1x2x8x2x8x4xf32, #tpu.memory_space<vmem>>, vector<1x2x1x2x1x4xf32>
    %126 = vector.shape_cast %125 : vector<1x2x1x2x1x4xf32> to vector<2x2x4xf32>
    %c0_298 = arith.constant 0 : index
    %c3_299 = arith.constant 3 : index
    %c1_300 = arith.constant 1 : index
    %c0_301 = arith.constant 0 : index
    %c0_302 = arith.constant 0 : index
    %c0_303 = arith.constant 0 : index
    %127 = vector.load %arg3[%c0_298, %c3_299, %c1_300, %c0_301, %c0_302, %c0_303] : memref<1x8x8x2x2x4xf32, #tpu.memory_space<vmem>>, vector<1x1x1x2x2x4xf32>
    %128 = vector.shape_cast %127 : vector<1x1x1x2x2x4xf32> to vector<2x2x4xf32>
    %129 = vector.shape_cast %126 : vector<2x2x4xf32> to vector<1x1x1x2x2x4xf32>
    tpu.vector_store %arg3[%c0_298, %c3_299, %c1_300, %c0_301, %c0_302, %c0_303], %129 {strides = array<i32>} : memref<1x8x8x2x2x4xf32, #tpu.memory_space<vmem>>, vector<1x1x1x2x2x4xf32>,
    %c0_304 = arith.constant 0 : index
    %c0_305 = arith.constant 0 : index
    %c3_306 = arith.constant 3 : index
    %c0_307 = arith.constant 0 : index
    %c2_308 = arith.constant 2 : index
    %c0_309 = arith.constant 0 : index
    %130 = vector.load %arg2[%c0_304, %c0_305, %c3_306, %c0_307, %c2_308, %c0_309] : memref<1x2x8x2x8x4xf32, #tpu.memory_space<vmem>>, vector<1x2x1x2x1x4xf32>
    %131 = vector.shape_cast %130 : vector<1x2x1x2x1x4xf32> to vector<2x2x4xf32>
    %c0_310 = arith.constant 0 : index
    %c3_311 = arith.constant 3 : index
    %c2_312 = arith.constant 2 : index
    %c0_313 = arith.constant 0 : index
    %c0_314 = arith.constant 0 : index
    %c0_315 = arith.constant 0 : index
    %132 = vector.load %arg3[%c0_310, %c3_311, %c2_312, %c0_313, %c0_314, %c0_315] : memref<1x8x8x2x2x4xf32, #tpu.memory_space<vmem>>, vector<1x1x1x2x2x4xf32>
    %133 = vector.shape_cast %132 : vector<1x1x1x2x2x4xf32> to vector<2x2x4xf32>
    %134 = vector.shape_cast %131 : vector<2x2x4xf32> to vector<1x1x1x2x2x4xf32>
    tpu.vector_store %arg3[%c0_310, %c3_311, %c2_312, %c0_313, %c0_314, %c0_315], %134 {strides = array<i32>} : memref<1x8x8x2x2x4xf32, #tpu.memory_space<vmem>>, vector<1x1x1x2x2x4xf32>,
    %c0_316 = arith.constant 0 : index
    %c0_317 = arith.constant 0 : index
    %c3_318 = arith.constant 3 : index
    %c0_319 = arith.constant 0 : index
    %c3_320 = arith.constant 3 : index
    %c0_321 = arith.constant 0 : index
    %135 = vector.load %arg2[%c0_316, %c0_317, %c3_318, %c0_319, %c3_320, %c0_321] : memref<1x2x8x2x8x4xf32, #tpu.memory_space<vmem>>, vector<1x2x1x2x1x4xf32>
    %136 = vector.shape_cast %135 : vector<1x2x1x2x1x4xf32> to vector<2x2x4xf32>
    %c0_322 = arith.constant 0 : index
    %c3_323 = arith.constant 3 : index
    %c3_324 = arith.constant 3 : index
    %c0_325 = arith.constant 0 : index
    %c0_326 = arith.constant 0 : index
    %c0_327 = arith.constant 0 : index
    %137 = vector.load %arg3[%c0_322, %c3_323, %c3_324, %c0_325, %c0_326, %c0_327] : memref<1x8x8x2x2x4xf32, #tpu.memory_space<vmem>>, vector<1x1x1x2x2x4xf32>
    %138 = vector.shape_cast %137 : vector<1x1x1x2x2x4xf32> to vector<2x2x4xf32>
    %139 = vector.shape_cast %136 : vector<2x2x4xf32> to vector<1x1x1x2x2x4xf32>
    tpu.vector_store %arg3[%c0_322, %c3_323, %c3_324, %c0_325, %c0_326, %c0_327], %139 {strides = array<i32>} : memref<1x8x8x2x2x4xf32, #tpu.memory_space<vmem>>, vector<1x1x1x2x2x4xf32>,
    %c0_328 = arith.constant 0 : index
    %c0_329 = arith.constant 0 : index
    %c3_330 = arith.constant 3 : index
    %c0_331 = arith.constant 0 : index
    %c4_332 = arith.constant 4 : index
    %c0_333 = arith.constant 0 : index
    %140 = vector.load %arg2[%c0_328, %c0_329, %c3_330, %c0_331, %c4_332, %c0_333] : memref<1x2x8x2x8x4xf32, #tpu.memory_space<vmem>>, vector<1x2x1x2x1x4xf32>
    %141 = vector.shape_cast %140 : vector<1x2x1x2x1x4xf32> to vector<2x2x4xf32>
    %c0_334 = arith.constant 0 : index
    %c3_335 = arith.constant 3 : index
    %c4_336 = arith.constant 4 : index
    %c0_337 = arith.constant 0 : index
    %c0_338 = arith.constant 0 : index
    %c0_339 = arith.constant 0 : index
    %142 = vector.load %arg3[%c0_334, %c3_335, %c4_336, %c0_337, %c0_338, %c0_339] : memref<1x8x8x2x2x4xf32, #tpu.memory_space<vmem>>, vector<1x1x1x2x2x4xf32>
    %143 = vector.shape_cast %142 : vector<1x1x1x2x2x4xf32> to vector<2x2x4xf32>
    %144 = vector.shape_cast %141 : vector<2x2x4xf32> to vector<1x1x1x2x2x4xf32>
    tpu.vector_store %arg3[%c0_334, %c3_335, %c4_336, %c0_337, %c0_338, %c0_339], %144 {strides = array<i32>} : memref<1x8x8x2x2x4xf32, #tpu.memory_space<vmem>>, vector<1x1x1x2x2x4xf32>,
    %c0_340 = arith.constant 0 : index
    %c0_341 = arith.constant 0 : index
    %c3_342 = arith.constant 3 : index
    %c0_343 = arith.constant 0 : index
    %c5_344 = arith.constant 5 : index
    %c0_345 = arith.constant 0 : index
    %145 = vector.load %arg2[%c0_340, %c0_341, %c3_342, %c0_343, %c5_344, %c0_345] : memref<1x2x8x2x8x4xf32, #tpu.memory_space<vmem>>, vector<1x2x1x2x1x4xf32>
    %146 = vector.shape_cast %145 : vector<1x2x1x2x1x4xf32> to vector<2x2x4xf32>
    %c0_346 = arith.constant 0 : index
    %c3_347 = arith.constant 3 : index
    %c5_348 = arith.constant 5 : index
    %c0_349 = arith.constant 0 : index
    %c0_350 = arith.constant 0 : index
    %c0_351 = arith.constant 0 : index
    %147 = vector.load %arg3[%c0_346, %c3_347, %c5_348, %c0_349, %c0_350, %c0_351] : memref<1x8x8x2x2x4xf32, #tpu.memory_space<vmem>>, vector<1x1x1x2x2x4xf32>
    %148 = vector.shape_cast %147 : vector<1x1x1x2x2x4xf32> to vector<2x2x4xf32>
    %149 = vector.shape_cast %146 : vector<2x2x4xf32> to vector<1x1x1x2x2x4xf32>
    tpu.vector_store %arg3[%c0_346, %c3_347, %c5_348, %c0_349, %c0_350, %c0_351], %149 {strides = array<i32>} : memref<1x8x8x2x2x4xf32, #tpu.memory_space<vmem>>, vector<1x1x1x2x2x4xf32>,
    %c0_352 = arith.constant 0 : index
    %c0_353 = arith.constant 0 : index
    %c3_354 = arith.constant 3 : index
    %c0_355 = arith.constant 0 : index
    %c6_356 = arith.constant 6 : index
    %c0_357 = arith.constant 0 : index
    %150 = vector.load %arg2[%c0_352, %c0_353, %c3_354, %c0_355, %c6_356, %c0_357] : memref<1x2x8x2x8x4xf32, #tpu.memory_space<vmem>>, vector<1x2x1x2x1x4xf32>
    %151 = vector.shape_cast %150 : vector<1x2x1x2x1x4xf32> to vector<2x2x4xf32>
    %c0_358 = arith.constant 0 : index
    %c3_359 = arith.constant 3 : index
    %c6_360 = arith.constant 6 : index
    %c0_361 = arith.constant 0 : index
    %c0_362 = arith.constant 0 : index
    %c0_363 = arith.constant 0 : index
    %152 = vector.load %arg3[%c0_358, %c3_359, %c6_360, %c0_361, %c0_362, %c0_363] : memref<1x8x8x2x2x4xf32, #tpu.memory_space<vmem>>, vector<1x1x1x2x2x4xf32>
    %153 = vector.shape_cast %152 : vector<1x1x1x2x2x4xf32> to vector<2x2x4xf32>
    %154 = vector.shape_cast %151 : vector<2x2x4xf32> to vector<1x1x1x2x2x4xf32>
    tpu.vector_store %arg3[%c0_358, %c3_359, %c6_360, %c0_361, %c0_362, %c0_363], %154 {strides = array<i32>} : memref<1x8x8x2x2x4xf32, #tpu.memory_space<vmem>>, vector<1x1x1x2x2x4xf32>,
    %c0_364 = arith.constant 0 : index
    %c0_365 = arith.constant 0 : index
    %c3_366 = arith.constant 3 : index
    %c0_367 = arith.constant 0 : index
    %c7_368 = arith.constant 7 : index
    %c0_369 = arith.constant 0 : index
    %155 = vector.load %arg2[%c0_364, %c0_365, %c3_366, %c0_367, %c7_368, %c0_369] : memref<1x2x8x2x8x4xf32, #tpu.memory_space<vmem>>, vector<1x2x1x2x1x4xf32>
    %156 = vector.shape_cast %155 : vector<1x2x1x2x1x4xf32> to vector<2x2x4xf32>
    %c0_370 = arith.constant 0 : index
    %c3_371 = arith.constant 3 : index
    %c7_372 = arith.constant 7 : index
    %c0_373 = arith.constant 0 : index
    %c0_374 = arith.constant 0 : index
    %c0_375 = arith.constant 0 : index
    %157 = vector.load %arg3[%c0_370, %c3_371, %c7_372, %c0_373, %c0_374, %c0_375] : memref<1x8x8x2x2x4xf32, #tpu.memory_space<vmem>>, vector<1x1x1x2x2x4xf32>
    %158 = vector.shape_cast %157 : vector<1x1x1x2x2x4xf32> to vector<2x2x4xf32>
    %159 = vector.shape_cast %156 : vector<2x2x4xf32> to vector<1x1x1x2x2x4xf32>
    tpu.vector_store %arg3[%c0_370, %c3_371, %c7_372, %c0_373, %c0_374, %c0_375], %159 {strides = array<i32>} : memref<1x8x8x2x2x4xf32, #tpu.memory_space<vmem>>, vector<1x1x1x2x2x4xf32>,
    %c0_376 = arith.constant 0 : index
    %c0_377 = arith.constant 0 : index
    %c4_378 = arith.constant 4 : index
    %c0_379 = arith.constant 0 : index
    %c0_380 = arith.constant 0 : index
    %c0_381 = arith.constant 0 : index
    %160 = vector.load %arg2[%c0_376, %c0_377, %c4_378, %c0_379, %c0_380, %c0_381] : memref<1x2x8x2x8x4xf32, #tpu.memory_space<vmem>>, vector<1x2x1x2x1x4xf32>
    %161 = vector.shape_cast %160 : vector<1x2x1x2x1x4xf32> to vector<2x2x4xf32>
    %c0_382 = arith.constant 0 : index
    %c4_383 = arith.constant 4 : index
    %c0_384 = arith.constant 0 : index
    %c0_385 = arith.constant 0 : index
    %c0_386 = arith.constant 0 : index
    %c0_387 = arith.constant 0 : index
    %162 = vector.load %arg3[%c0_382, %c4_383, %c0_384, %c0_385, %c0_386, %c0_387] : memref<1x8x8x2x2x4xf32, #tpu.memory_space<vmem>>, vector<1x1x1x2x2x4xf32>
    %163 = vector.shape_cast %162 : vector<1x1x1x2x2x4xf32> to vector<2x2x4xf32>
    %164 = vector.shape_cast %161 : vector<2x2x4xf32> to vector<1x1x1x2x2x4xf32>
    tpu.vector_store %arg3[%c0_382, %c4_383, %c0_384, %c0_385, %c0_386, %c0_387], %164 {strides = array<i32>} : memref<1x8x8x2x2x4xf32, #tpu.memory_space<vmem>>, vector<1x1x1x2x2x4xf32>,
    %c0_388 = arith.constant 0 : index
    %c0_389 = arith.constant 0 : index
    %c4_390 = arith.constant 4 : index
    %c0_391 = arith.constant 0 : index
    %c1_392 = arith.constant 1 : index
    %c0_393 = arith.constant 0 : index
    %165 = vector.load %arg2[%c0_388, %c0_389, %c4_390, %c0_391, %c1_392, %c0_393] : memref<1x2x8x2x8x4xf32, #tpu.memory_space<vmem>>, vector<1x2x1x2x1x4xf32>
    %166 = vector.shape_cast %165 : vector<1x2x1x2x1x4xf32> to vector<2x2x4xf32>
    %c0_394 = arith.constant 0 : index
    %c4_395 = arith.constant 4 : index
    %c1_396 = arith.constant 1 : index
    %c0_397 = arith.constant 0 : index
    %c0_398 = arith.constant 0 : index
    %c0_399 = arith.constant 0 : index
    %167 = vector.load %arg3[%c0_394, %c4_395, %c1_396, %c0_397, %c0_398, %c0_399] : memref<1x8x8x2x2x4xf32, #tpu.memory_space<vmem>>, vector<1x1x1x2x2x4xf32>
    %168 = vector.shape_cast %167 : vector<1x1x1x2x2x4xf32> to vector<2x2x4xf32>
    %169 = vector.shape_cast %166 : vector<2x2x4xf32> to vector<1x1x1x2x2x4xf32>
    tpu.vector_store %arg3[%c0_394, %c4_395, %c1_396, %c0_397, %c0_398, %c0_399], %169 {strides = array<i32>} : memref<1x8x8x2x2x4xf32, #tpu.memory_space<vmem>>, vector<1x1x1x2x2x4xf32>,
    %c0_400 = arith.constant 0 : index
    %c0_401 = arith.constant 0 : index
    %c4_402 = arith.constant 4 : index
    %c0_403 = arith.constant 0 : index
    %c2_404 = arith.constant 2 : index
    %c0_405 = arith.constant 0 : index
    %170 = vector.load %arg2[%c0_400, %c0_401, %c4_402, %c0_403, %c2_404, %c0_405] : memref<1x2x8x2x8x4xf32, #tpu.memory_space<vmem>>, vector<1x2x1x2x1x4xf32>
    %171 = vector.shape_cast %170 : vector<1x2x1x2x1x4xf32> to vector<2x2x4xf32>
    %c0_406 = arith.constant 0 : index
    %c4_407 = arith.constant 4 : index
    %c2_408 = arith.constant 2 : index
    %c0_409 = arith.constant 0 : index
    %c0_410 = arith.constant 0 : index
    %c0_411 = arith.constant 0 : index
    %172 = vector.load %arg3[%c0_406, %c4_407, %c2_408, %c0_409, %c0_410, %c0_411] : memref<1x8x8x2x2x4xf32, #tpu.memory_space<vmem>>, vector<1x1x1x2x2x4xf32>
    %173 = vector.shape_cast %172 : vector<1x1x1x2x2x4xf32> to vector<2x2x4xf32>
    %174 = vector.shape_cast %171 : vector<2x2x4xf32> to vector<1x1x1x2x2x4xf32>
    tpu.vector_store %arg3[%c0_406, %c4_407, %c2_408, %c0_409, %c0_410, %c0_411], %174 {strides = array<i32>} : memref<1x8x8x2x2x4xf32, #tpu.memory_space<vmem>>, vector<1x1x1x2x2x4xf32>,
    %c0_412 = arith.constant 0 : index
    %c0_413 = arith.constant 0 : index
    %c4_414 = arith.constant 4 : index
    %c0_415 = arith.constant 0 : index
    %c3_416 = arith.constant 3 : index
    %c0_417 = arith.constant 0 : index
    %175 = vector.load %arg2[%c0_412, %c0_413, %c4_414, %c0_415, %c3_416, %c0_417] : memref<1x2x8x2x8x4xf32, #tpu.memory_space<vmem>>, vector<1x2x1x2x1x4xf32>
    %176 = vector.shape_cast %175 : vector<1x2x1x2x1x4xf32> to vector<2x2x4xf32>
    %c0_418 = arith.constant 0 : index
    %c4_419 = arith.constant 4 : index
    %c3_420 = arith.constant 3 : index
    %c0_421 = arith.constant 0 : index
    %c0_422 = arith.constant 0 : index
    %c0_423 = arith.constant 0 : index
    %177 = vector.load %arg3[%c0_418, %c4_419, %c3_420, %c0_421, %c0_422, %c0_423] : memref<1x8x8x2x2x4xf32, #tpu.memory_space<vmem>>, vector<1x1x1x2x2x4xf32>
    %178 = vector.shape_cast %177 : vector<1x1x1x2x2x4xf32> to vector<2x2x4xf32>
    %179 = vector.shape_cast %176 : vector<2x2x4xf32> to vector<1x1x1x2x2x4xf32>
    tpu.vector_store %arg3[%c0_418, %c4_419, %c3_420, %c0_421, %c0_422, %c0_423], %179 {strides = array<i32>} : memref<1x8x8x2x2x4xf32, #tpu.memory_space<vmem>>, vector<1x1x1x2x2x4xf32>,
    %c0_424 = arith.constant 0 : index
    %c0_425 = arith.constant 0 : index
    %c4_426 = arith.constant 4 : index
    %c0_427 = arith.constant 0 : index
    %c4_428 = arith.constant 4 : index
    %c0_429 = arith.constant 0 : index
    %180 = vector.load %arg2[%c0_424, %c0_425, %c4_426, %c0_427, %c4_428, %c0_429] : memref<1x2x8x2x8x4xf32, #tpu.memory_space<vmem>>, vector<1x2x1x2x1x4xf32>
    %181 = vector.shape_cast %180 : vector<1x2x1x2x1x4xf32> to vector<2x2x4xf32>
    %c0_430 = arith.constant 0 : index
    %c4_431 = arith.constant 4 : index
    %c4_432 = arith.constant 4 : index
    %c0_433 = arith.constant 0 : index
    %c0_434 = arith.constant 0 : index
    %c0_435 = arith.constant 0 : index
    %182 = vector.load %arg3[%c0_430, %c4_431, %c4_432, %c0_433, %c0_434, %c0_435] : memref<1x8x8x2x2x4xf32, #tpu.memory_space<vmem>>, vector<1x1x1x2x2x4xf32>
    %183 = vector.shape_cast %182 : vector<1x1x1x2x2x4xf32> to vector<2x2x4xf32>
    %184 = vector.shape_cast %181 : vector<2x2x4xf32> to vector<1x1x1x2x2x4xf32>
    tpu.vector_store %arg3[%c0_430, %c4_431, %c4_432, %c0_433, %c0_434, %c0_435], %184 {strides = array<i32>} : memref<1x8x8x2x2x4xf32, #tpu.memory_space<vmem>>, vector<1x1x1x2x2x4xf32>,
    %c0_436 = arith.constant 0 : index
    %c0_437 = arith.constant 0 : index
    %c4_438 = arith.constant 4 : index
    %c0_439 = arith.constant 0 : index
    %c5_440 = arith.constant 5 : index
    %c0_441 = arith.constant 0 : index
    %185 = vector.load %arg2[%c0_436, %c0_437, %c4_438, %c0_439, %c5_440, %c0_441] : memref<1x2x8x2x8x4xf32, #tpu.memory_space<vmem>>, vector<1x2x1x2x1x4xf32>
    %186 = vector.shape_cast %185 : vector<1x2x1x2x1x4xf32> to vector<2x2x4xf32>
    %c0_442 = arith.constant 0 : index
    %c4_443 = arith.constant 4 : index
    %c5_444 = arith.constant 5 : index
    %c0_445 = arith.constant 0 : index
    %c0_446 = arith.constant 0 : index
    %c0_447 = arith.constant 0 : index
    %187 = vector.load %arg3[%c0_442, %c4_443, %c5_444, %c0_445, %c0_446, %c0_447] : memref<1x8x8x2x2x4xf32, #tpu.memory_space<vmem>>, vector<1x1x1x2x2x4xf32>
    %188 = vector.shape_cast %187 : vector<1x1x1x2x2x4xf32> to vector<2x2x4xf32>
    %189 = vector.shape_cast %186 : vector<2x2x4xf32> to vector<1x1x1x2x2x4xf32>
    tpu.vector_store %arg3[%c0_442, %c4_443, %c5_444, %c0_445, %c0_446, %c0_447], %189 {strides = array<i32>} : memref<1x8x8x2x2x4xf32, #tpu.memory_space<vmem>>, vector<1x1x1x2x2x4xf32>,
    %c0_448 = arith.constant 0 : index
    %c0_449 = arith.constant 0 : index
    %c4_450 = arith.constant 4 : index
    %c0_451 = arith.constant 0 : index
    %c6_452 = arith.constant 6 : index
    %c0_453 = arith.constant 0 : index
    %190 = vector.load %arg2[%c0_448, %c0_449, %c4_450, %c0_451, %c6_452, %c0_453] : memref<1x2x8x2x8x4xf32, #tpu.memory_space<vmem>>, vector<1x2x1x2x1x4xf32>
    %191 = vector.shape_cast %190 : vector<1x2x1x2x1x4xf32> to vector<2x2x4xf32>
    %c0_454 = arith.constant 0 : index
    %c4_455 = arith.constant 4 : index
    %c6_456 = arith.constant 6 : index
    %c0_457 = arith.constant 0 : index
    %c0_458 = arith.constant 0 : index
    %c0_459 = arith.constant 0 : index
    %192 = vector.load %arg3[%c0_454, %c4_455, %c6_456, %c0_457, %c0_458, %c0_459] : memref<1x8x8x2x2x4xf32, #tpu.memory_space<vmem>>, vector<1x1x1x2x2x4xf32>
    %193 = vector.shape_cast %192 : vector<1x1x1x2x2x4xf32> to vector<2x2x4xf32>
    %194 = vector.shape_cast %191 : vector<2x2x4xf32> to vector<1x1x1x2x2x4xf32>
    tpu.vector_store %arg3[%c0_454, %c4_455, %c6_456, %c0_457, %c0_458, %c0_459], %194 {strides = array<i32>} : memref<1x8x8x2x2x4xf32, #tpu.memory_space<vmem>>, vector<1x1x1x2x2x4xf32>,
    %c0_460 = arith.constant 0 : index
    %c0_461 = arith.constant 0 : index
    %c4_462 = arith.constant 4 : index
    %c0_463 = arith.constant 0 : index
    %c7_464 = arith.constant 7 : index
    %c0_465 = arith.constant 0 : index
    %195 = vector.load %arg2[%c0_460, %c0_461, %c4_462, %c0_463, %c7_464, %c0_465] : memref<1x2x8x2x8x4xf32, #tpu.memory_space<vmem>>, vector<1x2x1x2x1x4xf32>
    %196 = vector.shape_cast %195 : vector<1x2x1x2x1x4xf32> to vector<2x2x4xf32>
    %c0_466 = arith.constant 0 : index
    %c4_467 = arith.constant 4 : index
    %c7_468 = arith.constant 7 : index
    %c0_469 = arith.constant 0 : index
    %c0_470 = arith.constant 0 : index
    %c0_471 = arith.constant 0 : index
    %197 = vector.load %arg3[%c0_466, %c4_467, %c7_468, %c0_469, %c0_470, %c0_471] : memref<1x8x8x2x2x4xf32, #tpu.memory_space<vmem>>, vector<1x1x1x2x2x4xf32>
    %198 = vector.shape_cast %197 : vector<1x1x1x2x2x4xf32> to vector<2x2x4xf32>
    %199 = vector.shape_cast %196 : vector<2x2x4xf32> to vector<1x1x1x2x2x4xf32>
    tpu.vector_store %arg3[%c0_466, %c4_467, %c7_468, %c0_469, %c0_470, %c0_471], %199 {strides = array<i32>} : memref<1x8x8x2x2x4xf32, #tpu.memory_space<vmem>>, vector<1x1x1x2x2x4xf32>,
    %c0_472 = arith.constant 0 : index
    %c0_473 = arith.constant 0 : index
    %c5_474 = arith.constant 5 : index
    %c0_475 = arith.constant 0 : index
    %c0_476 = arith.constant 0 : index
    %c0_477 = arith.constant 0 : index
    %200 = vector.load %arg2[%c0_472, %c0_473, %c5_474, %c0_475, %c0_476, %c0_477] : memref<1x2x8x2x8x4xf32, #tpu.memory_space<vmem>>, vector<1x2x1x2x1x4xf32>
    %201 = vector.shape_cast %200 : vector<1x2x1x2x1x4xf32> to vector<2x2x4xf32>
    %c0_478 = arith.constant 0 : index
    %c5_479 = arith.constant 5 : index
    %c0_480 = arith.constant 0 : index
    %c0_481 = arith.constant 0 : index
    %c0_482 = arith.constant 0 : index
    %c0_483 = arith.constant 0 : index
    %202 = vector.load %arg3[%c0_478, %c5_479, %c0_480, %c0_481, %c0_482, %c0_483] : memref<1x8x8x2x2x4xf32, #tpu.memory_space<vmem>>, vector<1x1x1x2x2x4xf32>
    %203 = vector.shape_cast %202 : vector<1x1x1x2x2x4xf32> to vector<2x2x4xf32>
    %204 = vector.shape_cast %201 : vector<2x2x4xf32> to vector<1x1x1x2x2x4xf32>
    tpu.vector_store %arg3[%c0_478, %c5_479, %c0_480, %c0_481, %c0_482, %c0_483], %204 {strides = array<i32>} : memref<1x8x8x2x2x4xf32, #tpu.memory_space<vmem>>, vector<1x1x1x2x2x4xf32>,
    %c0_484 = arith.constant 0 : index
    %c0_485 = arith.constant 0 : index
    %c5_486 = arith.constant 5 : index
    %c0_487 = arith.constant 0 : index
    %c1_488 = arith.constant 1 : index
    %c0_489 = arith.constant 0 : index
    %205 = vector.load %arg2[%c0_484, %c0_485, %c5_486, %c0_487, %c1_488, %c0_489] : memref<1x2x8x2x8x4xf32, #tpu.memory_space<vmem>>, vector<1x2x1x2x1x4xf32>
    %206 = vector.shape_cast %205 : vector<1x2x1x2x1x4xf32> to vector<2x2x4xf32>
    %c0_490 = arith.constant 0 : index
    %c5_491 = arith.constant 5 : index
    %c1_492 = arith.constant 1 : index
    %c0_493 = arith.constant 0 : index
    %c0_494 = arith.constant 0 : index
    %c0_495 = arith.constant 0 : index
    %207 = vector.load %arg3[%c0_490, %c5_491, %c1_492, %c0_493, %c0_494, %c0_495] : memref<1x8x8x2x2x4xf32, #tpu.memory_space<vmem>>, vector<1x1x1x2x2x4xf32>
    %208 = vector.shape_cast %207 : vector<1x1x1x2x2x4xf32> to vector<2x2x4xf32>
    %209 = vector.shape_cast %206 : vector<2x2x4xf32> to vector<1x1x1x2x2x4xf32>
    tpu.vector_store %arg3[%c0_490, %c5_491, %c1_492, %c0_493, %c0_494, %c0_495], %209 {strides = array<i32>} : memref<1x8x8x2x2x4xf32, #tpu.memory_space<vmem>>, vector<1x1x1x2x2x4xf32>,
    %c0_496 = arith.constant 0 : index
    %c0_497 = arith.constant 0 : index
    %c5_498 = arith.constant 5 : index
    %c0_499 = arith.constant 0 : index
    %c2_500 = arith.constant 2 : index
    %c0_501 = arith.constant 0 : index
    %210 = vector.load %arg2[%c0_496, %c0_497, %c5_498, %c0_499, %c2_500, %c0_501] : memref<1x2x8x2x8x4xf32, #tpu.memory_space<vmem>>, vector<1x2x1x2x1x4xf32>
    %211 = vector.shape_cast %210 : vector<1x2x1x2x1x4xf32> to vector<2x2x4xf32>
    %c0_502 = arith.constant 0 : index
    %c5_503 = arith.constant 5 : index
    %c2_504 = arith.constant 2 : index
    %c0_505 = arith.constant 0 : index
    %c0_506 = arith.constant 0 : index
    %c0_507 = arith.constant 0 : index
    %212 = vector.load %arg3[%c0_502, %c5_503, %c2_504, %c0_505, %c0_506, %c0_507] : memref<1x8x8x2x2x4xf32, #tpu.memory_space<vmem>>, vector<1x1x1x2x2x4xf32>
    %213 = vector.shape_cast %212 : vector<1x1x1x2x2x4xf32> to vector<2x2x4xf32>
    %214 = vector.shape_cast %211 : vector<2x2x4xf32> to vector<1x1x1x2x2x4xf32>
    tpu.vector_store %arg3[%c0_502, %c5_503, %c2_504, %c0_505, %c0_506, %c0_507], %214 {strides = array<i32>} : memref<1x8x8x2x2x4xf32, #tpu.memory_space<vmem>>, vector<1x1x1x2x2x4xf32>,
    %c0_508 = arith.constant 0 : index
    %c0_509 = arith.constant 0 : index
    %c5_510 = arith.constant 5 : index
    %c0_511 = arith.constant 0 : index
    %c3_512 = arith.constant 3 : index
    %c0_513 = arith.constant 0 : index
    %215 = vector.load %arg2[%c0_508, %c0_509, %c5_510, %c0_511, %c3_512, %c0_513] : memref<1x2x8x2x8x4xf32, #tpu.memory_space<vmem>>, vector<1x2x1x2x1x4xf32>
    %216 = vector.shape_cast %215 : vector<1x2x1x2x1x4xf32> to vector<2x2x4xf32>
    %c0_514 = arith.constant 0 : index
    %c5_515 = arith.constant 5 : index
    %c3_516 = arith.constant 3 : index
    %c0_517 = arith.constant 0 : index
    %c0_518 = arith.constant 0 : index
    %c0_519 = arith.constant 0 : index
    %217 = vector.load %arg3[%c0_514, %c5_515, %c3_516, %c0_517, %c0_518, %c0_519] : memref<1x8x8x2x2x4xf32, #tpu.memory_space<vmem>>, vector<1x1x1x2x2x4xf32>
    %218 = vector.shape_cast %217 : vector<1x1x1x2x2x4xf32> to vector<2x2x4xf32>
    %219 = vector.shape_cast %216 : vector<2x2x4xf32> to vector<1x1x1x2x2x4xf32>
    tpu.vector_store %arg3[%c0_514, %c5_515, %c3_516, %c0_517, %c0_518, %c0_519], %219 {strides = array<i32>} : memref<1x8x8x2x2x4xf32, #tpu.memory_space<vmem>>, vector<1x1x1x2x2x4xf32>,
    %c0_520 = arith.constant 0 : index
    %c0_521 = arith.constant 0 : index
    %c5_522 = arith.constant 5 : index
    %c0_523 = arith.constant 0 : index
    %c4_524 = arith.constant 4 : index
    %c0_525 = arith.constant 0 : index
    %220 = vector.load %arg2[%c0_520, %c0_521, %c5_522, %c0_523, %c4_524, %c0_525] : memref<1x2x8x2x8x4xf32, #tpu.memory_space<vmem>>, vector<1x2x1x2x1x4xf32>
    %221 = vector.shape_cast %220 : vector<1x2x1x2x1x4xf32> to vector<2x2x4xf32>
    %c0_526 = arith.constant 0 : index
    %c5_527 = arith.constant 5 : index
    %c4_528 = arith.constant 4 : index
    %c0_529 = arith.constant 0 : index
    %c0_530 = arith.constant 0 : index
    %c0_531 = arith.constant 0 : index
    %222 = vector.load %arg3[%c0_526, %c5_527, %c4_528, %c0_529, %c0_530, %c0_531] : memref<1x8x8x2x2x4xf32, #tpu.memory_space<vmem>>, vector<1x1x1x2x2x4xf32>
    %223 = vector.shape_cast %222 : vector<1x1x1x2x2x4xf32> to vector<2x2x4xf32>
    %224 = vector.shape_cast %221 : vector<2x2x4xf32> to vector<1x1x1x2x2x4xf32>
    tpu.vector_store %arg3[%c0_526, %c5_527, %c4_528, %c0_529, %c0_530, %c0_531], %224 {strides = array<i32>} : memref<1x8x8x2x2x4xf32, #tpu.memory_space<vmem>>, vector<1x1x1x2x2x4xf32>,
    %c0_532 = arith.constant 0 : index
    %c0_533 = arith.constant 0 : index
    %c5_534 = arith.constant 5 : index
    %c0_535 = arith.constant 0 : index
    %c5_536 = arith.constant 5 : index
    %c0_537 = arith.constant 0 : index
    %225 = vector.load %arg2[%c0_532, %c0_533, %c5_534, %c0_535, %c5_536, %c0_537] : memref<1x2x8x2x8x4xf32, #tpu.memory_space<vmem>>, vector<1x2x1x2x1x4xf32>
    %226 = vector.shape_cast %225 : vector<1x2x1x2x1x4xf32> to vector<2x2x4xf32>
    %c0_538 = arith.constant 0 : index
    %c5_539 = arith.constant 5 : index
    %c5_540 = arith.constant 5 : index
    %c0_541 = arith.constant 0 : index
    %c0_542 = arith.constant 0 : index
    %c0_543 = arith.constant 0 : index
    %227 = vector.load %arg3[%c0_538, %c5_539, %c5_540, %c0_541, %c0_542, %c0_543] : memref<1x8x8x2x2x4xf32, #tpu.memory_space<vmem>>, vector<1x1x1x2x2x4xf32>
    %228 = vector.shape_cast %227 : vector<1x1x1x2x2x4xf32> to vector<2x2x4xf32>
    %229 = vector.shape_cast %226 : vector<2x2x4xf32> to vector<1x1x1x2x2x4xf32>
    tpu.vector_store %arg3[%c0_538, %c5_539, %c5_540, %c0_541, %c0_542, %c0_543], %229 {strides = array<i32>} : memref<1x8x8x2x2x4xf32, #tpu.memory_space<vmem>>, vector<1x1x1x2x2x4xf32>,
    %c0_544 = arith.constant 0 : index
    %c0_545 = arith.constant 0 : index
    %c5_546 = arith.constant 5 : index
    %c0_547 = arith.constant 0 : index
    %c6_548 = arith.constant 6 : index
    %c0_549 = arith.constant 0 : index
    %230 = vector.load %arg2[%c0_544, %c0_545, %c5_546, %c0_547, %c6_548, %c0_549] : memref<1x2x8x2x8x4xf32, #tpu.memory_space<vmem>>, vector<1x2x1x2x1x4xf32>
    %231 = vector.shape_cast %230 : vector<1x2x1x2x1x4xf32> to vector<2x2x4xf32>
    %c0_550 = arith.constant 0 : index
    %c5_551 = arith.constant 5 : index
    %c6_552 = arith.constant 6 : index
    %c0_553 = arith.constant 0 : index
    %c0_554 = arith.constant 0 : index
    %c0_555 = arith.constant 0 : index
    %232 = vector.load %arg3[%c0_550, %c5_551, %c6_552, %c0_553, %c0_554, %c0_555] : memref<1x8x8x2x2x4xf32, #tpu.memory_space<vmem>>, vector<1x1x1x2x2x4xf32>
    %233 = vector.shape_cast %232 : vector<1x1x1x2x2x4xf32> to vector<2x2x4xf32>
    %234 = vector.shape_cast %231 : vector<2x2x4xf32> to vector<1x1x1x2x2x4xf32>
    tpu.vector_store %arg3[%c0_550, %c5_551, %c6_552, %c0_553, %c0_554, %c0_555], %234 {strides = array<i32>} : memref<1x8x8x2x2x4xf32, #tpu.memory_space<vmem>>, vector<1x1x1x2x2x4xf32>,
    %c0_556 = arith.constant 0 : index
    %c0_557 = arith.constant 0 : index
    %c5_558 = arith.constant 5 : index
    %c0_559 = arith.constant 0 : index
    %c7_560 = arith.constant 7 : index
    %c0_561 = arith.constant 0 : index
    %235 = vector.load %arg2[%c0_556, %c0_557, %c5_558, %c0_559, %c7_560, %c0_561] : memref<1x2x8x2x8x4xf32, #tpu.memory_space<vmem>>, vector<1x2x1x2x1x4xf32>
    %236 = vector.shape_cast %235 : vector<1x2x1x2x1x4xf32> to vector<2x2x4xf32>
    %c0_562 = arith.constant 0 : index
    %c5_563 = arith.constant 5 : index
    %c7_564 = arith.constant 7 : index
    %c0_565 = arith.constant 0 : index
    %c0_566 = arith.constant 0 : index
    %c0_567 = arith.constant 0 : index
    %237 = vector.load %arg3[%c0_562, %c5_563, %c7_564, %c0_565, %c0_566, %c0_567] : memref<1x8x8x2x2x4xf32, #tpu.memory_space<vmem>>, vector<1x1x1x2x2x4xf32>
    %238 = vector.shape_cast %237 : vector<1x1x1x2x2x4xf32> to vector<2x2x4xf32>
    %239 = vector.shape_cast %236 : vector<2x2x4xf32> to vector<1x1x1x2x2x4xf32>
    tpu.vector_store %arg3[%c0_562, %c5_563, %c7_564, %c0_565, %c0_566, %c0_567], %239 {strides = array<i32>} : memref<1x8x8x2x2x4xf32, #tpu.memory_space<vmem>>, vector<1x1x1x2x2x4xf32>,
    %c0_568 = arith.constant 0 : index
    %c0_569 = arith.constant 0 : index
    %c6_570 = arith.constant 6 : index
    %c0_571 = arith.constant 0 : index
    %c0_572 = arith.constant 0 : index
    %c0_573 = arith.constant 0 : index
    %240 = vector.load %arg2[%c0_568, %c0_569, %c6_570, %c0_571, %c0_572, %c0_573] : memref<1x2x8x2x8x4xf32, #tpu.memory_space<vmem>>, vector<1x2x1x2x1x4xf32>
    %241 = vector.shape_cast %240 : vector<1x2x1x2x1x4xf32> to vector<2x2x4xf32>
    %c0_574 = arith.constant 0 : index
    %c6_575 = arith.constant 6 : index
    %c0_576 = arith.constant 0 : index
    %c0_577 = arith.constant 0 : index
    %c0_578 = arith.constant 0 : index
    %c0_579 = arith.constant 0 : index
    %242 = vector.load %arg3[%c0_574, %c6_575, %c0_576, %c0_577, %c0_578, %c0_579] : memref<1x8x8x2x2x4xf32, #tpu.memory_space<vmem>>, vector<1x1x1x2x2x4xf32>
    %243 = vector.shape_cast %242 : vector<1x1x1x2x2x4xf32> to vector<2x2x4xf32>
    %244 = vector.shape_cast %241 : vector<2x2x4xf32> to vector<1x1x1x2x2x4xf32>
    tpu.vector_store %arg3[%c0_574, %c6_575, %c0_576, %c0_577, %c0_578, %c0_579], %244 {strides = array<i32>} : memref<1x8x8x2x2x4xf32, #tpu.memory_space<vmem>>, vector<1x1x1x2x2x4xf32>,
    %c0_580 = arith.constant 0 : index
    %c0_581 = arith.constant 0 : index
    %c6_582 = arith.constant 6 : index
    %c0_583 = arith.constant 0 : index
    %c1_584 = arith.constant 1 : index
    %c0_585 = arith.constant 0 : index
    %245 = vector.load %arg2[%c0_580, %c0_581, %c6_582, %c0_583, %c1_584, %c0_585] : memref<1x2x8x2x8x4xf32, #tpu.memory_space<vmem>>, vector<1x2x1x2x1x4xf32>
    %246 = vector.shape_cast %245 : vector<1x2x1x2x1x4xf32> to vector<2x2x4xf32>
    %c0_586 = arith.constant 0 : index
    %c6_587 = arith.constant 6 : index
    %c1_588 = arith.constant 1 : index
    %c0_589 = arith.constant 0 : index
    %c0_590 = arith.constant 0 : index
    %c0_591 = arith.constant 0 : index
    %247 = vector.load %arg3[%c0_586, %c6_587, %c1_588, %c0_589, %c0_590, %c0_591] : memref<1x8x8x2x2x4xf32, #tpu.memory_space<vmem>>, vector<1x1x1x2x2x4xf32>
    %248 = vector.shape_cast %247 : vector<1x1x1x2x2x4xf32> to vector<2x2x4xf32>
    %249 = vector.shape_cast %246 : vector<2x2x4xf32> to vector<1x1x1x2x2x4xf32>
    tpu.vector_store %arg3[%c0_586, %c6_587, %c1_588, %c0_589, %c0_590, %c0_591], %249 {strides = array<i32>} : memref<1x8x8x2x2x4xf32, #tpu.memory_space<vmem>>, vector<1x1x1x2x2x4xf32>,
    %c0_592 = arith.constant 0 : index
    %c0_593 = arith.constant 0 : index
    %c6_594 = arith.constant 6 : index
    %c0_595 = arith.constant 0 : index
    %c2_596 = arith.constant 2 : index
    %c0_597 = arith.constant 0 : index
    %250 = vector.load %arg2[%c0_592, %c0_593, %c6_594, %c0_595, %c2_596, %c0_597] : memref<1x2x8x2x8x4xf32, #tpu.memory_space<vmem>>, vector<1x2x1x2x1x4xf32>
    %251 = vector.shape_cast %250 : vector<1x2x1x2x1x4xf32> to vector<2x2x4xf32>
    %c0_598 = arith.constant 0 : index
    %c6_599 = arith.constant 6 : index
    %c2_600 = arith.constant 2 : index
    %c0_601 = arith.constant 0 : index
    %c0_602 = arith.constant 0 : index
    %c0_603 = arith.constant 0 : index
    %252 = vector.load %arg3[%c0_598, %c6_599, %c2_600, %c0_601, %c0_602, %c0_603] : memref<1x8x8x2x2x4xf32, #tpu.memory_space<vmem>>, vector<1x1x1x2x2x4xf32>
    %253 = vector.shape_cast %252 : vector<1x1x1x2x2x4xf32> to vector<2x2x4xf32>
    %254 = vector.shape_cast %251 : vector<2x2x4xf32> to vector<1x1x1x2x2x4xf32>
    tpu.vector_store %arg3[%c0_598, %c6_599, %c2_600, %c0_601, %c0_602, %c0_603], %254 {strides = array<i32>} : memref<1x8x8x2x2x4xf32, #tpu.memory_space<vmem>>, vector<1x1x1x2x2x4xf32>,
    %c0_604 = arith.constant 0 : index
    %c0_605 = arith.constant 0 : index
    %c6_606 = arith.constant 6 : index
    %c0_607 = arith.constant 0 : index
    %c3_608 = arith.constant 3 : index
    %c0_609 = arith.constant 0 : index
    %255 = vector.load %arg2[%c0_604, %c0_605, %c6_606, %c0_607, %c3_608, %c0_609] : memref<1x2x8x2x8x4xf32, #tpu.memory_space<vmem>>, vector<1x2x1x2x1x4xf32>
    %256 = vector.shape_cast %255 : vector<1x2x1x2x1x4xf32> to vector<2x2x4xf32>
    %c0_610 = arith.constant 0 : index
    %c6_611 = arith.constant 6 : index
    %c3_612 = arith.constant 3 : index
    %c0_613 = arith.constant 0 : index
    %c0_614 = arith.constant 0 : index
    %c0_615 = arith.constant 0 : index
    %257 = vector.load %arg3[%c0_610, %c6_611, %c3_612, %c0_613, %c0_614, %c0_615] : memref<1x8x8x2x2x4xf32, #tpu.memory_space<vmem>>, vector<1x1x1x2x2x4xf32>
    %258 = vector.shape_cast %257 : vector<1x1x1x2x2x4xf32> to vector<2x2x4xf32>
    %259 = vector.shape_cast %256 : vector<2x2x4xf32> to vector<1x1x1x2x2x4xf32>
    tpu.vector_store %arg3[%c0_610, %c6_611, %c3_612, %c0_613, %c0_614, %c0_615], %259 {strides = array<i32>} : memref<1x8x8x2x2x4xf32, #tpu.memory_space<vmem>>, vector<1x1x1x2x2x4xf32>,
    %c0_616 = arith.constant 0 : index
    %c0_617 = arith.constant 0 : index
    %c6_618 = arith.constant 6 : index
    %c0_619 = arith.constant 0 : index
    %c4_620 = arith.constant 4 : index
    %c0_621 = arith.constant 0 : index
    %260 = vector.load %arg2[%c0_616, %c0_617, %c6_618, %c0_619, %c4_620, %c0_621] : memref<1x2x8x2x8x4xf32, #tpu.memory_space<vmem>>, vector<1x2x1x2x1x4xf32>
    %261 = vector.shape_cast %260 : vector<1x2x1x2x1x4xf32> to vector<2x2x4xf32>
    %c0_622 = arith.constant 0 : index
    %c6_623 = arith.constant 6 : index
    %c4_624 = arith.constant 4 : index
    %c0_625 = arith.constant 0 : index
    %c0_626 = arith.constant 0 : index
    %c0_627 = arith.constant 0 : index
    %262 = vector.load %arg3[%c0_622, %c6_623, %c4_624, %c0_625, %c0_626, %c0_627] : memref<1x8x8x2x2x4xf32, #tpu.memory_space<vmem>>, vector<1x1x1x2x2x4xf32>
    %263 = vector.shape_cast %262 : vector<1x1x1x2x2x4xf32> to vector<2x2x4xf32>
    %264 = vector.shape_cast %261 : vector<2x2x4xf32> to vector<1x1x1x2x2x4xf32>
    tpu.vector_store %arg3[%c0_622, %c6_623, %c4_624, %c0_625, %c0_626, %c0_627], %264 {strides = array<i32>} : memref<1x8x8x2x2x4xf32, #tpu.memory_space<vmem>>, vector<1x1x1x2x2x4xf32>,
    %c0_628 = arith.constant 0 : index
    %c0_629 = arith.constant 0 : index
    %c6_630 = arith.constant 6 : index
    %c0_631 = arith.constant 0 : index
    %c5_632 = arith.constant 5 : index
    %c0_633 = arith.constant 0 : index
    %265 = vector.load %arg2[%c0_628, %c0_629, %c6_630, %c0_631, %c5_632, %c0_633] : memref<1x2x8x2x8x4xf32, #tpu.memory_space<vmem>>, vector<1x2x1x2x1x4xf32>
    %266 = vector.shape_cast %265 : vector<1x2x1x2x1x4xf32> to vector<2x2x4xf32>
    %c0_634 = arith.constant 0 : index
    %c6_635 = arith.constant 6 : index
    %c5_636 = arith.constant 5 : index
    %c0_637 = arith.constant 0 : index
    %c0_638 = arith.constant 0 : index
    %c0_639 = arith.constant 0 : index
    %267 = vector.load %arg3[%c0_634, %c6_635, %c5_636, %c0_637, %c0_638, %c0_639] : memref<1x8x8x2x2x4xf32, #tpu.memory_space<vmem>>, vector<1x1x1x2x2x4xf32>
    %268 = vector.shape_cast %267 : vector<1x1x1x2x2x4xf32> to vector<2x2x4xf32>
    %269 = vector.shape_cast %266 : vector<2x2x4xf32> to vector<1x1x1x2x2x4xf32>
    tpu.vector_store %arg3[%c0_634, %c6_635, %c5_636, %c0_637, %c0_638, %c0_639], %269 {strides = array<i32>} : memref<1x8x8x2x2x4xf32, #tpu.memory_space<vmem>>, vector<1x1x1x2x2x4xf32>,
    %c0_640 = arith.constant 0 : index
    %c0_641 = arith.constant 0 : index
    %c6_642 = arith.constant 6 : index
    %c0_643 = arith.constant 0 : index
    %c6_644 = arith.constant 6 : index
    %c0_645 = arith.constant 0 : index
    %270 = vector.load %arg2[%c0_640, %c0_641, %c6_642, %c0_643, %c6_644, %c0_645] : memref<1x2x8x2x8x4xf32, #tpu.memory_space<vmem>>, vector<1x2x1x2x1x4xf32>
    %271 = vector.shape_cast %270 : vector<1x2x1x2x1x4xf32> to vector<2x2x4xf32>
    %c0_646 = arith.constant 0 : index
    %c6_647 = arith.constant 6 : index
    %c6_648 = arith.constant 6 : index
    %c0_649 = arith.constant 0 : index
    %c0_650 = arith.constant 0 : index
    %c0_651 = arith.constant 0 : index
    %272 = vector.load %arg3[%c0_646, %c6_647, %c6_648, %c0_649, %c0_650, %c0_651] : memref<1x8x8x2x2x4xf32, #tpu.memory_space<vmem>>, vector<1x1x1x2x2x4xf32>
    %273 = vector.shape_cast %272 : vector<1x1x1x2x2x4xf32> to vector<2x2x4xf32>
    %274 = vector.shape_cast %271 : vector<2x2x4xf32> to vector<1x1x1x2x2x4xf32>
    tpu.vector_store %arg3[%c0_646, %c6_647, %c6_648, %c0_649, %c0_650, %c0_651], %274 {strides = array<i32>} : memref<1x8x8x2x2x4xf32, #tpu.memory_space<vmem>>, vector<1x1x1x2x2x4xf32>,
    %c0_652 = arith.constant 0 : index
    %c0_653 = arith.constant 0 : index
    %c6_654 = arith.constant 6 : index
    %c0_655 = arith.constant 0 : index
    %c7_656 = arith.constant 7 : index
    %c0_657 = arith.constant 0 : index
    %275 = vector.load %arg2[%c0_652, %c0_653, %c6_654, %c0_655, %c7_656, %c0_657] : memref<1x2x8x2x8x4xf32, #tpu.memory_space<vmem>>, vector<1x2x1x2x1x4xf32>
    %276 = vector.shape_cast %275 : vector<1x2x1x2x1x4xf32> to vector<2x2x4xf32>
    %c0_658 = arith.constant 0 : index
    %c6_659 = arith.constant 6 : index
    %c7_660 = arith.constant 7 : index
    %c0_661 = arith.constant 0 : index
    %c0_662 = arith.constant 0 : index
    %c0_663 = arith.constant 0 : index
    %277 = vector.load %arg3[%c0_658, %c6_659, %c7_660, %c0_661, %c0_662, %c0_663] : memref<1x8x8x2x2x4xf32, #tpu.memory_space<vmem>>, vector<1x1x1x2x2x4xf32>
    %278 = vector.shape_cast %277 : vector<1x1x1x2x2x4xf32> to vector<2x2x4xf32>
    %279 = vector.shape_cast %276 : vector<2x2x4xf32> to vector<1x1x1x2x2x4xf32>
    tpu.vector_store %arg3[%c0_658, %c6_659, %c7_660, %c0_661, %c0_662, %c0_663], %279 {strides = array<i32>} : memref<1x8x8x2x2x4xf32, #tpu.memory_space<vmem>>, vector<1x1x1x2x2x4xf32>,
    %c0_664 = arith.constant 0 : index
    %c0_665 = arith.constant 0 : index
    %c7_666 = arith.constant 7 : index
    %c0_667 = arith.constant 0 : index
    %c0_668 = arith.constant 0 : index
    %c0_669 = arith.constant 0 : index
    %280 = vector.load %arg2[%c0_664, %c0_665, %c7_666, %c0_667, %c0_668, %c0_669] : memref<1x2x8x2x8x4xf32, #tpu.memory_space<vmem>>, vector<1x2x1x2x1x4xf32>
    %281 = vector.shape_cast %280 : vector<1x2x1x2x1x4xf32> to vector<2x2x4xf32>
    %c0_670 = arith.constant 0 : index
    %c7_671 = arith.constant 7 : index
    %c0_672 = arith.constant 0 : index
    %c0_673 = arith.constant 0 : index
    %c0_674 = arith.constant 0 : index
    %c0_675 = arith.constant 0 : index
    %282 = vector.load %arg3[%c0_670, %c7_671, %c0_672, %c0_673, %c0_674, %c0_675] : memref<1x8x8x2x2x4xf32, #tpu.memory_space<vmem>>, vector<1x1x1x2x2x4xf32>
    %283 = vector.shape_cast %282 : vector<1x1x1x2x2x4xf32> to vector<2x2x4xf32>
    %284 = vector.shape_cast %281 : vector<2x2x4xf32> to vector<1x1x1x2x2x4xf32>
    tpu.vector_store %arg3[%c0_670, %c7_671, %c0_672, %c0_673, %c0_674, %c0_675], %284 {strides = array<i32>} : memref<1x8x8x2x2x4xf32, #tpu.memory_space<vmem>>, vector<1x1x1x2x2x4xf32>,
    %c0_676 = arith.constant 0 : index
    %c0_677 = arith.constant 0 : index
    %c7_678 = arith.constant 7 : index
    %c0_679 = arith.constant 0 : index
    %c1_680 = arith.constant 1 : index
    %c0_681 = arith.constant 0 : index
    %285 = vector.load %arg2[%c0_676, %c0_677, %c7_678, %c0_679, %c1_680, %c0_681] : memref<1x2x8x2x8x4xf32, #tpu.memory_space<vmem>>, vector<1x2x1x2x1x4xf32>
    %286 = vector.shape_cast %285 : vector<1x2x1x2x1x4xf32> to vector<2x2x4xf32>
    %c0_682 = arith.constant 0 : index
    %c7_683 = arith.constant 7 : index
    %c1_684 = arith.constant 1 : index
    %c0_685 = arith.constant 0 : index
    %c0_686 = arith.constant 0 : index
    %c0_687 = arith.constant 0 : index
    %287 = vector.load %arg3[%c0_682, %c7_683, %c1_684, %c0_685, %c0_686, %c0_687] : memref<1x8x8x2x2x4xf32, #tpu.memory_space<vmem>>, vector<1x1x1x2x2x4xf32>
    %288 = vector.shape_cast %287 : vector<1x1x1x2x2x4xf32> to vector<2x2x4xf32>
    %289 = vector.shape_cast %286 : vector<2x2x4xf32> to vector<1x1x1x2x2x4xf32>
    tpu.vector_store %arg3[%c0_682, %c7_683, %c1_684, %c0_685, %c0_686, %c0_687], %289 {strides = array<i32>} : memref<1x8x8x2x2x4xf32, #tpu.memory_space<vmem>>, vector<1x1x1x2x2x4xf32>,
    %c0_688 = arith.constant 0 : index
    %c0_689 = arith.constant 0 : index
    %c7_690 = arith.constant 7 : index
    %c0_691 = arith.constant 0 : index
    %c2_692 = arith.constant 2 : index
    %c0_693 = arith.constant 0 : index
    %290 = vector.load %arg2[%c0_688, %c0_689, %c7_690, %c0_691, %c2_692, %c0_693] : memref<1x2x8x2x8x4xf32, #tpu.memory_space<vmem>>, vector<1x2x1x2x1x4xf32>
    %291 = vector.shape_cast %290 : vector<1x2x1x2x1x4xf32> to vector<2x2x4xf32>
    %c0_694 = arith.constant 0 : index
    %c7_695 = arith.constant 7 : index
    %c2_696 = arith.constant 2 : index
    %c0_697 = arith.constant 0 : index
    %c0_698 = arith.constant 0 : index
    %c0_699 = arith.constant 0 : index
    %292 = vector.load %arg3[%c0_694, %c7_695, %c2_696, %c0_697, %c0_698, %c0_699] : memref<1x8x8x2x2x4xf32, #tpu.memory_space<vmem>>, vector<1x1x1x2x2x4xf32>
    %293 = vector.shape_cast %292 : vector<1x1x1x2x2x4xf32> to vector<2x2x4xf32>
    %294 = vector.shape_cast %291 : vector<2x2x4xf32> to vector<1x1x1x2x2x4xf32>
    tpu.vector_store %arg3[%c0_694, %c7_695, %c2_696, %c0_697, %c0_698, %c0_699], %294 {strides = array<i32>} : memref<1x8x8x2x2x4xf32, #tpu.memory_space<vmem>>, vector<1x1x1x2x2x4xf32>,
    %c0_700 = arith.constant 0 : index
    %c0_701 = arith.constant 0 : index
    %c7_702 = arith.constant 7 : index
    %c0_703 = arith.constant 0 : index
    %c3_704 = arith.constant 3 : index
    %c0_705 = arith.constant 0 : index
    %295 = vector.load %arg2[%c0_700, %c0_701, %c7_702, %c0_703, %c3_704, %c0_705] : memref<1x2x8x2x8x4xf32, #tpu.memory_space<vmem>>, vector<1x2x1x2x1x4xf32>
    %296 = vector.shape_cast %295 : vector<1x2x1x2x1x4xf32> to vector<2x2x4xf32>
    %c0_706 = arith.constant 0 : index
    %c7_707 = arith.constant 7 : index
    %c3_708 = arith.constant 3 : index
    %c0_709 = arith.constant 0 : index
    %c0_710 = arith.constant 0 : index
    %c0_711 = arith.constant 0 : index
    %297 = vector.load %arg3[%c0_706, %c7_707, %c3_708, %c0_709, %c0_710, %c0_711] : memref<1x8x8x2x2x4xf32, #tpu.memory_space<vmem>>, vector<1x1x1x2x2x4xf32>
    %298 = vector.shape_cast %297 : vector<1x1x1x2x2x4xf32> to vector<2x2x4xf32>
    %299 = vector.shape_cast %296 : vector<2x2x4xf32> to vector<1x1x1x2x2x4xf32>
    tpu.vector_store %arg3[%c0_706, %c7_707, %c3_708, %c0_709, %c0_710, %c0_711], %299 {strides = array<i32>} : memref<1x8x8x2x2x4xf32, #tpu.memory_space<vmem>>, vector<1x1x1x2x2x4xf32>,
    %c0_712 = arith.constant 0 : index
    %c0_713 = arith.constant 0 : index
    %c7_714 = arith.constant 7 : index
    %c0_715 = arith.constant 0 : index
    %c4_716 = arith.constant 4 : index
    %c0_717 = arith.constant 0 : index
    %300 = vector.load %arg2[%c0_712, %c0_713, %c7_714, %c0_715, %c4_716, %c0_717] : memref<1x2x8x2x8x4xf32, #tpu.memory_space<vmem>>, vector<1x2x1x2x1x4xf32>
    %301 = vector.shape_cast %300 : vector<1x2x1x2x1x4xf32> to vector<2x2x4xf32>
    %c0_718 = arith.constant 0 : index
    %c7_719 = arith.constant 7 : index
    %c4_720 = arith.constant 4 : index
    %c0_721 = arith.constant 0 : index
    %c0_722 = arith.constant 0 : index
    %c0_723 = arith.constant 0 : index
    %302 = vector.load %arg3[%c0_718, %c7_719, %c4_720, %c0_721, %c0_722, %c0_723] : memref<1x8x8x2x2x4xf32, #tpu.memory_space<vmem>>, vector<1x1x1x2x2x4xf32>
    %303 = vector.shape_cast %302 : vector<1x1x1x2x2x4xf32> to vector<2x2x4xf32>
    %304 = vector.shape_cast %301 : vector<2x2x4xf32> to vector<1x1x1x2x2x4xf32>
    tpu.vector_store %arg3[%c0_718, %c7_719, %c4_720, %c0_721, %c0_722, %c0_723], %304 {strides = array<i32>} : memref<1x8x8x2x2x4xf32, #tpu.memory_space<vmem>>, vector<1x1x1x2x2x4xf32>,
    %c0_724 = arith.constant 0 : index
    %c0_725 = arith.constant 0 : index
    %c7_726 = arith.constant 7 : index
    %c0_727 = arith.constant 0 : index
    %c5_728 = arith.constant 5 : index
    %c0_729 = arith.constant 0 : index
    %305 = vector.load %arg2[%c0_724, %c0_725, %c7_726, %c0_727, %c5_728, %c0_729] : memref<1x2x8x2x8x4xf32, #tpu.memory_space<vmem>>, vector<1x2x1x2x1x4xf32>
    %306 = vector.shape_cast %305 : vector<1x2x1x2x1x4xf32> to vector<2x2x4xf32>
    %c0_730 = arith.constant 0 : index
    %c7_731 = arith.constant 7 : index
    %c5_732 = arith.constant 5 : index
    %c0_733 = arith.constant 0 : index
    %c0_734 = arith.constant 0 : index
    %c0_735 = arith.constant 0 : index
    %307 = vector.load %arg3[%c0_730, %c7_731, %c5_732, %c0_733, %c0_734, %c0_735] : memref<1x8x8x2x2x4xf32, #tpu.memory_space<vmem>>, vector<1x1x1x2x2x4xf32>
    %308 = vector.shape_cast %307 : vector<1x1x1x2x2x4xf32> to vector<2x2x4xf32>
    %309 = vector.shape_cast %306 : vector<2x2x4xf32> to vector<1x1x1x2x2x4xf32>
    tpu.vector_store %arg3[%c0_730, %c7_731, %c5_732, %c0_733, %c0_734, %c0_735], %309 {strides = array<i32>} : memref<1x8x8x2x2x4xf32, #tpu.memory_space<vmem>>, vector<1x1x1x2x2x4xf32>,
    %c0_736 = arith.constant 0 : index
    %c0_737 = arith.constant 0 : index
    %c7_738 = arith.constant 7 : index
    %c0_739 = arith.constant 0 : index
    %c6_740 = arith.constant 6 : index
    %c0_741 = arith.constant 0 : index
    %310 = vector.load %arg2[%c0_736, %c0_737, %c7_738, %c0_739, %c6_740, %c0_741] : memref<1x2x8x2x8x4xf32, #tpu.memory_space<vmem>>, vector<1x2x1x2x1x4xf32>
    %311 = vector.shape_cast %310 : vector<1x2x1x2x1x4xf32> to vector<2x2x4xf32>
    %c0_742 = arith.constant 0 : index
    %c7_743 = arith.constant 7 : index
    %c6_744 = arith.constant 6 : index
    %c0_745 = arith.constant 0 : index
    %c0_746 = arith.constant 0 : index
    %c0_747 = arith.constant 0 : index
    %312 = vector.load %arg3[%c0_742, %c7_743, %c6_744, %c0_745, %c0_746, %c0_747] : memref<1x8x8x2x2x4xf32, #tpu.memory_space<vmem>>, vector<1x1x1x2x2x4xf32>
    %313 = vector.shape_cast %312 : vector<1x1x1x2x2x4xf32> to vector<2x2x4xf32>
    %314 = vector.shape_cast %311 : vector<2x2x4xf32> to vector<1x1x1x2x2x4xf32>
    tpu.vector_store %arg3[%c0_742, %c7_743, %c6_744, %c0_745, %c0_746, %c0_747], %314 {strides = array<i32>} : memref<1x8x8x2x2x4xf32, #tpu.memory_space<vmem>>, vector<1x1x1x2x2x4xf32>,
    %c0_748 = arith.constant 0 : index
    %c0_749 = arith.constant 0 : index
    %c7_750 = arith.constant 7 : index
    %c0_751 = arith.constant 0 : index
    %c7_752 = arith.constant 7 : index
    %c0_753 = arith.constant 0 : index
    %315 = vector.load %arg2[%c0_748, %c0_749, %c7_750, %c0_751, %c7_752, %c0_753] : memref<1x2x8x2x8x4xf32, #tpu.memory_space<vmem>>, vector<1x2x1x2x1x4xf32>
    %316 = vector.shape_cast %315 : vector<1x2x1x2x1x4xf32> to vector<2x2x4xf32>
    %c0_754 = arith.constant 0 : index
    %c7_755 = arith.constant 7 : index
    %c7_756 = arith.constant 7 : index
    %c0_757 = arith.constant 0 : index
    %c0_758 = arith.constant 0 : index
    %c0_759 = arith.constant 0 : index
    %317 = vector.load %arg3[%c0_754, %c7_755, %c7_756, %c0_757, %c0_758, %c0_759] : memref<1x8x8x2x2x4xf32, #tpu.memory_space<vmem>>, vector<1x1x1x2x2x4xf32>
    %318 = vector.shape_cast %317 : vector<1x1x1x2x2x4xf32> to vector<2x2x4xf32>
    %319 = vector.shape_cast %316 : vector<2x2x4xf32> to vector<1x1x1x2x2x4xf32>
    tpu.vector_store %arg3[%c0_754, %c7_755, %c7_756, %c0_757, %c0_758, %c0_759], %319 {strides = array<i32>} : memref<1x8x8x2x2x4xf32, #tpu.memory_space<vmem>>, vector<1x1x1x2x2x4xf32>,
    return
  }
  func.func @transform_0(%arg0: i32, %arg1: i32) -> (i32, i32, i32, i32, i32, i32) {
    %c0_i32 = arith.constant 0 : i32
    %c0_i32_0 = arith.constant 0 : i32
    %c0_i32_1 = arith.constant 0 : i32
    %c0_i32_2 = arith.constant 0 : i32
    %c0_i32_3 = arith.constant 0 : i32
    return %arg0, %arg1, %c0_i32, %c0_i32_0, %c0_i32_1, %c0_i32_2 : i32, i32, i32, i32, i32, i32
  }
  func.func @transform_1(%arg0: i32, %arg1: i32) -> (i32, i32, i32, i32, i32, i32) {
    %c0_i32 = arith.constant 0 : i32
    %c0_i32_0 = arith.constant 0 : i32
    %c0_i32_1 = arith.constant 0 : i32
    %c0_i32_2 = arith.constant 0 : i32
    %c0_i32_3 = arith.constant 0 : i32
    return %arg0, %c0_i32, %c0_i32_0, %arg1, %c0_i32_1, %c0_i32_2 : i32, i32, i32, i32, i32, i32
  }
}

</mosaic_0001>

<bundles_post_ra>
// kernel: tpu_custom_call.1
= control target key start
LH: loop header
LB: loop body
LE: loop exit
PB: predicated region body
PF: predicated region fallthrough
CT: control target
= control target key end

     0   :  { %6 = vsyncpa [#allocation3], 0  ;;  %s3267_s0 = inlined_call_operand.hbm [shape: f32[2,2,8,2,32], index: 0, kind: input, shape index: {}]   ;;  %s3268_s1 = inlined_call_operand.hbm [shape: f32[2,8,8,2,8], index: 1, kind: output, shape index: {}]  }
   0x1   :  { %8 = vsyncpa [#allocation3 + $0x1], 0 }
   0x2   :  { %9 = vsyncpa [#allocation4], 0 }
   0x3   :  { %11 = vsyncpa [#allocation4 + $0x1], 0  ;;  %s2280_s6 = smov 0   ;;  %s2282_s7 = smov 0  }
   0x4   :  { %s2284_s8 = smov 0   ;;  %s2286_s9 = smov 0  }
   0x5   :  { %s2288_s10 = smov 0   ;;  %s2290_s11 = smov 0  }
   0x6 LB: > { %s1864_s12 = sadd.s32 4294967295, %s2252_s11   ;;  %s1865_s13 = sadd.s32 4294967294, %s2252_s11   ;;  %s2252_s11 = sphi %s2290_s11, %s17_s11   ;;  %s2248_s10 = sphi %s2288_s10, %s3283_s10   ;;  %s2244_s9 = sphi %s2286_s9, %s3282_s9   ;;  %s2240_s8 = sphi %s2284_s8, %s3281_s8   ;;  %s2236_s7 = sphi %s2282_s7, %s3280_s7   ;;  %s2232_s6 = sphi %s2280_s6, %s3279_s6  }
   0x7   : > { %s29_s14 = sadd.s32 1, %s2248_s10  ;;  %s38_s15 = sadd.s32 1, %s2240_s8 }
   0x8   : > { %p31_p0 = scmp.ge.s32.totalorder %s29_s14, 2  ;;  %p45_p1 = scmp.ne.s32.totalorder %s2240_s8, %s2236_s7 }
   0x9   : > { %p46_p2 = scmp.eq.s32.totalorder %s2252_s11, 0  ;;  %p51_p3 = scmp.ne.s32.totalorder %s2236_s7, %s2232_s6 }
   0xa   : > { %s3285_s14 = smov (%p31_p0, %s29_s14), 0  ;;  %p52_p5 = scmp.eq.s32.totalorder %s1864_s12, 0 }
   0xb   : > { %p2321_p4 = por %p46_p2, %p45_p1  ;;  %s33_s17 = ssub.s32 %s2248_s10, %s3285_s14 }
   0xc   : > { %p77_p6 = scmp.eq.s32.totalorder %s1864_s12, 1  ;;  %p36_p7 = scmp.eq.s32.totalorder %s33_s17, 0 }
   0xd   : > { %p2327_p8 = por %p52_p5, %p51_p3  ;;  %p83_p10 = scmp.eq.s32.totalorder %s1865_s13, 1 }
   0xe   : > { %p2331_p9 = por %p77_p6, %p45_p1  ;;  %p2068_p13 = scmp.lt.s32.totalorder %s2252_s11, 2 }
   0xf   : > { %s2336_s20 = scalar_select %p36_p7, %s2240_s8, %s38_s15  }
  0x10   : > { %s3272_s19 = scalar_select %p2331_p9, 1, 0 }
  0x11   : > { %p2338_p11 = por %p83_p10, %p51_p3  ;;  %s103_s22 = sand.u32 1, %s2240_s8  }
  0x12   : > { %s1868_s23 = sshll.u32 %s103_s22, 5  ;;  %s2054_s24 = sshll.u32 %s2248_s10, 9 }
  0x13   : > { %s3273_s21 = scalar_select %p2338_p11, 1, 0 }
  0x14   : > { %s2349_s27 = scalar_lea.hbm %s3267_s0, %s2054_s24  ;;  %s107_s28 = scalar_lea.vmem [#allocation2], %s1868_s23 }
  0x15   : > { %s117_s29 = sshll.u32 %s107_s28, 4  ;;  %p2355_p0 = pnand %p2068_p13, %p2321_p4  ;;  %s2351_s29 = int_to_ptr.vmem [resolvable:$true] %s117_s29 }
  0x16   : > { %s2360_s2 = scalar_lea.sflag [#allocation3], %s103_s22  ;;  %s2140_s3 = scalar_lea.hbm %s2349_s27, 512 }
  0x17   : > { %p2141_p2 = scmp.ne.s32.totalorder %s2349_s27, %s2140_s3  ;;  %p2142_p3 = pneg %p2355_p0 }
  0x18   : > { %s2145_s12 = scalar_lea.hbm %s3267_s0, 1024  ;;  %p2146_p4 = scmp.lt.u32.totalorder %s2349_s27, %s3267_s0 }
  0x19   : > { %p2143_p5 = pnand %p2142_p3, %p2141_p2  ;;  %p2147_p7 = scmp.lt.u32.totalorder %s2145_s12, %s2140_s3 }
  0x1a   : > { %p2149_p13 = scmp.lt.u32.totalorder %s2140_s3, %s2349_s27 }
  0x1b   : > { %p2144_p6 = pneg %p2143_p5  ;;  %p2148_p10 = por %p2147_p7, %p2146_p4 }
  0x1d   : > { %p2150_p12 = por %p2149_p13, %p2148_p10 }
  0x1f   : > { %p2151_p1 = pnand %p2150_p12, %p2144_p6 }
  0x21   : > { %2154 = shalt.err (!%p2151_p1)
}
  0x22   : > { %s2155_s16 = scalar_lea.vmem %s2351_s29, 512  ;;  %s2254_s17 = smov [#allocation2]  }
  0x23   : > { %p2156_p2 = scmp.ne.s32.totalorder %s2351_s29, %s2155_s16  ;;  %s2160_s22 = sshll.u32 %s2254_s17, 4  ;;  %s2161_s22 = int_to_ptr.vmem [resolvable:$false] %s2160_s22 }
  0x24   : > { %s2162_s23 = scalar_lea.vmem %s2161_s22, 1024  ;;  %p2163_p9 = scmp.lt.s32.totalorder %s2351_s29, %s2161_s22 }
  0x25   : > { %p2158_p5 = pnand %p2156_p2, %p2142_p3  ;;  %p2164_p4 = scmp.lt.s32.totalorder %s2162_s23, %s2155_s16 }
  0x27   : > { %p2159_p11 = pneg %p2158_p5  ;;  %p2165_p7 = por %p2164_p4, %p2163_p9 }
  0x29   : > { %p2166_p10 = pnand %p2165_p7, %p2159_p11 }
  0x2b   : > { %2169 = shalt.err (!%p2166_p10)
}
  0x2c   : > { %s2255_s24 = smov 32   ;;  %s2256_s25 = smov 2  }
  0x2d   : > { %2063 = dma.hbm_to_vmem [thread:$0]  (!%p2355_p0), %s2349_s27, 512, %s2351_s29, %s2360_s2, %s2255_s24, %s2255_s24, %s2256_s25  }
  0x2e   : > { %p125_p12 = scmp.lt.s32.totalorder %s2252_s11, 3  ;;  %p3275_p1 = scmp.ge.s32.totalorder %s2252_s11, 1 }
  0x30   : > { %p126_p3 = pnand %p3275_p1, %p125_p12 }
  0x31   : > { %s2392_s26 = sand.u32 (!%p126_p3), 1, %s2236_s7  }
  0x32   : > { %129 = sbr.rel (%p126_p3) target bundleno = 2480 (0x9b0), region = 24  ;;  %s1872_s28 = sshll.u32 (!%p126_p3), %s2392_s26, 5 }
  0x33   : > { %s132_s3 = scalar_lea.sflag (!%p126_p3), [#allocation3], %s2392_s26  ;;  %s2396_s4 = scalar_lea.vmem (!%p126_p3), [#allocation2], %s1872_s28 }
  0x39   : > { %2223 = dma.done.wait (%p2327_p8), %s132_s3, 512  }
  0x3a   : > { %2225 = vsyncadd (%p2327_p8), %s132_s3, 4294966784  ;;  %v161_v0 = vlaneseq  ;;  %v2257_v1 = vmov 1934713408   ;;  %v175_v5 = vld [vmem:[%s2396_s4 + $0x10] sm:$0x3]  ;;  %s2258_s27 = smov 124  }
  0x3b   : > { %v159_v2 = vunpack.c.l.s4 %v2257_v1  ;;  %v174_v6 = vld [vmem:[%s2396_s4] sm:$0x3]  ;;  %180 = vrot.lane.b32.xlu1 %v175_v5, %s2258_s27  ;;  %v201_v7 = vld [vmem:[%s2396_s4 + $0x10] sm:$0x3]  ;;  %s2259_s18 = smov 120   ;;  %s2260_s29 = smov 116  }
  0x3c   : > { %v162_v4 = vshrl.u32 %v161_v0, 7  ;;  %178 = vrot.lane.b32.xlu0 %v174_v6, %s2258_s27  ;;  %v200_v9 = vld [vmem:[%s2396_s4] sm:$0x3]  ;;  %v227_v13 = vld [vmem:[%s2396_s4 + $0x10] sm:$0x3]  ;;  %v2261_v14 = vmov 0.0  }
  0x3d   : > { %v160_v3 = vunpack.c.0.s8 %v159_v2  ;;  %v2132_v10 = vld [vmem:[%s2396_s4] ss:$16 sps:$4 sm:$0x33]   ;;  %s2262_s30 = smov 4   ;;  %s2263_s2 = smov 112   ;;  %vm170_vm0 = vcmask 31744  }
  0x3e   : > { %v226_v12 = vld [vmem:[%s2396_s4] sm:$0x3]  ;;  %v253_v16 = vld [vmem:[%s2396_s4 + $0x10] sm:$0x3]  ;;  %s2264_s5 = smov 108   ;;  %s2265_s12 = smov 104  }
  0x3f   : > { %v2407_v8 = vsub.s32 %v160_v3, %v162_v4  ;;  %206 = vrot.lane.b32.xlu1 %v201_v7, %s2259_s18  ;;  %v252_v17 = vld [vmem:[%s2396_s4] sm:$0x3]  ;;  %v279_v19 = vld [vmem:[%s2396_s4 + $0x10] sm:$0x3]  ;;  %s2266_s13 = smov 100   ;;  %s1873_s15 = sshll.u32 %s2392_s26, 7 }
  0x40   : > { %204 = vrot.lane.b32.xlu0 %v200_v9, %s2259_s18  ;;  %v278_v18 = vld [vmem:[%s2396_s4] sm:$0x3]  ;;  %v305_v20 = vld [vmem:[%s2396_s4 + $0x10] sm:$0x3]  ;;  %v1884_v26 = vld [vmem:[%s2396_s4 + $0x2] sm:$0x3] }
  0x41   : > { %v2414_v11 = vrot.slane %v2132_v10, %v2407_v8  ;;  %v2133_v21 = vld [vmem:[%s2396_s4 + $0x2] ss:$16 sps:$4 sm:$0x33]   ;;  %v304_v22 = vld [vmem:[%s2396_s4] sm:$0x3]  ;;  %vm172_vm1 = vcmask 58368  }
  0x42   : > { %v330_v23 = vld [vmem:[%s2396_s4] sm:$0x3]  ;;  %v2439_v24 = vrot.slane %v2133_v21, %v2407_v8  ;;  %v331_v25 = vld [vmem:[%s2396_s4 + $0x10] sm:$0x3]  ;;  %v1888_v28 = vld [vmem:[%s2396_s4 + $0x12] sm:$0x3] }
  0x43   : > { %230 = vrot.lane.b32.xlu1 %v226_v12, %s2260_s29  ;;  %v165_v15 = vcombine.high %v2414_v11, %v2261_v14  ;;  %v1885_v29 = vld [vmem:[%s2396_s4 + $0x12] sm:$0x3]  ;;  %v1890_v30 = vld [vmem:[%s2396_s4 + $0x2] sm:$0x3]  ;;  %v1908_v41 = vld [vmem:[%s2396_s4 + $0x4] sm:$0x3] }
  0x44   : > { %232 = vrot.lane.b32.xlu0 %v227_v13, %s2260_s29  ;;  %v367_v27 = vcombine.high %v2439_v24, %v2261_v14  ;;  %v1887_v31 = vld [vmem:[%s2396_s4 + $0x2] sm:$0x3]  ;;  %v1894_v32 = vld [vmem:[%s2396_s4 + $0x12] sm:$0x3]  ;;  %v1912_v44 = vld [vmem:[%s2396_s4 + $0x14] sm:$0x3] }
  0x45   : > { %v1891_v33 = vld [vmem:[%s2396_s4 + $0x12] sm:$0x3]  ;;  %v1896_v34 = vld [vmem:[%s2396_s4 + $0x2] sm:$0x3]  ;;  %v1914_v46 = vld [vmem:[%s2396_s4 + $0x4] sm:$0x3] }
  0x46   : > { %v1893_v35 = vld [vmem:[%s2396_s4 + $0x2] sm:$0x3]  ;;  %v1900_v36 = vld [vmem:[%s2396_s4 + $0x12] sm:$0x3]  ;;  %v1909_v47 = vld [vmem:[%s2396_s4 + $0x14] sm:$0x3] }
  0x47   : > { %258 = vrot.lane.b32.xlu1 %v253_v16, %s2263_s2  ;;  %v1897_v37 = vld [vmem:[%s2396_s4 + $0x12] sm:$0x3]  ;;  %v1902_v38 = vld [vmem:[%s2396_s4 + $0x2] sm:$0x3]  ;;  %v1918_v48 = vld [vmem:[%s2396_s4 + $0x14] sm:$0x3] }
  0x48   : > { %167 = vrot.lane.b32.xlu0 %v165_v15, %s2262_s30  ;;  %v2134_v39 = vld [vmem:[%s2396_s4 + $0x4] ss:$16 sps:$4 sm:$0x33]   ;;  %v1899_v40 = vld [vmem:[%s2396_s4 + $0x2] sm:$0x3]  ;;  %s2529_s16 = scalar_lea.vmem [#allocation5], %s1873_s15 }
  0x49   : > { %v2475_v42 = vrot.slane %v2134_v39, %v2407_v8  ;;  %v1903_v43 = vld [vmem:[%s2396_s4 + $0x12] sm:$0x3]  ;;  %v1911_v49 = vld [vmem:[%s2396_s4 + $0x4] sm:$0x3]  ;;  %v1915_v51 = vld [vmem:[%s2396_s4 + $0x14] sm:$0x3] }
  0x4a   : > { %v1920_v50 = vld [vmem:[%s2396_s4 + $0x4] sm:$0x3]  ;;  %v1924_v52 = vld [vmem:[%s2396_s4 + $0x14] sm:$0x3]  ;;  %s2055_s17 = sshll.u32 %s2244_s9, 11  ;;  %s1778_s22 = sshll.u32 %s2529_s16, 4  ;;  %s3214_s22 = int_to_ptr.vmem [resolvable:$true] %s1778_s22 }
  0x4b   : > { %282 = vrot.lane.b32.xlu1 %v278_v18, %s2264_s5  ;;  %v568_v45 = vcombine.high %v2475_v42, %v2261_v14  ;;  %v1917_v53 = vld [vmem:[%s2396_s4 + $0x4] sm:$0x3]  ;;  %v1921_v55 = vld [vmem:[%s2396_s4 + $0x14] sm:$0x3]  ;;  %s3212_s25 = scalar_lea.hbm %s3268_s1, %s2055_s17  ;;  %s1764_s9 = scalar_lea.sflag [#allocation4], %s2392_s26 }
  0x4c   : > { %256 = vrot.lane.b32.xlu0 %v252_v17, %s2263_s2  ;;  %v1926_v54 = vld [vmem:[%s2396_s4 + $0x4] sm:$0x3]  ;;  %v1927_v57 = vld [vmem:[%s2396_s4 + $0x14] sm:$0x3]  ;;  %s2170_s28 = scalar_lea.vmem %s3214_s22, 2048  ;;  %p3276_p9 = scmp.ne.s32.totalorder %s3272_s19, 0 }
  0x4d   : > { %v1923_v56 = vld [vmem:[%s2396_s4 + $0x4] sm:$0x3]  ;;  %p2171_p8 = scmp.ne.s32.totalorder %s3214_s22, %s2170_s28  ;;  %s2267_s3 = smov [#allocation5]  }
  0x4f   : > { %310 = vrot.lane.b32.xlu1 %v305_v20, %s2265_s12  ;;  %p2172_p11 = pnand %p2171_p8, %p3276_p9 }
  0x50   : > { %284 = vrot.lane.b32.xlu0 %v279_v19, %s2264_s5 }
  0x51   : > { %p2173_p0 = pneg %p2172_p11 }
  0x53   : > { %334 = vrot.lane.b32.xlu1 %v330_v23, %s2266_s13 }
  0x54   : > { %308 = vrot.lane.b32.xlu0 %v304_v22, %s2265_s12 }
  0x57   : > { %379 = vrot.lane.b32.xlu1 %v1884_v26, %s2258_s27 }
  0x58   : > { %336 = vrot.lane.b32.xlu0 %v331_v25, %s2266_s13 }
  0x5b   : > { %407 = vrot.lane.b32.xlu1 %v1888_v28, %s2259_s18 }
  0x5c   : > { %369 = vrot.lane.b32.xlu0 %v367_v27, %s2262_s30 }
  0x5f   : > { %431 = vrot.lane.b32.xlu1 %v1890_v30, %s2260_s29 }
  0x60   : > { %381 = vrot.lane.b32.xlu0 %v1885_v29, %s2258_s27 }
  0x63   : > { %459 = vrot.lane.b32.xlu1 %v1894_v32, %s2263_s2 }
  0x64   : > { %405 = vrot.lane.b32.xlu0 %v1887_v31, %s2259_s18 }
  0x67   : > { %483 = vrot.lane.b32.xlu1 %v1896_v34, %s2264_s5 }
  0x68   : > { %433 = vrot.lane.b32.xlu0 %v1891_v33, %s2260_s29 }
  0x6b   : > { %511 = vrot.lane.b32.xlu1 %v1900_v36, %s2265_s12 }
  0x6c   : > { %457 = vrot.lane.b32.xlu0 %v1893_v35, %s2263_s2 }
  0x6f   : > { %535 = vrot.lane.b32.xlu1 %v1902_v38, %s2266_s13 }
  0x70   : > { %485 = vrot.lane.b32.xlu0 %v1897_v37, %s2264_s5 }
  0x73   : > { %580 = vrot.lane.b32.xlu1 %v1908_v41, %s2258_s27 }
  0x74   : > { %509 = vrot.lane.b32.xlu0 %v1899_v40, %s2265_s12 }
  0x77   : > { %608 = vrot.lane.b32.xlu1 %v1912_v44, %s2259_s18 }
  0x78   : > { %537 = vrot.lane.b32.xlu0 %v1903_v43, %s2266_s13 }
  0x7b   : > { %632 = vrot.lane.b32.xlu1 %v1914_v46, %s2260_s29 }
  0x7c   : > { %570 = vrot.lane.b32.xlu0 %v568_v45, %s2262_s30 }
  0x7f   : > { %660 = vrot.lane.b32.xlu1 %v1918_v48, %s2263_s2 }
  0x80   : > { %582 = vrot.lane.b32.xlu0 %v1909_v47, %s2258_s27 }
  0x83   : > { %684 = vrot.lane.b32.xlu1 %v1920_v50, %s2264_s5 }
  0x84   : > { %606 = vrot.lane.b32.xlu0 %v1911_v49, %s2259_s18 }
  0x87   : > { %712 = vrot.lane.b32.xlu1 %v1924_v52, %s2265_s12 }
  0x88   : > { %634 = vrot.lane.b32.xlu0 %v1915_v51, %s2260_s29 }
  0x8b   : > { %736 = vrot.lane.b32.xlu1 %v1926_v54, %s2266_s13 }
  0x8c   : > { %658 = vrot.lane.b32.xlu0 %v1917_v53, %s2263_s2 }
  0x90   : > { %686 = vrot.lane.b32.xlu0 %v1921_v55, %s2264_s5 }
  0x94   : > { %710 = vrot.lane.b32.xlu0 %v1923_v56, %s2265_s12 }
  0x98   : > { %738 = vrot.lane.b32.xlu0 %v1927_v57, %s2266_s13 }
  0xad   : > { %v181_v58 = vpop.permute.xlu1 %180 }
  0xae   : > { %v179_v59 = vpop.permute.xlu0 %178 }
  0xaf   : > { %v184_v60 = vcombine.low %v179_v59, %v181_v58 }
  0xb1   : > { %v2510_v61 = vrot.slane %v184_v60, %v2407_v8  ;;  %v207_v62 = vpop.permute.xlu1 %206 }
  0xb2   : > { %v205_v63 = vpop.permute.xlu0 %204 }
  0xb3   : > { %v210_v0 = vcombine.low %v205_v63, %v207_v62  ;;  %v192_v1 = vcombine.high %v2510_v61, %v2261_v14 }
  0xb5   : > { %v2515_v2 = vrot.slane %v210_v0, %v2407_v8  ;;  %194 = vrot.lane.b32.xlu1 %v192_v1, %s2262_s30  ;;  %v231_v3 = vpop.permute.xlu1 %230 }
  0xb6   : > { %v233_v4 = vpop.permute.xlu0 %232 }
  0xb7   : > { %v236_v5 = vcombine.low %v231_v3, %v233_v4  ;;  %v218_v6 = vcombine.high %v2515_v2, %v2261_v14 }
  0xb9   : > { %v2522_v7 = vrot.slane %v236_v5, %v2407_v8  ;;  %220 = vrot.lane.b32.xlu0 %v218_v6, %s2262_s30  ;;  %v259_v10 = vpop.permute.xlu1 %258 }
  0xba   : > { %v168_v9 = vpop.permute.xlu0 %167 }
  0xbb   : > { %v171_v12 = vsel %vm170_vm0, %v2414_v11, %v168_v9  ;;  %v244_v13 = vcombine.high %v2522_v7, %v2261_v14 }
  0xbc   : > { %173 = vst.msk [vmem:[%s2529_s16] sm:$0x3] %vm172_vm1, %v171_v12 }
  0xbd   : > { %246 = vrot.lane.b32.xlu1 %v244_v13, %s2262_s30  ;;  %v283_v16 = vpop.permute.xlu1 %282 }
  0xbe   : > { %v257_v15 = vpop.permute.xlu0 %256 }
  0xbf   : > { %v262_v17 = vcombine.low %v257_v15, %v259_v10 }
  0xc1   : > { %v2535_v18 = vrot.slane %v262_v17, %v2407_v8  ;;  %v311_v20 = vpop.permute.xlu1 %310 }
  0xc2   : > { %v285_v19 = vpop.permute.xlu0 %284 }
  0xc3   : > { %v288_v21 = vcombine.low %v283_v16, %v285_v19  ;;  %v270_v11 = vcombine.high %v2535_v18, %v2261_v14 }
  0xc5   : > { %v2540_v22 = vrot.slane %v288_v21, %v2407_v8  ;;  %272 = vrot.lane.b32.xlu0 %v270_v11, %s2262_s30  ;;  %v335_v25 = vpop.permute.xlu1 %334 }
  0xc6   : > { %v309_v23 = vpop.permute.xlu0 %308 }
  0xc7   : > { %v314_v26 = vcombine.low %v309_v23, %v311_v20  ;;  %v296_v27 = vcombine.high %v2540_v22, %v2261_v14 }
  0xc9   : > { %v2546_v28 = vrot.slane %v314_v26, %v2407_v8  ;;  %298 = vrot.lane.b32.xlu1 %v296_v27, %s2262_s30  ;;  %v380_v30 = vpop.permute.xlu1 %379 }
  0xca   : > { %v337_v29 = vpop.permute.xlu0 %336 }
  0xcb   : > { %v340_v31 = vcombine.low %v335_v25, %v337_v29  ;;  %v322_v32 = vcombine.high %v2546_v28, %v2261_v14 }
  0xcd   : > { %v2552_v33 = vrot.slane %v340_v31, %v2407_v8  ;;  %324 = vrot.lane.b32.xlu0 %v322_v32, %s2262_s30  ;;  %v408_v35 = vpop.permute.xlu1 %407 }
  0xce   : > { %v370_v34 = vpop.permute.xlu0 %369 }
  0xcf   : > { %v372_v36 = vsel %vm170_vm0, %v2439_v24, %v370_v34  ;;  %v348_v37 = vcombine.high %v2552_v33, %v2261_v14 }
  0xd0   : > { %1883 = vst.msk [vmem:[%s2529_s16 + $0x10] sm:$0x3] %vm172_vm1, %v372_v36 }
  0xd1   : > { %350 = vrot.lane.b32.xlu1 %v348_v37, %s2262_s30  ;;  %v432_v39 = vpop.permute.xlu1 %431 }
  0xd2   : > { %v382_v38 = vpop.permute.xlu0 %381 }
  0xd3   : > { %v385_v40 = vcombine.low %v380_v30, %v382_v38 }
  0xd5   : > { %v2563_v41 = vrot.slane %v385_v40, %v2407_v8  ;;  %v460_v44 = vpop.permute.xlu1 %459 }
  0xd6   : > { %v406_v43 = vpop.permute.xlu0 %405 }
  0xd7   : > { %v411_v45 = vcombine.low %v406_v43, %v408_v35  ;;  %v393_v46 = vcombine.high %v2563_v41, %v2261_v14 }
  0xd9   : > { %v2568_v24 = vrot.slane %v411_v45, %v2407_v8  ;;  %395 = vrot.lane.b32.xlu1 %v393_v46, %s2262_s30  ;;  %v484_v48 = vpop.permute.xlu1 %483  ;;  %v2135_v45 = vld [vmem:[%s2396_s4 + $0x6] ss:$16 sps:$4 sm:$0x33]  }
  0xda   : > { %v434_v47 = vpop.permute.xlu0 %433 }
  0xdb   : > { %v437_v49 = vcombine.low %v432_v39, %v434_v47  ;;  %v419_v50 = vcombine.high %v2568_v24, %v2261_v14 }
  0xdd   : > { %v2574_v51 = vrot.slane %v437_v49, %v2407_v8  ;;  %421 = vrot.lane.b32.xlu0 %v419_v50, %s2262_s30  ;;  %v512_v53 = vpop.permute.xlu1 %511 }
  0xde   : > { %v458_v52 = vpop.permute.xlu0 %457 }
  0xdf   : > { %v463_v54 = vcombine.low %v458_v52, %v460_v44  ;;  %v445_v55 = vcombine.high %v2574_v51, %v2261_v14  ;;  %v2643_v52 = vrot.slane %v2135_v45, %v2407_v8 }
  0xe1   : > { %v2580_v56 = vrot.slane %v463_v54, %v2407_v8  ;;  %447 = vrot.lane.b32.xlu1 %v445_v55, %s2262_s30  ;;  %v536_v58 = vpop.permute.xlu1 %535 }
  0xe2   : > { %v486_v57 = vpop.permute.xlu0 %485 }
  0xe3   : > { %v489_v59 = vcombine.low %v484_v48, %v486_v57  ;;  %v471_v60 = vcombine.high %v2580_v56, %v2261_v14 }
  0xe5   : > { %v2586_v62 = vrot.slane %v489_v59, %v2407_v8  ;;  %473 = vrot.lane.b32.xlu0 %v471_v60, %s2262_s30  ;;  %v581_v0 = vpop.permute.xlu1 %580  ;;  %v1933_v60 = vld [vmem:[%s2396_s4 + $0x16] sm:$0x3] }
  0xe6   : > { %v510_v63 = vpop.permute.xlu0 %509 }
  0xe7   : > { %v515_v1 = vcombine.low %v510_v63, %v512_v53  ;;  %v497_v3 = vcombine.high %v2586_v62, %v2261_v14  ;;  %v1932_v63 = vld [vmem:[%s2396_s4 + $0x6] sm:$0x3] }
  0xe9   : > { %v2592_v4 = vrot.slane %v515_v1, %v2407_v8  ;;  %499 = vrot.lane.b32.xlu1 %v497_v3, %s2262_s30  ;;  %v609_v6 = vpop.permute.xlu1 %608 }
  0xea   : > { %v538_v5 = vpop.permute.xlu0 %537 }
  0xeb   : > { %v541_v9 = vcombine.low %v536_v58, %v538_v5  ;;  %v523_v10 = vcombine.high %v2592_v4, %v2261_v14  ;;  %v769_v58 = vcombine.high %v2643_v52, %v2261_v14 }
  0xed   : > { %v2598_v12 = vrot.slane %v541_v9, %v2407_v8  ;;  %525 = vrot.lane.b32.xlu0 %v523_v10, %s2262_s30  ;;  %v633_v17 = vpop.permute.xlu1 %632 }
  0xee   : > { %v571_v13 = vpop.permute.xlu0 %570 }
  0xef   : > { %v573_v15 = vsel %vm170_vm0, %v2475_v42, %v571_v13  ;;  %v549_v16 = vcombine.high %v2598_v12, %v2261_v14 }
  0xf0   : > { %1907 = vst.msk [vmem:[%s2529_s16 + $0x20] sm:$0x3] %vm172_vm1, %v573_v15 }
  0xf1   : > { %551 = vrot.lane.b32.xlu1 %v549_v16, %s2262_s30  ;;  %v661_v23 = vpop.permute.xlu1 %660 }
  0xf2   : > { %v583_v19 = vpop.permute.xlu0 %582 }
  0xf3   : > { %v586_v20 = vcombine.low %v581_v0, %v583_v19  ;;  %v1935_v0 = vld [vmem:[%s2396_s4 + $0x6] sm:$0x3] }
  0xf5   : > { %v2609_v21 = vrot.slane %v586_v20, %v2407_v8  ;;  %v685_v31 = vpop.permute.xlu1 %684 }
  0xf6   : > { %v607_v11 = vpop.permute.xlu0 %606 }
  0xf7   : > { %v612_v25 = vcombine.low %v607_v11, %v609_v6  ;;  %v594_v26 = vcombine.high %v2609_v21, %v2261_v14 }
  0xf9   : > { %v2614_v42 = vrot.slane %v612_v25, %v2407_v8  ;;  %596 = vrot.lane.b32.xlu1 %v594_v26, %s2262_s30  ;;  %v713_v39 = vpop.permute.xlu1 %712 }
  0xfa   : > { %v635_v27 = vpop.permute.xlu0 %634 }
  0xfb   : > { %v638_v29 = vcombine.low %v633_v17, %v635_v27  ;;  %v620_v30 = vcombine.high %v2614_v42, %v2261_v14 }
  0xfd   : > { %v2620_v32 = vrot.slane %v638_v29, %v2407_v8  ;;  %622 = vrot.lane.b32.xlu0 %v620_v30, %s2262_s30  ;;  %v737_v49 = vpop.permute.xlu1 %736 }
  0xfe   : > { %v659_v34 = vpop.permute.xlu0 %658 }
  0xff   : > { %v664_v35 = vcombine.low %v659_v34, %v661_v23  ;;  %v646_v36 = vcombine.high %v2620_v32, %v2261_v14 }
 0x101   : > { %v2626_v37 = vrot.slane %v664_v35, %v2407_v8  ;;  %648 = vrot.lane.b32.xlu1 %v646_v36, %s2262_s30 }
 0x102   : > { %v687_v38 = vpop.permute.xlu0 %686 }
 0x103   : > { %v690_v40 = vcombine.low %v685_v31, %v687_v38  ;;  %v672_v43 = vcombine.high %v2626_v37, %v2261_v14 }
 0x105   : > { %v2632_v44 = vrot.slane %v690_v40, %v2407_v8  ;;  %674 = vrot.lane.b32.xlu0 %v672_v43, %s2262_s30 }
 0x106   : > { %v711_v46 = vpop.permute.xlu0 %710 }
 0x107   : > { %v716_v47 = vcombine.low %v711_v46, %v713_v39  ;;  %v698_v48 = vcombine.high %v2632_v44, %v2261_v14 }
 0x109   : > { %v2639_v50 = vrot.slane %v716_v47, %v2407_v8  ;;  %700 = vrot.lane.b32.xlu1 %v698_v48, %s2262_s30  ;;  %v1936_v48 = vld [vmem:[%s2396_s4 + $0x16] sm:$0x3] }
 0x10a   : > { %v739_v53 = vpop.permute.xlu0 %738 }
 0x10b   : > { %v742_v54 = vcombine.low %v737_v49, %v739_v53  ;;  %v724_v55 = vcombine.high %v2639_v50, %v2261_v14  ;;  %v1938_v49 = vld [vmem:[%s2396_s4 + $0x6] sm:$0x3] }
 0x10d   : > { %v2648_v57 = vrot.slane %v742_v54, %v2407_v8  ;;  %726 = vrot.lane.b32.xlu0 %v724_v55, %s2262_s30 }
 0x10f   : > { %v750_v59 = vcombine.high %v2648_v57, %v2261_v14 }
 0x111   : > { %771 = vrot.lane.b32.xlu0 %v769_v58, %s2262_s30  ;;  %752 = vrot.lane.b32.xlu1 %v750_v59, %s2262_s30  ;;  %v1939_v59 = vld [vmem:[%s2396_s4 + $0x16] sm:$0x3] }
 0x115   : > { %783 = vrot.lane.b32.xlu0 %v1933_v60, %s2258_s27  ;;  %781 = vrot.lane.b32.xlu1 %v1932_v63, %s2258_s27  ;;  %v1941_v60 = vld [vmem:[%s2396_s4 + $0x6] sm:$0x3] }
 0x119   : > { %807 = vrot.lane.b32.xlu0 %v1935_v0, %s2259_s18 }
 0x127   : > { %v195_v1 = vpop.permute.xlu1 %194 }
 0x128   : > { %v197_v3 = vsel %vm170_vm0, %v2510_v61, %v195_v1 }
 0x129   : > { %1874 = vst.msk [vmem:[%s2529_s16 + $0x2] sm:$0x3] %vm172_vm1, %v197_v3 }
 0x12b   : > { %v221_v5 = vpop.permute.xlu0 %220 }
 0x12c   : > { %v223_v6 = vsel %vm170_vm0, %v2515_v2, %v221_v5 }
 0x12d   : > { %1875 = vst.msk [vmem:[%s2529_s16 + $0x4] sm:$0x3] %vm172_vm1, %v223_v6 }
 0x12f   : > { %v247_v9 = vpop.permute.xlu1 %246 }
 0x130   : > { %v249_v10 = vsel %vm170_vm0, %v2522_v7, %v247_v9 }
 0x131   : > { %1876 = vst.msk [vmem:[%s2529_s16 + $0x6] sm:$0x3] %vm172_vm1, %v249_v10  ;;  %v1942_v10 = vld [vmem:[%s2396_s4 + $0x16] sm:$0x3] }
 0x137   : > { %v273_v13 = vpop.permute.xlu0 %272 }
 0x138   : > { %v275_v61 = vsel %vm170_vm0, %v2535_v18, %v273_v13  ;;  %v1944_v13 = vld [vmem:[%s2396_s4 + $0x6] sm:$0x3] }
 0x139   : > { %1877 = vst.msk [vmem:[%s2529_s16 + $0x8] sm:$0x3] %vm172_vm1, %v275_v61 }
 0x13b   : > { %v299_v15 = vpop.permute.xlu1 %298 }
 0x13c   : > { %v301_v2 = vsel %vm170_vm0, %v2540_v22, %v299_v15 }
 0x13d   : > { %1878 = vst.msk [vmem:[%s2529_s16 + $0xa] sm:$0x3] %vm172_vm1, %v301_v2 }
 0x13f   : > { %v325_v16 = vpop.permute.xlu0 %324 }
 0x140   : > { %v327_v7 = vsel %vm170_vm0, %v2546_v28, %v325_v16 }
 0x141   : > { %1879 = vst.msk [vmem:[%s2529_s16 + $0xc] sm:$0x3] %vm172_vm1, %v327_v7 }
 0x143   : > { %v351_v17 = vpop.permute.xlu1 %350 }
 0x144   : > { %v353_v18 = vsel %vm170_vm0, %v2552_v33, %v351_v17 }
 0x145   : > { %1880 = vst.msk [vmem:[%s2529_s16 + $0xe] sm:$0x3] %vm172_vm1, %v353_v18 }
 0x14b   : > { %v396_v19 = vpop.permute.xlu1 %395 }
 0x14c   : > { %v398_v22 = vsel %vm170_vm0, %v2563_v41, %v396_v19  ;;  %v1945_v19 = vld [vmem:[%s2396_s4 + $0x16] sm:$0x3] }
 0x14d   : > { %1886 = vst.msk [vmem:[%s2529_s16 + $0x12] sm:$0x3] %vm172_vm1, %v398_v22  ;;  %v1947_v22 = vld [vmem:[%s2396_s4 + $0x6] sm:$0x3] }
 0x14f   : > { %v422_v20 = vpop.permute.xlu0 %421 }
 0x150   : > { %v424_v28 = vsel %vm170_vm0, %v2568_v24, %v422_v20 }
 0x151   : > { %1889 = vst.msk [vmem:[%s2529_s16 + $0x14] sm:$0x3] %vm172_vm1, %v424_v28 }
 0x153   : > { %v448_v11 = vpop.permute.xlu1 %447 }
 0x154   : > { %v450_v33 = vsel %vm170_vm0, %v2574_v51, %v448_v11 }
 0x155   : > { %1892 = vst.msk [vmem:[%s2529_s16 + $0x16] sm:$0x3] %vm172_vm1, %v450_v33 }
 0x157   : > { %v474_v23 = vpop.permute.xlu0 %473 }
 0x158   : > { %v476_v41 = vsel %vm170_vm0, %v2580_v56, %v474_v23 }
 0x159   : > { %1895 = vst.msk [vmem:[%s2529_s16 + $0x18] sm:$0x3] %vm172_vm1, %v476_v41 }
 0x15b   : > { %v500_v25 = vpop.permute.xlu1 %499 }
 0x15c   : > { %v502_v24 = vsel %vm170_vm0, %v2586_v62, %v500_v25 }
 0x15d   : > { %1898 = vst.msk [vmem:[%s2529_s16 + $0x1a] sm:$0x3] %vm172_vm1, %v502_v24  ;;  %v1948_v24 = vld [vmem:[%s2396_s4 + $0x16] sm:$0x3] }
 0x15f   : > { %v526_v26 = vpop.permute.xlu0 %525 }
 0x160   : > { %v528_v51 = vsel %vm170_vm0, %v2592_v4, %v526_v26  ;;  %v1950_v26 = vld [vmem:[%s2396_s4 + $0x6] sm:$0x3] }
 0x161   : > { %1901 = vst.msk [vmem:[%s2529_s16 + $0x1c] sm:$0x3] %vm172_vm1, %v528_v51 }
 0x163   : > { %v552_v27 = vpop.permute.xlu1 %551 }
 0x164   : > { %v554_v56 = vsel %vm170_vm0, %v2598_v12, %v552_v27 }
 0x165   : > { %1904 = vst.msk [vmem:[%s2529_s16 + $0x1e] sm:$0x3] %vm172_vm1, %v554_v56 }
 0x16b   : > { %v597_v29 = vpop.permute.xlu1 %596 }
 0x16c   : > { %v599_v62 = vsel %vm170_vm0, %v2609_v21, %v597_v29 }
 0x16d   : > { %1910 = vst.msk [vmem:[%s2529_s16 + $0x22] sm:$0x3] %vm172_vm1, %v599_v62 }
 0x16f   : > { %v623_v30 = vpop.permute.xlu0 %622 }
 0x170   : > { %v625_v4 = vsel %vm170_vm0, %v2614_v42, %v623_v30 }
 0x171   : > { %1913 = vst.msk [vmem:[%s2529_s16 + $0x24] sm:$0x3] %vm172_vm1, %v625_v4  ;;  %v2136_v4 = vld [vmem:[%s2396_s4 + $0x8] ss:$16 sps:$4 sm:$0x33]  }
 0x173   : > { %v649_v31 = vpop.permute.xlu1 %648 }
 0x174   : > { %v651_v12 = vsel %vm170_vm0, %v2620_v32, %v649_v31 }
 0x175   : > { %1916 = vst.msk [vmem:[%s2529_s16 + $0x26] sm:$0x3] %vm172_vm1, %v651_v12  ;;  %v969_v12 = vrot.slane %v2136_v4, %v2407_v8 }
 0x177   : > { %v675_v34 = vpop.permute.xlu0 %674 }
 0x178   : > { %v677_v21 = vsel %vm170_vm0, %v2626_v37, %v675_v34  ;;  %v1951_v34 = vld [vmem:[%s2396_s4 + $0x16] sm:$0x3] }
 0x179   : > { %1919 = vst.msk [vmem:[%s2529_s16 + $0x28] sm:$0x3] %vm172_vm1, %v677_v21  ;;  %v970_v21 = vcombine.high %v969_v12, %v2261_v14 }
 0x17b   : > { %v701_v35 = vpop.permute.xlu1 %700 }
 0x17c   : > { %v703_v42 = vsel %vm170_vm0, %v2632_v44, %v701_v35  ;;  %v1957_v35 = vld [vmem:[%s2396_s4 + $0x18] sm:$0x3] }
 0x17d   : > { %1922 = vst.msk [vmem:[%s2529_s16 + $0x2a] sm:$0x3] %vm172_vm1, %v703_v42 }
 0x17f   : > { %v727_v36 = vpop.permute.xlu0 %726 }
 0x180   : > { %v729_v32 = vsel %vm170_vm0, %v2639_v50, %v727_v36 }
 0x181   : > { %1925 = vst.msk [vmem:[%s2529_s16 + $0x2c] sm:$0x3] %vm172_vm1, %v729_v32 }
 0x183   : > { %v753_v38 = vpop.permute.xlu1 %752  ;;  %v772_v39 = vpop.permute.xlu0 %771 }
 0x184   : > { %v755_v37 = vsel %vm170_vm0, %v2648_v57, %v753_v38  ;;  %v774_v40 = vsel %vm170_vm0, %v2643_v52, %v772_v39 }
 0x185   : > { %1928 = vst.msk [vmem:[%s2529_s16 + $0x2e] sm:$0x3] %vm172_vm1, %v755_v37  ;;  %1931 = vst.msk [vmem:[%s2529_s16 + $0x30] sm:$0x3] %vm172_vm1, %v774_v40 }
 0x187   : > { %v782_v43 = vpop.permute.xlu1 %781  ;;  %v784_v44 = vpop.permute.xlu0 %783 }
 0x188   : > { %v787_v45 = vcombine.low %v782_v43, %v784_v44  ;;  %v1959_v43 = vld [vmem:[%s2396_s4 + $0x8] sm:$0x3] }
 0x18a   : > { %v794_v46 = vrot.slane %v787_v45, %v2407_v8 }
 0x18b   : > { %v808_v53 = vpop.permute.xlu0 %807 }
 0x18c   : > { %v795_v47 = vcombine.high %v794_v46, %v2261_v14 }
 0x18e   : > { %797 = vrot.lane.b32.xlu1 %v795_v47, %s2262_s30 }
 0x192   : > { %809 = vrot.lane.b32.xlu1 %v1936_v48, %s2259_s18 }
 0x196   : > { %833 = vrot.lane.b32.xlu1 %v1938_v49, %s2260_s29 }
 0x200   : > { %v798_v50 = vpop.permute.xlu1 %797 }
 0x201   : > { %v800_v52 = vsel %vm170_vm0, %v794_v46, %v798_v50  ;;  %v1956_v46 = vld [vmem:[%s2396_s4 + $0x8] sm:$0x3] }
 0x202   : > { %1934 = vst.msk [vmem:[%s2529_s16 + $0x32] sm:$0x3] %vm172_vm1, %v800_v52 }
 0x204   : > { %v810_v54 = vpop.permute.xlu1 %809 }
 0x205   : > { %v813_v55 = vcombine.low %v808_v53, %v810_v54 }
 0x207   : > { %v820_v57 = vrot.slane %v813_v55, %v2407_v8  ;;  %v1960_v55 = vld [vmem:[%s2396_s4 + $0x18] sm:$0x3] }
 0x208   : > { %v834_v1 = vpop.permute.xlu1 %833 }
 0x209   : > { %v821_v58 = vcombine.high %v820_v57, %v2261_v14 }
 0x20b   : > { %823 = vrot.lane.b32.xlu0 %v821_v58, %s2262_s30 }
 0x20f   : > { %835 = vrot.lane.b32.xlu0 %v1939_v59, %s2260_s29 }
 0x213   : > { %859 = vrot.lane.b32.xlu0 %v1941_v60, %s2263_s2 }
 0x27d   : > { %v824_v63 = vpop.permute.xlu0 %823 }
 0x27e   : > { %v826_v0 = vsel %vm170_vm0, %v820_v57, %v824_v63  ;;  %v1962_v57 = vld [vmem:[%s2396_s4 + $0x8] sm:$0x3] }
 0x27f   : > { %1937 = vst.msk [vmem:[%s2529_s16 + $0x34] sm:$0x3] %vm172_vm1, %v826_v0 }
 0x281   : > { %v836_v3 = vpop.permute.xlu0 %835 }
 0x282   : > { %v839_v5 = vcombine.low %v834_v1, %v836_v3 }
 0x284   : > { %v846_v6 = vrot.slane %v839_v5, %v2407_v8  ;;  %v1963_v5 = vld [vmem:[%s2396_s4 + $0x18] sm:$0x3] }
 0x285   : > { %v860_v2 = vpop.permute.xlu0 %859 }
 0x286   : > { %v847_v9 = vcombine.high %v846_v6, %v2261_v14 }
 0x288   : > { %849 = vrot.lane.b32.xlu1 %v847_v9, %s2262_s30 }
 0x28c   : > { %861 = vrot.lane.b32.xlu1 %v1942_v10, %s2263_s2 }
 0x290   : > { %885 = vrot.lane.b32.xlu1 %v1944_v13, %s2264_s5 }
 0x2fa   : > { %v850_v61 = vpop.permute.xlu1 %849 }
 0x2fb   : > { %v852_v15 = vsel %vm170_vm0, %v846_v6, %v850_v61  ;;  %v1965_v6 = vld [vmem:[%s2396_s4 + $0x8] sm:$0x3] }
 0x2fc   : > { %1940 = vst.msk [vmem:[%s2529_s16 + $0x36] sm:$0x3] %vm172_vm1, %v852_v15 }
 0x2fe   : > { %v862_v16 = vpop.permute.xlu1 %861 }
 0x2ff   : > { %v865_v7 = vcombine.low %v860_v2, %v862_v16 }
 0x301   : > { %v872_v17 = vrot.slane %v865_v7, %v2407_v8  ;;  %v1966_v7 = vld [vmem:[%s2396_s4 + $0x18] sm:$0x3] }
 0x302   : > { %v886_v11 = vpop.permute.xlu1 %885 }
 0x303   : > { %v873_v18 = vcombine.high %v872_v17, %v2261_v14 }
 0x305   : > { %875 = vrot.lane.b32.xlu0 %v873_v18, %s2262_s30 }
 0x309   : > { %887 = vrot.lane.b32.xlu0 %v1945_v19, %s2264_s5 }
 0x30d   : > { %911 = vrot.lane.b32.xlu0 %v1947_v22, %s2265_s12 }
 0x377   : > { %v876_v20 = vpop.permute.xlu0 %875 }
 0x378   : > { %v878_v28 = vsel %vm170_vm0, %v872_v17, %v876_v20  ;;  %v1968_v17 = vld [vmem:[%s2396_s4 + $0x8] sm:$0x3] }
 0x379   : > { %1943 = vst.msk [vmem:[%s2529_s16 + $0x38] sm:$0x3] %vm172_vm1, %v878_v28 }
 0x37b   : > { %v888_v33 = vpop.permute.xlu0 %887 }
 0x37c   : > { %v891_v23 = vcombine.low %v886_v11, %v888_v33 }
 0x37e   : > { %v898_v41 = vrot.slane %v891_v23, %v2407_v8  ;;  %v1969_v23 = vld [vmem:[%s2396_s4 + $0x18] sm:$0x3] }
 0x37f   : > { %v912_v56 = vpop.permute.xlu0 %911 }
 0x380   : > { %v899_v25 = vcombine.high %v898_v41, %v2261_v14 }
 0x382   : > { %901 = vrot.lane.b32.xlu1 %v899_v25, %s2262_s30 }
 0x386   : > { %913 = vrot.lane.b32.xlu1 %v1948_v24, %s2265_s12 }
 0x38a   : > { %937 = vrot.lane.b32.xlu1 %v1950_v26, %s2266_s13 }
 0x3f4   : > { %v902_v51 = vpop.permute.xlu1 %901 }
 0x3f5   : > { %v904_v27 = vsel %vm170_vm0, %v898_v41, %v902_v51  ;;  %v1971_v41 = vld [vmem:[%s2396_s4 + $0x8] sm:$0x3] }
 0x3f6   : > { %1946 = vst.msk [vmem:[%s2529_s16 + $0x3a] sm:$0x3] %vm172_vm1, %v904_v27 }
 0x3f8   : > { %v914_v29 = vpop.permute.xlu1 %913 }
 0x3f9   : > { %v917_v62 = vcombine.low %v912_v56, %v914_v29 }
 0x3fb   : > { %v924_v30 = vrot.slane %v917_v62, %v2407_v8  ;;  %v1972_v62 = vld [vmem:[%s2396_s4 + $0x18] sm:$0x3] }
 0x3fc   : > { %v938_v32 = vpop.permute.xlu1 %937 }
 0x3fd   : > { %v925_v31 = vcombine.high %v924_v30, %v2261_v14 }
 0x3ff   : > { %927 = vrot.lane.b32.xlu0 %v925_v31, %s2262_s30 }
 0x403   : > { %939 = vrot.lane.b32.xlu0 %v1951_v34, %s2266_s13 }
 0x407   : > { %972 = vrot.lane.b32.xlu0 %v970_v21, %s2262_s30 }
 0x40b   : > { %984 = vrot.lane.b32.xlu0 %v1957_v35, %s2258_s27 }
 0x40f   : > { %1008 = vrot.lane.b32.xlu0 %v1959_v43, %s2259_s18 }
 0x471   : > { %v928_v42 = vpop.permute.xlu0 %927 }
 0x472   : > { %v930_v36 = vsel %vm170_vm0, %v924_v30, %v928_v42  ;;  %v1974_v30 = vld [vmem:[%s2396_s4 + $0x8] sm:$0x3]  ;;  %v2137_v42 = vld [vmem:[%s2396_s4 + $0xa] ss:$16 sps:$4 sm:$0x33]  }
 0x473   : > { %1949 = vst.msk [vmem:[%s2529_s16 + $0x3c] sm:$0x3] %vm172_vm1, %v930_v36 }
 0x475   : > { %v940_v38 = vpop.permute.xlu0 %939 }
 0x476   : > { %v943_v39 = vcombine.low %v938_v32, %v940_v38  ;;  %v1170_v32 = vrot.slane %v2137_v42, %v2407_v8  ;;  %v1975_v38 = vld [vmem:[%s2396_s4 + $0x18] sm:$0x3]  ;;  %v2047_v42 = vld [vmem:[%s2396_s4 + $0x1e] sm:$0x3] }
 0x478   : > { %v950_v37 = vrot.slane %v943_v39, %v2407_v8  ;;  %v1171_v39 = vcombine.high %v1170_v32, %v2261_v14 }
 0x479   : > { %v973_v40 = vpop.permute.xlu0 %972 }
 0x47a   : > { %v951_v44 = vcombine.high %v950_v37, %v2261_v14  ;;  %v975_v45 = vsel %vm170_vm0, %v969_v12, %v973_v40 }
 0x47b   : > { %1955 = vst.msk [vmem:[%s2529_s16 + $0x40] sm:$0x3] %vm172_vm1, %v975_v45 }
 0x47c   : > { %953 = vrot.lane.b32.xlu1 %v951_v44, %s2262_s30 }
 0x47d   : > { %v985_v49 = vpop.permute.xlu0 %984 }
 0x480   : > { %982 = vrot.lane.b32.xlu1 %v1956_v46, %s2258_s27 }
 0x481   : > { %v1009_v60 = vpop.permute.xlu0 %1008 }
 0x4ee   : > { %v954_v47 = vpop.permute.xlu1 %953 }
 0x4ef   : > { %v956_v48 = vsel %vm170_vm0, %v950_v37, %v954_v47  ;;  %v1981_v37 = vld [vmem:[%s2396_s4 + $0x1a] sm:$0x3] }
 0x4f0   : > { %1952 = vst.msk [vmem:[%s2529_s16 + $0x3e] sm:$0x3] %vm172_vm1, %v956_v48 }
 0x4f2   : > { %v983_v50 = vpop.permute.xlu1 %982 }
 0x4f3   : > { %v988_v52 = vcombine.low %v983_v50, %v985_v49  ;;  %v1983_v49 = vld [vmem:[%s2396_s4 + $0xa] sm:$0x3] }
 0x4f5   : > { %v995_v53 = vrot.slane %v988_v52, %v2407_v8 }
 0x4f7   : > { %v996_v54 = vcombine.high %v995_v53, %v2261_v14 }
 0x4f9   : > { %998 = vrot.lane.b32.xlu1 %v996_v54, %s2262_s30  ;;  %v1986_v54 = vld [vmem:[%s2396_s4 + $0xa] sm:$0x3] }
 0x4fd   : > { %1010 = vrot.lane.b32.xlu1 %v1960_v55, %s2259_s18  ;;  %v1989_v55 = vld [vmem:[%s2396_s4 + $0xa] sm:$0x3] }
 0x501   : > { %1034 = vrot.lane.b32.xlu1 %v1962_v57, %s2260_s29  ;;  %v1992_v57 = vld [vmem:[%s2396_s4 + $0xa] sm:$0x3] }
 0x56b   : > { %v999_v58 = vpop.permute.xlu1 %998 }
 0x56c   : > { %v1001_v59 = vsel %vm170_vm0, %v995_v53, %v999_v58  ;;  %v1980_v53 = vld [vmem:[%s2396_s4 + $0xa] sm:$0x3] }
 0x56d   : > { %1958 = vst.msk [vmem:[%s2529_s16 + $0x42] sm:$0x3] %vm172_vm1, %v1001_v59  ;;  %v1995_v58 = vld [vmem:[%s2396_s4 + $0xa] sm:$0x3] }
 0x56e   : > { %v1998_v59 = vld [vmem:[%s2396_s4 + $0xa] sm:$0x3] }
 0x56f   : > { %v1011_v63 = vpop.permute.xlu1 %1010 }
 0x570   : > { %v1014_v0 = vcombine.low %v1009_v60, %v1011_v63  ;;  %v2004_v60 = vld [vmem:[%s2396_s4 + $0xc] sm:$0x3] }
 0x571   : > { %v2007_v63 = vld [vmem:[%s2396_s4 + $0xc] sm:$0x3] }
 0x572   : > { %v1021_v1 = vrot.slane %v1014_v0, %v2407_v8  ;;  %v2010_v0 = vld [vmem:[%s2396_s4 + $0xc] sm:$0x3] }
 0x573   : > { %v1035_v13 = vpop.permute.xlu1 %1034 }
 0x574   : > { %v1022_v3 = vcombine.high %v1021_v1, %v2261_v14 }
 0x576   : > { %1024 = vrot.lane.b32.xlu0 %v1022_v3, %s2262_s30  ;;  %v2016_v3 = vld [vmem:[%s2396_s4 + $0xc] sm:$0x3] }
 0x57a   : > { %1036 = vrot.lane.b32.xlu0 %v1963_v5, %s2260_s29  ;;  %v2019_v5 = vld [vmem:[%s2396_s4 + $0xc] sm:$0x3] }
 0x57e   : > { %1060 = vrot.lane.b32.xlu0 %v1965_v6, %s2263_s2  ;;  %v2022_v6 = vld [vmem:[%s2396_s4 + $0xc] sm:$0x3] }
 0x5e8   : > { %v1025_v9 = vpop.permute.xlu0 %1024 }
 0x5e9   : > { %v1027_v10 = vsel %vm170_vm0, %v1021_v1, %v1025_v9  ;;  %v2013_v1 = vld [vmem:[%s2396_s4 + $0xc] sm:$0x3]  ;;  %v2028_v9 = vld [vmem:[%s2396_s4 + $0xe] sm:$0x3] }
 0x5ea   : > { %1961 = vst.msk [vmem:[%s2529_s16 + $0x44] sm:$0x3] %vm172_vm1, %v1027_v10  ;;  %v2031_v10 = vld [vmem:[%s2396_s4 + $0xe] sm:$0x3] }
 0x5ec   : > { %v1037_v61 = vpop.permute.xlu0 %1036 }
 0x5ed   : > { %v1040_v15 = vcombine.low %v1035_v13, %v1037_v61  ;;  %v2034_v13 = vld [vmem:[%s2396_s4 + $0xe] sm:$0x3] }
 0x5ee   : > { %v2037_v61 = vld [vmem:[%s2396_s4 + $0xe] sm:$0x3] }
 0x5ef   : > { %v1047_v2 = vrot.slane %v1040_v15, %v2407_v8  ;;  %v2040_v15 = vld [vmem:[%s2396_s4 + $0xe] sm:$0x3] }
 0x5f0   : > { %v1061_v22 = vpop.permute.xlu0 %1060 }
 0x5f1   : > { %v1048_v16 = vcombine.high %v1047_v2, %v2261_v14 }
 0x5f3   : > { %1050 = vrot.lane.b32.xlu1 %v1048_v16, %s2262_s30  ;;  %v2046_v16 = vld [vmem:[%s2396_s4 + $0xe] sm:$0x3] }
 0x5f7   : > { %1062 = vrot.lane.b32.xlu1 %v1966_v7, %s2263_s2 }
 0x5fb   : > { %1086 = vrot.lane.b32.xlu1 %v1968_v17, %s2264_s5 }
 0x665   : > { %v1051_v18 = vpop.permute.xlu1 %1050 }
 0x666   : > { %v1053_v19 = vsel %vm170_vm0, %v1047_v2, %v1051_v18  ;;  %v2043_v2 = vld [vmem:[%s2396_s4 + $0xe] sm:$0x3] }
 0x667   : > { %1964 = vst.msk [vmem:[%s2529_s16 + $0x46] sm:$0x3] %vm172_vm1, %v1053_v19 }
 0x669   : > { %v1063_v20 = vpop.permute.xlu1 %1062 }
 0x66a   : > { %v1066_v28 = vcombine.low %v1061_v22, %v1063_v20 }
 0x66c   : > { %v1073_v11 = vrot.slane %v1066_v28, %v2407_v8 }
 0x66d   : > { %v1087_v26 = vpop.permute.xlu1 %1086 }
 0x66e   : > { %v1074_v33 = vcombine.high %v1073_v11, %v2261_v14 }
 0x670   : > { %1076 = vrot.lane.b32.xlu0 %v1074_v33, %s2262_s30  ;;  %v1987_v33 = vld [vmem:[%s2396_s4 + $0x1a] sm:$0x3] }
 0x674   : > { %1088 = vrot.lane.b32.xlu0 %v1969_v23, %s2264_s5  ;;  %v1990_v23 = vld [vmem:[%s2396_s4 + $0x1a] sm:$0x3] }
 0x678   : > { %1112 = vrot.lane.b32.xlu0 %v1971_v41, %s2265_s12  ;;  %v1993_v41 = vld [vmem:[%s2396_s4 + $0x1a] sm:$0x3] }
 0x6e2   : > { %v1077_v25 = vpop.permute.xlu0 %1076 }
 0x6e3   : > { %v1079_v24 = vsel %vm170_vm0, %v1073_v11, %v1077_v25  ;;  %v1984_v11 = vld [vmem:[%s2396_s4 + $0x1a] sm:$0x3] }
 0x6e4   : > { %1967 = vst.msk [vmem:[%s2529_s16 + $0x48] sm:$0x3] %vm172_vm1, %v1079_v24  ;;  %v1996_v25 = vld [vmem:[%s2396_s4 + $0x1a] sm:$0x3] }
 0x6e5   : > { %v1999_v24 = vld [vmem:[%s2396_s4 + $0x1a] sm:$0x3] }
 0x6e6   : > { %v1089_v51 = vpop.permute.xlu0 %1088 }
 0x6e7   : > { %v1092_v27 = vcombine.low %v1087_v26, %v1089_v51  ;;  %v2005_v26 = vld [vmem:[%s2396_s4 + $0x1c] sm:$0x3] }
 0x6e8   : > { %v2008_v51 = vld [vmem:[%s2396_s4 + $0x1c] sm:$0x3] }
 0x6e9   : > { %v1099_v56 = vrot.slane %v1092_v27, %v2407_v8  ;;  %v2011_v27 = vld [vmem:[%s2396_s4 + $0x1c] sm:$0x3] }
 0x6ea   : > { %v1113_v12 = vpop.permute.xlu0 %1112 }
 0x6eb   : > { %v1100_v29 = vcombine.high %v1099_v56, %v2261_v14 }
 0x6ed   : > { %1102 = vrot.lane.b32.xlu1 %v1100_v29, %s2262_s30  ;;  %v2017_v29 = vld [vmem:[%s2396_s4 + $0x1c] sm:$0x3] }
 0x6f1   : > { %1114 = vrot.lane.b32.xlu1 %v1972_v62, %s2265_s12  ;;  %v2020_v62 = vld [vmem:[%s2396_s4 + $0x1c] sm:$0x3] }
 0x6f5   : > { %1138 = vrot.lane.b32.xlu1 %v1974_v30, %s2266_s13  ;;  %v2023_v30 = vld [vmem:[%s2396_s4 + $0x1c] sm:$0x3] }
 0x75f   : > { %v1103_v4 = vpop.permute.xlu1 %1102 }
 0x760   : > { %v1105_v31 = vsel %vm170_vm0, %v1099_v56, %v1103_v4  ;;  %v2014_v56 = vld [vmem:[%s2396_s4 + $0x1c] sm:$0x3]  ;;  %v2029_v4 = vld [vmem:[%s2396_s4 + $0x1e] sm:$0x3] }
 0x761   : > { %1970 = vst.msk [vmem:[%s2529_s16 + $0x4a] sm:$0x3] %vm172_vm1, %v1105_v31  ;;  %v2032_v31 = vld [vmem:[%s2396_s4 + $0x1e] sm:$0x3] }
 0x763   : > { %v1115_v34 = vpop.permute.xlu1 %1114 }
 0x764   : > { %v1118_v21 = vcombine.low %v1113_v12, %v1115_v34  ;;  %v2035_v12 = vld [vmem:[%s2396_s4 + $0x1e] sm:$0x3] }
 0x765   : > { %v2038_v34 = vld [vmem:[%s2396_s4 + $0x1e] sm:$0x3] }
 0x766   : > { %v1125_v35 = vrot.slane %v1118_v21, %v2407_v8  ;;  %v2041_v21 = vld [vmem:[%s2396_s4 + $0x1e] sm:$0x3] }
 0x767   : > { %v1139_v44 = vpop.permute.xlu1 %1138 }
 0x768   : > { %v1126_v36 = vcombine.high %v1125_v35, %v2261_v14 }
 0x76a   : > { %1128 = vrot.lane.b32.xlu0 %v1126_v36, %s2262_s30 }
 0x76e   : > { %1140 = vrot.lane.b32.xlu0 %v1975_v38, %s2266_s13 }
 0x772   : > { %1173 = vrot.lane.b32.xlu0 %v1171_v39, %s2262_s30 }
 0x776   : > { %1185 = vrot.lane.b32.xlu0 %v1981_v37, %s2258_s27 }
 0x77a   : > { %1209 = vrot.lane.b32.xlu0 %v1983_v49, %s2259_s18 }
 0x77e   : > { %1235 = vrot.lane.b32.xlu0 %v1986_v54, %s2260_s29 }
 0x782   : > { %1261 = vrot.lane.b32.xlu0 %v1989_v55, %s2263_s2 }
 0x786   : > { %1287 = vrot.lane.b32.xlu0 %v1992_v57, %s2264_s5 }
 0x78a   : > { %1313 = vrot.lane.b32.xlu0 %v1995_v58, %s2265_s12 }
 0x78e   : > { %1339 = vrot.lane.b32.xlu0 %v1998_v59, %s2266_s13 }
 0x792   : > { %1384 = vrot.lane.b32.xlu0 %v2004_v60, %s2258_s27 }
 0x796   : > { %1410 = vrot.lane.b32.xlu0 %v2007_v63, %s2259_s18 }
 0x79a   : > { %1436 = vrot.lane.b32.xlu0 %v2010_v0, %s2260_s29 }
 0x79e   : > { %1462 = vrot.lane.b32.xlu0 %v2013_v1, %s2263_s2 }
 0x7a2   : > { %1488 = vrot.lane.b32.xlu0 %v2016_v3, %s2264_s5 }
 0x7a6   : > { %1514 = vrot.lane.b32.xlu0 %v2019_v5, %s2265_s12 }
 0x7aa   : > { %1540 = vrot.lane.b32.xlu0 %v2022_v6, %s2266_s13  ;;  %v2138_v6 = vld [vmem:[%s2396_s4 + $0xc] ss:$16 sps:$4 sm:$0x33]  }
 0x7ae   : > { %1585 = vrot.lane.b32.xlu0 %v2028_v9, %s2258_s27 }
 0x7b2   : > { %1611 = vrot.lane.b32.xlu0 %v2031_v10, %s2259_s18 }
 0x7b6   : > { %1637 = vrot.lane.b32.xlu0 %v2034_v13, %s2260_s29 }
 0x7ba   : > { %1663 = vrot.lane.b32.xlu0 %v2037_v61, %s2263_s2 }
 0x7be   : > { %1689 = vrot.lane.b32.xlu0 %v2040_v15, %s2264_s5  ;;  %v3018_v15 = vrot.slane %v2138_v6, %v2407_v8 }
 0x7c2   : > { %1715 = vrot.lane.b32.xlu0 %v2043_v2, %s2265_s12 }
 0x7c6   : > { %1741 = vrot.lane.b32.xlu0 %v2046_v16, %s2266_s13 }
 0x7dc   : > { %v1129_v40 = vpop.permute.xlu0 %1128 }
 0x7dd   : > { %v1131_v43 = vsel %vm170_vm0, %v1125_v35, %v1129_v40  ;;  %v2044_v35 = vld [vmem:[%s2396_s4 + $0x1e] sm:$0x3] }
 0x7de   : > { %1973 = vst.msk [vmem:[%s2529_s16 + $0x4c] sm:$0x3] %vm172_vm1, %v1131_v43 }
 0x7e0   : > { %v1141_v45 = vpop.permute.xlu0 %1140 }
 0x7e1   : > { %v1144_v46 = vcombine.low %v1139_v44, %v1141_v45 }
 0x7e3   : > { %v1151_v47 = vrot.slane %v1144_v46, %v2407_v8 }
 0x7e4   : > { %v1174_v48 = vpop.permute.xlu0 %1173 }
 0x7e5   : > { %v1152_v50 = vcombine.high %v1151_v47, %v2261_v14  ;;  %v1176_v52 = vsel %vm170_vm0, %v1170_v32, %v1174_v48 }
 0x7e6   : > { %1979 = vst.msk [vmem:[%s2529_s16 + $0x50] sm:$0x3] %vm172_vm1, %v1176_v52 }
 0x7e7   : > { %1154 = vrot.lane.b32.xlu1 %v1152_v50, %s2262_s30 }
 0x7e8   : > { %v1186_v18 = vpop.permute.xlu0 %1185 }
 0x7eb   : > { %1183 = vrot.lane.b32.xlu1 %v1980_v53, %s2258_s27 }
 0x7ec   : > { %v1210_v36 = vpop.permute.xlu0 %1209 }
 0x7f0   : > { %v1236_v32 = vpop.permute.xlu0 %1235 }
 0x7f4   : > { %v1262_v38 = vpop.permute.xlu0 %1261 }
 0x7f8   : > { %v1288_v39 = vpop.permute.xlu0 %1287 }
 0x7fc   : > { %v1314_v37 = vpop.permute.xlu0 %1313 }
 0x800   : > { %v1340_v40 = vpop.permute.xlu0 %1339 }
 0x804   : > { %v1385_v44 = vpop.permute.xlu0 %1384 }
 0x808   : > { %v1411_v48 = vpop.permute.xlu0 %1410 }
 0x80c   : > { %v1437_v57 = vpop.permute.xlu0 %1436 }
 0x810   : > { %v1463_v3 = vpop.permute.xlu0 %1462 }
 0x814   : > { %v1489_v16 = vpop.permute.xlu0 %1488 }
 0x859   : > { %v1155_v7 = vpop.permute.xlu1 %1154 }
 0x85a   : > { %v1157_v17 = vsel %vm170_vm0, %v1151_v47, %v1155_v7 }
 0x85b   : > { %1976 = vst.msk [vmem:[%s2529_s16 + $0x4e] sm:$0x3] %vm172_vm1, %v1157_v17 }
 0x85d   : > { %v1184_v19 = vpop.permute.xlu1 %1183 }
 0x85e   : > { %v1189_v22 = vcombine.low %v1184_v19, %v1186_v18  ;;  %v1372_v19 = vcombine.high %v3018_v15, %v2261_v14 }
 0x860   : > { %v1196_v20 = vrot.slane %v1189_v22, %v2407_v8 }
 0x862   : > { %v1197_v28 = vcombine.high %v1196_v20, %v2261_v14 }
 0x864   : > { %1199 = vrot.lane.b32.xlu1 %v1197_v28, %s2262_s30 }
 0x868   : > { %1211 = vrot.lane.b32.xlu1 %v1984_v11, %s2259_s18  ;;  %v1515_v11 = vpop.permute.xlu0 %1514 }
 0x86c   : > { %1237 = vrot.lane.b32.xlu1 %v1987_v33, %s2260_s29 }
 0x870   : > { %1263 = vrot.lane.b32.xlu1 %v1990_v23, %s2263_s2 }
 0x874   : > { %1289 = vrot.lane.b32.xlu1 %v1993_v41, %s2264_s5 }
 0x878   : > { %1315 = vrot.lane.b32.xlu1 %v1996_v25, %s2265_s12 }
 0x87c   : > { %1341 = vrot.lane.b32.xlu1 %v1999_v24, %s2266_s13 }
 0x880   : > { %1386 = vrot.lane.b32.xlu1 %v2005_v26, %s2258_s27 }
 0x884   : > { %1412 = vrot.lane.b32.xlu1 %v2008_v51, %s2259_s18  ;;  %v1541_v51 = vpop.permute.xlu0 %1540 }
 0x888   : > { %1438 = vrot.lane.b32.xlu1 %v2011_v27, %s2260_s29 }
 0x88c   : > { %1464 = vrot.lane.b32.xlu1 %v2014_v56, %s2263_s2 }
 0x890   : > { %1490 = vrot.lane.b32.xlu1 %v2017_v29, %s2264_s5 }
 0x894   : > { %1516 = vrot.lane.b32.xlu1 %v2020_v62, %s2265_s12 }
 0x898   : > { %1542 = vrot.lane.b32.xlu1 %v2023_v30, %s2266_s13 }
 0x89c   : > { %1587 = vrot.lane.b32.xlu1 %v2029_v4, %s2258_s27 }
 0x8a0   : > { %1613 = vrot.lane.b32.xlu1 %v2032_v31, %s2259_s18  ;;  %v1586_v31 = vpop.permute.xlu0 %1585 }
 0x8a4   : > { %1639 = vrot.lane.b32.xlu1 %v2035_v12, %s2260_s29 }
 0x8a8   : > { %1665 = vrot.lane.b32.xlu1 %v2038_v34, %s2263_s2 }
 0x8ac   : > { %1691 = vrot.lane.b32.xlu1 %v2041_v21, %s2264_s5 }
 0x8b0   : > { %1717 = vrot.lane.b32.xlu1 %v2044_v35, %s2265_s12 }
 0x8b4   : > { %1743 = vrot.lane.b32.xlu1 %v2047_v42, %s2266_s13 }
 0x8d6   : > { %v1200_v43 = vpop.permute.xlu1 %1199 }
 0x8d7   : > { %v1202_v45 = vsel %vm170_vm0, %v1196_v20, %v1200_v43 }
 0x8d8   : > { %1982 = vst.msk [vmem:[%s2529_s16 + $0x52] sm:$0x3] %vm172_vm1, %v1202_v45 }
 0x8da   : > { %v1212_v46 = vpop.permute.xlu1 %1211 }
 0x8db   : > { %v1215_v47 = vcombine.low %v1210_v36, %v1212_v46  ;;  %v2139_v36 = vld [vmem:[%s2396_s4 + $0xe] ss:$16 sps:$4 sm:$0x33]   ;;  %s2174_s4 = sshll.u32 %s2267_s3, 4  ;;  %s2175_s4 = int_to_ptr.vmem [resolvable:$false] %s2174_s4 }
 0x8dc   : > { %v3067_v43 = vrot.slane %v2139_v36, %v2407_v8  ;;  %s2176_s27 = scalar_lea.vmem %s2175_s4, 4096  ;;  %p2177_p6 = scmp.lt.s32.totalorder %s3214_s22, %s2175_s4 }
 0x8dd   : > { %v2990_v49 = vrot.slane %v1215_v47, %v2407_v8  ;;  %p2178_p13 = scmp.lt.s32.totalorder %s2176_s27, %s2170_s28 }
 0x8de   : > { %v1238_v50 = vpop.permute.xlu1 %1237 }
 0x8df   : > { %v1223_v52 = vcombine.high %v2990_v49, %v2261_v14  ;;  %v1241_v53 = vcombine.low %v1236_v32, %v1238_v50  ;;  %v1573_v50 = vcombine.high %v3067_v43, %v2261_v14  ;;  %p2179_p2 = por %p2178_p13, %p2177_p6 }
 0x8e1   : > { %v2995_v54 = vrot.slane %v1241_v53, %v2407_v8  ;;  %1225 = vrot.lane.b32.xlu0 %v1223_v52, %s2262_s30  ;;  %p2180_p5 = pnand %p2179_p2, %p2173_p0 }
 0x8e2   : > { %v1264_v55 = vpop.permute.xlu1 %1263 }
 0x8e3   : > { %v1249_v58 = vcombine.high %v2995_v54, %v2261_v14  ;;  %v1267_v59 = vcombine.low %v1262_v38, %v1264_v55  ;;  %v1612_v38 = vpop.permute.xlu0 %1611 }
 0x8e5   : > { %v3001_v60 = vrot.slane %v1267_v59, %v2407_v8  ;;  %1251 = vrot.lane.b32.xlu1 %v1249_v58, %s2262_s30 }
 0x8e6   : > { %v1290_v63 = vpop.permute.xlu1 %1289 }
 0x8e7   : > { %v1275_v0 = vcombine.high %v3001_v60, %v2261_v14  ;;  %v1293_v1 = vcombine.low %v1288_v39, %v1290_v63  ;;  %v1638_v47 = vpop.permute.xlu0 %1637 }
 0x8e9   : > { %v3007_v5 = vrot.slane %v1293_v1, %v2407_v8  ;;  %1277 = vrot.lane.b32.xlu0 %v1275_v0, %s2262_s30 }
 0x8ea   : > { %v1316_v9 = vpop.permute.xlu1 %1315 }
 0x8eb   : > { %v1301_v10 = vcombine.high %v3007_v5, %v2261_v14  ;;  %v1319_v13 = vcombine.low %v1314_v37, %v1316_v9  ;;  %v1664_v59 = vpop.permute.xlu0 %1663 }
 0x8ed   : > { %v3014_v61 = vrot.slane %v1319_v13, %v2407_v8  ;;  %1303 = vrot.lane.b32.xlu1 %v1301_v10, %s2262_s30 }
 0x8ee   : > { %v1342_v2 = vpop.permute.xlu1 %1341 }
 0x8ef   : > { %v1327_v7 = vcombine.high %v3014_v61, %v2261_v14  ;;  %v1345_v17 = vcombine.low %v1340_v40, %v1342_v2  ;;  %v1690_v10 = vpop.permute.xlu0 %1689 }
 0x8f1   : > { %v3023_v18 = vrot.slane %v1345_v17, %v2407_v8  ;;  %1329 = vrot.lane.b32.xlu0 %v1327_v7, %s2262_s30 }
 0x8f2   : > { %v1387_v22 = vpop.permute.xlu1 %1386 }
 0x8f3   : > { %v1353_v20 = vcombine.high %v3023_v18, %v2261_v14  ;;  %v1390_v28 = vcombine.low %v1385_v44, %v1387_v22  ;;  %v1716_v22 = vpop.permute.xlu0 %1715 }
 0x8f5   : > { %v3031_v33 = vrot.slane %v1390_v28, %v2407_v8  ;;  %1355 = vrot.lane.b32.xlu1 %v1353_v20, %s2262_s30  ;;  %1374 = vrot.lane.b32.xlu0 %v1372_v19, %s2262_s30 }
 0x8f6   : > { %v1413_v23 = vpop.permute.xlu1 %1412 }
 0x8f7   : > { %v1398_v41 = vcombine.high %v3031_v33, %v2261_v14  ;;  %v1416_v25 = vcombine.low %v1411_v48, %v1413_v23 }
 0x8f9   : > { %v3038_v24 = vrot.slane %v1416_v25, %v2407_v8  ;;  %1400 = vrot.lane.b32.xlu1 %v1398_v41, %s2262_s30 }
 0x8fa   : > { %v1439_v26 = vpop.permute.xlu1 %1438 }
 0x8fb   : > { %v1424_v27 = vcombine.high %v3038_v24, %v2261_v14  ;;  %v1442_v56 = vcombine.low %v1437_v57, %v1439_v26  ;;  %v1742_v26 = vpop.permute.xlu0 %1741 }
 0x8fd   : > { %v3044_v29 = vrot.slane %v1442_v56, %v2407_v8  ;;  %1426 = vrot.lane.b32.xlu0 %v1424_v27, %s2262_s30 }
 0x8fe   : > { %v1465_v62 = vpop.permute.xlu1 %1464 }
 0x8ff   : > { %v1450_v30 = vcombine.high %v3044_v29, %v2261_v14  ;;  %v1468_v4 = vcombine.low %v1463_v3, %v1465_v62 }
 0x901   : > { %v3050_v12 = vrot.slane %v1468_v4, %v2407_v8  ;;  %1452 = vrot.lane.b32.xlu1 %v1450_v30, %s2262_s30 }
 0x902   : > { %v1491_v34 = vpop.permute.xlu1 %1490 }
 0x903   : > { %v1476_v21 = vcombine.high %v3050_v12, %v2261_v14  ;;  %v1494_v35 = vcombine.low %v1489_v16, %v1491_v34 }
 0x905   : > { %v3056_v42 = vrot.slane %v1494_v35, %v2407_v8  ;;  %1478 = vrot.lane.b32.xlu0 %v1476_v21, %s2262_s30 }
 0x906   : > { %v1517_v32 = vpop.permute.xlu1 %1516 }
 0x907   : > { %v1502_v39 = vcombine.high %v3056_v42, %v2261_v14  ;;  %v1520_v37 = vcombine.low %v1515_v11, %v1517_v32 }
 0x909   : > { %v3063_v40 = vrot.slane %v1520_v37, %v2407_v8  ;;  %1504 = vrot.lane.b32.xlu1 %v1502_v39, %s2262_s30 }
 0x90a   : > { %v1543_v44 = vpop.permute.xlu1 %1542 }
 0x90b   : > { %v1528_v45 = vcombine.high %v3063_v40, %v2261_v14  ;;  %v1546_v46 = vcombine.low %v1541_v51, %v1543_v44 }
 0x90d   : > { %v3072_v48 = vrot.slane %v1546_v46, %v2407_v8  ;;  %1530 = vrot.lane.b32.xlu0 %v1528_v45, %s2262_s30 }
 0x90e   : > { %v1588_v52 = vpop.permute.xlu1 %1587 }
 0x90f   : > { %v1554_v53 = vcombine.high %v3072_v48, %v2261_v14  ;;  %v1591_v55 = vcombine.low %v1586_v31, %v1588_v52 }
 0x911   : > { %v3080_v57 = vrot.slane %v1591_v55, %v2407_v8  ;;  %1556 = vrot.lane.b32.xlu1 %v1554_v53, %s2262_s30  ;;  %1575 = vrot.lane.b32.xlu0 %v1573_v50, %s2262_s30 }
 0x912   : > { %v1614_v58 = vpop.permute.xlu1 %1613 }
 0x913   : > { %v1599_v63 = vcombine.high %v3080_v57, %v2261_v14  ;;  %v1617_v0 = vcombine.low %v1612_v38, %v1614_v58 }
 0x915   : > { %v3087_v1 = vrot.slane %v1617_v0, %v2407_v8  ;;  %1601 = vrot.lane.b32.xlu1 %v1599_v63, %s2262_s30 }
 0x916   : > { %v1640_v3 = vpop.permute.xlu1 %1639 }
 0x917   : > { %v1625_v6 = vcombine.high %v3087_v1, %v2261_v14  ;;  %v1643_v9 = vcombine.low %v1638_v47, %v1640_v3 }
 0x919   : > { %v3093_v13 = vrot.slane %v1643_v9, %v2407_v8  ;;  %1627 = vrot.lane.b32.xlu0 %v1625_v6, %s2262_s30 }
 0x91a   : > { %v1666_v2 = vpop.permute.xlu1 %1665 }
 0x91b   : > { %v1651_v16 = vcombine.high %v3093_v13, %v2261_v14  ;;  %v1669_v7 = vcombine.low %v1664_v59, %v1666_v2 }
 0x91d   : > { %v3099_v17 = vrot.slane %v1669_v7, %v2407_v8  ;;  %1653 = vrot.lane.b32.xlu1 %v1651_v16, %s2262_s30 }
 0x91e   : > { %v1692_v19 = vpop.permute.xlu1 %1691 }
 0x91f   : > { %v1677_v20 = vcombine.high %v3099_v17, %v2261_v14  ;;  %v1695_v28 = vcombine.low %v1690_v10, %v1692_v19 }
 0x921   : > { %v3105_v11 = vrot.slane %v1695_v28, %v2407_v8  ;;  %1679 = vrot.lane.b32.xlu0 %v1677_v20, %s2262_s30 }
 0x922   : > { %v1718_v23 = vpop.permute.xlu1 %1717 }
 0x923   : > { %v1703_v41 = vcombine.high %v3105_v11, %v2261_v14  ;;  %v1721_v25 = vcombine.low %v1716_v22, %v1718_v23 }
 0x925   : > { %v3111_v51 = vrot.slane %v1721_v25, %v2407_v8  ;;  %1705 = vrot.lane.b32.xlu1 %v1703_v41, %s2262_s30 }
 0x926   : > { %v1744_v27 = vpop.permute.xlu1 %1743 }
 0x927   : > { %v1729_v56 = vcombine.high %v3111_v51, %v2261_v14  ;;  %v1747_v62 = vcombine.low %v1742_v26, %v1744_v27 }
 0x929   : > { %v3117_v30 = vrot.slane %v1747_v62, %v2407_v8  ;;  %1731 = vrot.lane.b32.xlu0 %v1729_v56, %s2262_s30 }
 0x92b   : > { %v1755_v4 = vcombine.high %v3117_v30, %v2261_v14 }
 0x92d   : > { %1757 = vrot.lane.b32.xlu1 %v1755_v4, %s2262_s30 }
 0x953   : > { %v1226_v31 = vpop.permute.xlu0 %1225 }
 0x954   : > { %v1228_v34 = vsel %vm170_vm0, %v2990_v49, %v1226_v31 }
 0x955   : > { %1985 = vst.msk [vmem:[%s2529_s16 + $0x54] sm:$0x3] %vm172_vm1, %v1228_v34 }
 0x957   : > { %v1252_v21 = vpop.permute.xlu1 %1251 }
 0x958   : > { %v1254_v8 = vsel %vm170_vm0, %v2995_v54, %v1252_v21 }
 0x959   : > { %1988 = vst.msk [vmem:[%s2529_s16 + $0x56] sm:$0x3] %vm172_vm1, %v1254_v8 }
 0x95b   : > { %v1278_v35 = vpop.permute.xlu0 %1277 }
 0x95c   : > { %v1280_v14 = vsel %vm170_vm0, %v3001_v60, %v1278_v35 }
 0x95d   : > { %1991 = vst.msk [vmem:[%s2529_s16 + $0x58] sm:$0x3] %vm172_vm1, %v1280_v14 }
 0x95f   : > { %v1304_v36 = vpop.permute.xlu1 %1303 }
 0x960   : > { %v1306_v49 = vsel %vm170_vm0, %v3007_v5, %v1304_v36 }
 0x961   : > { %1994 = vst.msk [vmem:[%s2529_s16 + $0x5a] sm:$0x3] %vm172_vm1, %v1306_v49 }
 0x963   : > { %v1330_v32 = vpop.permute.xlu0 %1329 }
 0x964   : > { %v1332_v54 = vsel %vm170_vm0, %v3014_v61, %v1330_v32 }
 0x965   : > { %1997 = vst.msk [vmem:[%s2529_s16 + $0x5c] sm:$0x3] %vm172_vm1, %v1332_v54 }
 0x967   : > { %v1356_v38 = vpop.permute.xlu1 %1355  ;;  %v1375_v39 = vpop.permute.xlu0 %1374 }
 0x968   : > { %v1358_v60 = vsel %vm170_vm0, %v3023_v18, %v1356_v38  ;;  %v1377_v37 = vsel %vm170_vm0, %v3018_v15, %v1375_v39 }
 0x969   : > { %2000 = vst.msk [vmem:[%s2529_s16 + $0x5e] sm:$0x3] %vm172_vm1, %v1358_v60  ;;  %2003 = vst.msk [vmem:[%s2529_s16 + $0x60] sm:$0x3] %vm172_vm1, %v1377_v37 }
 0x96b   : > { %v1401_v5 = vpop.permute.xlu1 %1400 }
 0x96c   : > { %v1403_v61 = vsel %vm170_vm0, %v3031_v33, %v1401_v5 }
 0x96d   : > { %2006 = vst.msk [vmem:[%s2529_s16 + $0x62] sm:$0x3] %vm172_vm1, %v1403_v61 }
 0x96f   : > { %v1427_v44 = vpop.permute.xlu0 %1426 }
 0x970   : > { %v1429_v45 = vsel %vm170_vm0, %v3038_v24, %v1427_v44 }
 0x971   : > { %2009 = vst.msk [vmem:[%s2529_s16 + $0x64] sm:$0x3] %vm172_vm1, %v1429_v45 }
 0x973   : > { %v1453_v18 = vpop.permute.xlu1 %1452 }
 0x974   : > { %v1455_v15 = vsel %vm170_vm0, %v3044_v29, %v1453_v18 }
 0x975   : > { %2012 = vst.msk [vmem:[%s2529_s16 + $0x66] sm:$0x3] %vm172_vm1, %v1455_v15 }
 0x977   : > { %v1479_v46 = vpop.permute.xlu0 %1478 }
 0x978   : > { %v1481_v33 = vsel %vm170_vm0, %v3050_v12, %v1479_v46 }
 0x979   : > { %2015 = vst.msk [vmem:[%s2529_s16 + $0x68] sm:$0x3] %vm172_vm1, %v1481_v33 }
 0x97b   : > { %v1505_v47 = vpop.permute.xlu1 %1504 }
 0x97c   : > { %v1507_v24 = vsel %vm170_vm0, %v3056_v42, %v1505_v47 }
 0x97d   : > { %2018 = vst.msk [vmem:[%s2529_s16 + $0x6a] sm:$0x3] %vm172_vm1, %v1507_v24 }
 0x97f   : > { %v1531_v50 = vpop.permute.xlu0 %1530 }
 0x980   : > { %v1533_v29 = vsel %vm170_vm0, %v3063_v40, %v1531_v50 }
 0x981   : > { %2021 = vst.msk [vmem:[%s2529_s16 + $0x6c] sm:$0x3] %vm172_vm1, %v1533_v29 }
 0x983   : > { %v1557_v52 = vpop.permute.xlu1 %1556  ;;  %v1576_v53 = vpop.permute.xlu0 %1575 }
 0x984   : > { %v1559_v12 = vsel %vm170_vm0, %v3072_v48, %v1557_v52  ;;  %v1578_v55 = vsel %vm170_vm0, %v3067_v43, %v1576_v53 }
 0x985   : > { %2024 = vst.msk [vmem:[%s2529_s16 + $0x6e] sm:$0x3] %vm172_vm1, %v1559_v12  ;;  %2027 = vst.msk [vmem:[%s2529_s16 + $0x70] sm:$0x3] %vm172_vm1, %v1578_v55 }
 0x987   : > { %v1602_v42 = vpop.permute.xlu1 %1601 }
 0x988   : > { %v1604_v40 = vsel %vm170_vm0, %v3080_v57, %v1602_v42 }
 0x989   : > { %2030 = vst.msk [vmem:[%s2529_s16 + $0x72] sm:$0x3] %vm172_vm1, %v1604_v40 }
 0x98b   : > { %v1628_v58 = vpop.permute.xlu0 %1627 }
 0x98c   : > { %v1630_v48 = vsel %vm170_vm0, %v3087_v1, %v1628_v58 }
 0x98d   : > { %2033 = vst.msk [vmem:[%s2529_s16 + $0x74] sm:$0x3] %vm172_vm1, %v1630_v48 }
 0x98f   : > { %v1654_v43 = vpop.permute.xlu1 %1653 }
 0x990   : > { %v1656_v59 = vsel %vm170_vm0, %v3093_v13, %v1654_v43 }
 0x991   : > { %2036 = vst.msk [vmem:[%s2529_s16 + $0x76] sm:$0x3] %vm172_vm1, %v1656_v59 }
 0x993   : > { %v1680_v63 = vpop.permute.xlu0 %1679 }
 0x994   : > { %v1682_v57 = vsel %vm170_vm0, %v3099_v17, %v1680_v63 }
 0x995   : > { %2039 = vst.msk [vmem:[%s2529_s16 + $0x78] sm:$0x3] %vm172_vm1, %v1682_v57 }
 0x997   : > { %v1706_v0 = vpop.permute.xlu1 %1705 }
 0x998   : > { %v1708_v1 = vsel %vm170_vm0, %v3105_v11, %v1706_v0 }
 0x999   : > { %2042 = vst.msk [vmem:[%s2529_s16 + $0x7a] sm:$0x3] %vm172_vm1, %v1708_v1 }
 0x99b   : > { %v1732_v3 = vpop.permute.xlu0 %1731 }
 0x99c   : > { %v1734_v6 = vsel %vm170_vm0, %v3111_v51, %v1732_v3 }
 0x99d   : > { %2045 = vst.msk [vmem:[%s2529_s16 + $0x7c] sm:$0x3] %vm172_vm1, %v1734_v6 }
 0x99f   : > { %v1758_v9 = vpop.permute.xlu1 %1757 }
 0x9a0   : > { %v1760_v10 = vsel %vm170_vm0, %v3117_v30, %v1758_v9 }
 0x9a1   : > { %2048 = vst.msk [vmem:[%s2529_s16 + $0x7e] sm:$0x3] %vm172_vm1, %v1760_v10 }
 0x9a2   : > { %2183 = shalt.err (!%p2180_p5)
}
 0x9a3   : > { %s2184_s18 = scalar_lea.hbm %s3212_s25, 2048  ;;  %s2188_s2 = scalar_lea.hbm %s3268_s1, 4096 }
 0x9a4   : > { %p2185_p4 = scmp.ne.s32.totalorder %s3212_s25, %s2184_s18  ;;  %p2189_p12 = scmp.lt.u32.totalorder %s3212_s25, %s3268_s1 }
 0x9a5   : > { %p2190_p1 = scmp.lt.u32.totalorder %s2188_s2, %s2184_s18  ;;  %p2192_p8 = scmp.lt.u32.totalorder %s2184_s18, %s3212_s25 }
 0x9a6   : > { %p2186_p7 = pnand %p2185_p4, %p3276_p9 }
 0x9a7   : > { %p2191_p3 = por %p2190_p1, %p2189_p12 }
 0x9a8   : > { %p2187_p10 = pneg %p2186_p7 }
 0x9a9   : > { %p2193_p11 = por %p2192_p8, %p2191_p3 }
 0x9ab   : > { %p2194_p0 = pnand %p2193_p11, %p2187_p10 }
 0x9ad   : > { %2197 = shalt.err (!%p2194_p0)
}
 0x9ae   : > { %s2268_s13 = smov 32   ;;  %s2269_s15 = smov 2  }
 0x9af   : > { %2058 = dma.vmem_to_hbm [thread:$0]  (%p3276_p9), %s3214_s22, 2048, %s3212_s25, %s1764_s9, %s2268_s13, %s2268_s13, %s2269_s15  }
 0x9b0 PF: > { %s1793_s16 = sand.u32 1, %s2232_s6   ;;  %p3277_p6 = scmp.ne.s32.totalorder %s3273_s21, 0 }
 0x9b1   : > { %p3278_p13 = scmp.ge.s32.totalorder %s2252_s11, 2  ;;  %s1794_s17 = scalar_lea.sflag [#allocation4], %s1793_s16 }
 0x9b3   : > { %p2065_p2 = pnand %p3278_p13, %p3277_p6 }
 0x9b5   : > { %2227 = dma.done.wait (!%p2065_p2), %s1794_s17, 2048  }
 0x9b6   : > { %2229 = vsyncadd (!%p2065_p2), %s1794_s17, 4294965248  ;;  %s17_s11 = sadd.s32 1, %s2252_s11   ;;  %s3279_s6 = smov %s2236_s7 }
 0x9b7   : > { %p14_p5 = scmp.ge.s32.totalorder %s17_s11, 4   ;;  %s3280_s7 = smov %s2240_s8 }
 0x9b8   : > { %s3281_s8 = smov %s2336_s20  ;;  %s3282_s9 = smov %s2248_s10 }
 0x9b9   : > { %s3283_s10 = smov %s3285_s14  ;;  %16 = sbr.rel (!%p14_p5) target bundleno = 6 (0x6), region = 139 }
 0x9c0   :  { %1799 = vsyncpa [#allocation3], 1 }
 0x9c1   :  { %1801 = vsyncpa [#allocation3 + $0x1], 1 }
 0x9c2   :  { %1802 = vsyncpa [#allocation4], 1 }
 0x9c3   :  { %1804 = vsyncpa [#allocation4 + $0x1], 1 }

// kernel: tpu_custom_call.1
= control target key start
LH: loop header
LB: loop body
LE: loop exit
PB: predicated region body
PF: predicated region fallthrough
CT: control target
= control target key end

     0   :  { %s1766_s6 = smov 0   ;;  %s1768_s7 = smov 0   ;;  %s2443_s0 = inlined_call_operand.vmem [shape: f32[2,2,8,2,8,4], index: 0, kind: input, shape index: {}]   ;;  %s2444_s1 = inlined_call_operand.vmem [shape: f32[2,8,8,2,2,4], index: 1, kind: output, shape index: {}]  }
   0x1   :  { %s1770_s8 = smov 0  }
   0x2 LB: > { %s23_s9 = sadd.s32 1, %s1750_s7  ;;  %p1349_p0 = scmp.ge.s32.totalorder %s1754_s8, 1  ;;  %s1754_s8 = sphi %s1770_s8, %s11_s8   ;;  %s1750_s7 = sphi %s1768_s7, %s2446_s7   ;;  %s1746_s6 = sphi %s1766_s6, %s2445_s6  }
   0x3   : > { %p25_p1 = scmp.ge.s32.totalorder %s23_s9, 2  ;;  %p109_p2 = scmp.lt.s32.totalorder %s1754_s8, 3 }
   0x5   : > { %s2448_s9 = smov (%p25_p1, %s23_s9), 0  ;;  %p110_p3 = pnand %p1349_p0, %p109_p2 }
   0x6   : > { %p139_p4 = scmp.lt.s32.totalorder (!%p110_p3), %s1746_s6, 1  ;;  %vm168_vm0 = vcmask (!%p110_p3), 1041409   ;;  %vm174_vm1 = vcmask (!%p110_p3), 25600  }
   0x7   : > { %113 = sbr.rel (%p110_p3) target bundleno = 190 (0xbe), region = 24 }
   0xe   : > { %s2450_s6 = smov (!%p139_p4, %s1746_s6), 1 }
   0xf   : > { %s1706_s10 = sshll.u32 %s2450_s6, 8 }
  0x10   : > { %s1787_s13 = scalar_lea.vmem %s2443_s0, %s1706_s10  ;;  %s1794_s16 = scalar_lea.vmem %s2444_s1, %s1706_s10 }
  0x11   : > { %v159_v0 = vld [vmem:[%s1787_s13] sm:$0x1]  ;;  %v160_v1 = vld [vmem:[%s1787_s13 + $0x8] sm:$0x1]  ;;  %v177_v6 = vld [vmem:[%s1787_s13 + $0x1] sm:$0x1] }
  0x12   : > { %v167_v2 = vrot.slane %v160_v1, 7  ;;  %v161_v3 = vld [vmem:[%s1787_s13 + $0x80] sm:$0x1]  ;;  %v162_v4 = vld [vmem:[%s1787_s13 + $0x88] sm:$0x1] }
  0x13   : > { %v170_v5 = vrot.slane %v162_v4, 7  ;;  %v178_v7 = vld [vmem:[%s1787_s13 + $0x9] sm:$0x1]  ;;  %v179_v10 = vld [vmem:[%s1787_s13 + $0x81] sm:$0x1] }
  0x14   : > { %v169_v8 = vsel %vm168_vm0, %v167_v2, %v159_v0  ;;  %v185_v9 = vrot.slane %v178_v7, 7  ;;  %v180_v11 = vld [vmem:[%s1787_s13 + $0x89] sm:$0x1]  ;;  %v194_v14 = vld [vmem:[%s1787_s13 + $0x2] sm:$0x1] }
  0x15   : > { %175 = vst.msk [vmem:[%s1794_s16] sm:$0x3] %vm174_vm1, %v169_v8  ;;  %v171_v12 = vsel %vm168_vm0, %v170_v5, %v161_v3  ;;  %v187_v13 = vrot.slane %v180_v11, 7  ;;  %v195_v15 = vld [vmem:[%s1787_s13 + $0xa] sm:$0x1] }
  0x16   : > { %176 = vst.msk [vmem:[%s1794_s16 + $0x2] sm:$0x3] %vm174_vm1, %v171_v12  ;;  %v186_v16 = vsel %vm168_vm0, %v185_v9, %v177_v6  ;;  %v202_v17 = vrot.slane %v195_v15, 7  ;;  %v196_v18 = vld [vmem:[%s1787_s13 + $0x82] sm:$0x1] }
  0x17   : > { %v197_v19 = vld [vmem:[%s1787_s13 + $0x8a] sm:$0x1]  ;;  %1354 = vst.msk [vmem:[%s1794_s16 + $0x4] sm:$0x3] %vm174_vm1, %v186_v16  ;;  %v188_v20 = vsel %vm168_vm0, %v187_v13, %v179_v10  ;;  %v211_v22 = vld [vmem:[%s1787_s13 + $0x3] sm:$0x1] }
  0x18   : > { %v204_v21 = vrot.slane %v197_v19, 7  ;;  %v212_v23 = vld [vmem:[%s1787_s13 + $0xb] sm:$0x1]  ;;  %1355 = vst.msk [vmem:[%s1794_s16 + $0x6] sm:$0x3] %vm174_vm1, %v188_v20  ;;  %v203_v24 = vsel %vm168_vm0, %v202_v17, %v194_v14 }
  0x19   : > { %v219_v25 = vrot.slane %v212_v23, 7  ;;  %v213_v26 = vld [vmem:[%s1787_s13 + $0x83] sm:$0x1]  ;;  %v214_v27 = vld [vmem:[%s1787_s13 + $0x8b] sm:$0x1] }
  0x1a   : > { %1356 = vst.msk [vmem:[%s1794_s16 + $0x8] sm:$0x3] %vm174_vm1, %v203_v24  ;;  %v205_v28 = vsel %vm168_vm0, %v204_v21, %v196_v18  ;;  %v221_v29 = vrot.slane %v214_v27, 7  ;;  %v228_v30 = vld [vmem:[%s1787_s13 + $0x4] sm:$0x1] }
  0x1b   : > { %v229_v31 = vld [vmem:[%s1787_s13 + $0xc] sm:$0x1]  ;;  %1357 = vst.msk [vmem:[%s1794_s16 + $0xa] sm:$0x3] %vm174_vm1, %v205_v28  ;;  %v220_v32 = vsel %vm168_vm0, %v219_v25, %v211_v22  ;;  %v230_v34 = vld [vmem:[%s1787_s13 + $0x84] sm:$0x1] }
  0x1c   : > { %v236_v33 = vrot.slane %v229_v31, 7  ;;  %v231_v35 = vld [vmem:[%s1787_s13 + $0x8c] sm:$0x1]  ;;  %1358 = vst.msk [vmem:[%s1794_s16 + $0xc] sm:$0x3] %vm174_vm1, %v220_v32  ;;  %v222_v36 = vsel %vm168_vm0, %v221_v29, %v213_v26 }
  0x1d   : > { %v238_v37 = vrot.slane %v231_v35, 7  ;;  %v245_v38 = vld [vmem:[%s1787_s13 + $0x5] sm:$0x1]  ;;  %v246_v39 = vld [vmem:[%s1787_s13 + $0xd] sm:$0x1] }
  0x1e   : > { %1359 = vst.msk [vmem:[%s1794_s16 + $0xe] sm:$0x3] %vm174_vm1, %v222_v36  ;;  %v237_v40 = vsel %vm168_vm0, %v236_v33, %v228_v30  ;;  %v253_v41 = vrot.slane %v246_v39, 7  ;;  %v247_v42 = vld [vmem:[%s1787_s13 + $0x85] sm:$0x1] }
  0x1f   : > { %v248_v43 = vld [vmem:[%s1787_s13 + $0x8d] sm:$0x1]  ;;  %1360 = vst.msk [vmem:[%s1794_s16 + $0x10] sm:$0x3] %vm174_vm1, %v237_v40  ;;  %v239_v44 = vsel %vm168_vm0, %v238_v37, %v230_v34  ;;  %v262_v46 = vld [vmem:[%s1787_s13 + $0x6] sm:$0x1] }
  0x20   : > { %v255_v45 = vrot.slane %v248_v43, 7  ;;  %v263_v47 = vld [vmem:[%s1787_s13 + $0xe] sm:$0x1]  ;;  %1361 = vst.msk [vmem:[%s1794_s16 + $0x12] sm:$0x3] %vm174_vm1, %v239_v44  ;;  %v254_v48 = vsel %vm168_vm0, %v253_v41, %v245_v38 }
  0x21   : > { %v270_v49 = vrot.slane %v263_v47, 7  ;;  %v264_v50 = vld [vmem:[%s1787_s13 + $0x86] sm:$0x1]  ;;  %v265_v51 = vld [vmem:[%s1787_s13 + $0x8e] sm:$0x1] }
  0x22   : > { %1362 = vst.msk [vmem:[%s1794_s16 + $0x14] sm:$0x3] %vm174_vm1, %v254_v48  ;;  %v256_v52 = vsel %vm168_vm0, %v255_v45, %v247_v42  ;;  %v272_v53 = vrot.slane %v265_v51, 7  ;;  %v279_v54 = vld [vmem:[%s1787_s13 + $0x7] sm:$0x1] }
  0x23   : > { %v280_v55 = vld [vmem:[%s1787_s13 + $0xf] sm:$0x1]  ;;  %1363 = vst.msk [vmem:[%s1794_s16 + $0x16] sm:$0x3] %vm174_vm1, %v256_v52  ;;  %v271_v56 = vsel %vm168_vm0, %v270_v49, %v262_v46  ;;  %v281_v58 = vld [vmem:[%s1787_s13 + $0x87] sm:$0x1] }
  0x24   : > { %v287_v57 = vrot.slane %v280_v55, 7  ;;  %v282_v59 = vld [vmem:[%s1787_s13 + $0x8f] sm:$0x1]  ;;  %1364 = vst.msk [vmem:[%s1794_s16 + $0x18] sm:$0x3] %vm174_vm1, %v271_v56  ;;  %v273_v60 = vsel %vm168_vm0, %v272_v53, %v264_v50 }
  0x25   : > { %v289_v61 = vrot.slane %v282_v59, 7  ;;  %v1368_v62 = vld [vmem:[%s1787_s13 + $0x10] sm:$0x1]  ;;  %v1369_v63 = vld [vmem:[%s1787_s13 + $0x18] sm:$0x1] }
  0x26   : > { %1365 = vst.msk [vmem:[%s1794_s16 + $0x1a] sm:$0x3] %vm174_vm1, %v273_v60  ;;  %v288_v0 = vsel %vm168_vm0, %v287_v57, %v279_v54  ;;  %v305_v1 = vrot.slane %v1369_v63, 7  ;;  %v1370_v2 = vld [vmem:[%s1787_s13 + $0x90] sm:$0x1] }
  0x27   : > { %v1371_v3 = vld [vmem:[%s1787_s13 + $0x98] sm:$0x1]  ;;  %1366 = vst.msk [vmem:[%s1794_s16 + $0x1c] sm:$0x3] %vm174_vm1, %v288_v0  ;;  %v290_v4 = vsel %vm168_vm0, %v289_v61, %v281_v58  ;;  %v1374_v6 = vld [vmem:[%s1787_s13 + $0x11] sm:$0x1] }
  0x28   : > { %v307_v5 = vrot.slane %v1371_v3, 7  ;;  %v1375_v7 = vld [vmem:[%s1787_s13 + $0x19] sm:$0x1]  ;;  %1367 = vst.msk [vmem:[%s1794_s16 + $0x1e] sm:$0x3] %vm174_vm1, %v290_v4  ;;  %v306_v8 = vsel %vm168_vm0, %v305_v1, %v1368_v62 }
  0x29   : > { %v322_v9 = vrot.slane %v1375_v7, 7  ;;  %v1376_v10 = vld [vmem:[%s1787_s13 + $0x91] sm:$0x1]  ;;  %v1377_v11 = vld [vmem:[%s1787_s13 + $0x99] sm:$0x1] }
  0x2a   : > { %1372 = vst.msk [vmem:[%s1794_s16 + $0x20] sm:$0x3] %vm174_vm1, %v306_v8  ;;  %v308_v12 = vsel %vm168_vm0, %v307_v5, %v1370_v2  ;;  %v324_v13 = vrot.slane %v1377_v11, 7  ;;  %v1380_v14 = vld [vmem:[%s1787_s13 + $0x12] sm:$0x1] }
  0x2b   : > { %v1381_v15 = vld [vmem:[%s1787_s13 + $0x1a] sm:$0x1]  ;;  %1373 = vst.msk [vmem:[%s1794_s16 + $0x22] sm:$0x3] %vm174_vm1, %v308_v12  ;;  %v323_v16 = vsel %vm168_vm0, %v322_v9, %v1374_v6  ;;  %v1382_v18 = vld [vmem:[%s1787_s13 + $0x92] sm:$0x1] }
  0x2c   : > { %v339_v17 = vrot.slane %v1381_v15, 7  ;;  %v1383_v19 = vld [vmem:[%s1787_s13 + $0x9a] sm:$0x1]  ;;  %1378 = vst.msk [vmem:[%s1794_s16 + $0x24] sm:$0x3] %vm174_vm1, %v323_v16  ;;  %v325_v20 = vsel %vm168_vm0, %v324_v13, %v1376_v10 }
  0x2d   : > { %v341_v21 = vrot.slane %v1383_v19, 7  ;;  %v1386_v22 = vld [vmem:[%s1787_s13 + $0x13] sm:$0x1]  ;;  %v1387_v23 = vld [vmem:[%s1787_s13 + $0x1b] sm:$0x1] }
  0x2e   : > { %1379 = vst.msk [vmem:[%s1794_s16 + $0x26] sm:$0x3] %vm174_vm1, %v325_v20  ;;  %v340_v24 = vsel %vm168_vm0, %v339_v17, %v1380_v14  ;;  %v356_v25 = vrot.slane %v1387_v23, 7  ;;  %v1388_v26 = vld [vmem:[%s1787_s13 + $0x93] sm:$0x1] }
  0x2f   : > { %v1389_v27 = vld [vmem:[%s1787_s13 + $0x9b] sm:$0x1]  ;;  %1384 = vst.msk [vmem:[%s1794_s16 + $0x28] sm:$0x3] %vm174_vm1, %v340_v24  ;;  %v342_v28 = vsel %vm168_vm0, %v341_v21, %v1382_v18  ;;  %v1392_v30 = vld [vmem:[%s1787_s13 + $0x14] sm:$0x1] }
  0x30   : > { %v358_v29 = vrot.slane %v1389_v27, 7  ;;  %v1393_v31 = vld [vmem:[%s1787_s13 + $0x1c] sm:$0x1]  ;;  %1385 = vst.msk [vmem:[%s1794_s16 + $0x2a] sm:$0x3] %vm174_vm1, %v342_v28  ;;  %v357_v32 = vsel %vm168_vm0, %v356_v25, %v1386_v22 }
  0x31   : > { %v373_v33 = vrot.slane %v1393_v31, 7  ;;  %v1394_v34 = vld [vmem:[%s1787_s13 + $0x94] sm:$0x1]  ;;  %v1395_v35 = vld [vmem:[%s1787_s13 + $0x9c] sm:$0x1] }
  0x32   : > { %1390 = vst.msk [vmem:[%s1794_s16 + $0x2c] sm:$0x3] %vm174_vm1, %v357_v32  ;;  %v359_v36 = vsel %vm168_vm0, %v358_v29, %v1388_v26  ;;  %v375_v37 = vrot.slane %v1395_v35, 7  ;;  %v1398_v38 = vld [vmem:[%s1787_s13 + $0x15] sm:$0x1] }
  0x33   : > { %v1399_v39 = vld [vmem:[%s1787_s13 + $0x1d] sm:$0x1]  ;;  %1391 = vst.msk [vmem:[%s1794_s16 + $0x2e] sm:$0x3] %vm174_vm1, %v359_v36  ;;  %v374_v40 = vsel %vm168_vm0, %v373_v33, %v1392_v30  ;;  %v1400_v42 = vld [vmem:[%s1787_s13 + $0x95] sm:$0x1] }
  0x34   : > { %v390_v41 = vrot.slane %v1399_v39, 7  ;;  %v1401_v43 = vld [vmem:[%s1787_s13 + $0x9d] sm:$0x1]  ;;  %1396 = vst.msk [vmem:[%s1794_s16 + $0x30] sm:$0x3] %vm174_vm1, %v374_v40  ;;  %v376_v44 = vsel %vm168_vm0, %v375_v37, %v1394_v34 }
  0x35   : > { %v392_v45 = vrot.slane %v1401_v43, 7  ;;  %v1404_v46 = vld [vmem:[%s1787_s13 + $0x16] sm:$0x1]  ;;  %v1405_v47 = vld [vmem:[%s1787_s13 + $0x1e] sm:$0x1] }
  0x36   : > { %1397 = vst.msk [vmem:[%s1794_s16 + $0x32] sm:$0x3] %vm174_vm1, %v376_v44  ;;  %v391_v48 = vsel %vm168_vm0, %v390_v41, %v1398_v38  ;;  %v407_v49 = vrot.slane %v1405_v47, 7  ;;  %v1406_v50 = vld [vmem:[%s1787_s13 + $0x96] sm:$0x1] }
  0x37   : > { %v1407_v51 = vld [vmem:[%s1787_s13 + $0x9e] sm:$0x1]  ;;  %1402 = vst.msk [vmem:[%s1794_s16 + $0x34] sm:$0x3] %vm174_vm1, %v391_v48  ;;  %v393_v52 = vsel %vm168_vm0, %v392_v45, %v1400_v42  ;;  %v1410_v54 = vld [vmem:[%s1787_s13 + $0x17] sm:$0x1] }
  0x38   : > { %v409_v53 = vrot.slane %v1407_v51, 7  ;;  %v1411_v55 = vld [vmem:[%s1787_s13 + $0x1f] sm:$0x1]  ;;  %1403 = vst.msk [vmem:[%s1794_s16 + $0x36] sm:$0x3] %vm174_vm1, %v393_v52  ;;  %v408_v56 = vsel %vm168_vm0, %v407_v49, %v1404_v46 }
  0x39   : > { %v424_v57 = vrot.slane %v1411_v55, 7  ;;  %v1412_v58 = vld [vmem:[%s1787_s13 + $0x97] sm:$0x1]  ;;  %v1413_v59 = vld [vmem:[%s1787_s13 + $0x9f] sm:$0x1] }
  0x3a   : > { %1408 = vst.msk [vmem:[%s1794_s16 + $0x38] sm:$0x3] %vm174_vm1, %v408_v56  ;;  %v410_v60 = vsel %vm168_vm0, %v409_v53, %v1406_v50  ;;  %v426_v61 = vrot.slane %v1413_v59, 7  ;;  %v1416_v62 = vld [vmem:[%s1787_s13 + $0x20] sm:$0x1] }
  0x3b   : > { %v1417_v63 = vld [vmem:[%s1787_s13 + $0x28] sm:$0x1]  ;;  %1409 = vst.msk [vmem:[%s1794_s16 + $0x3a] sm:$0x3] %vm174_vm1, %v410_v60  ;;  %v425_v0 = vsel %vm168_vm0, %v424_v57, %v1410_v54  ;;  %v1418_v2 = vld [vmem:[%s1787_s13 + $0xa0] sm:$0x1] }
  0x3c   : > { %v442_v1 = vrot.slane %v1417_v63, 7  ;;  %v1419_v3 = vld [vmem:[%s1787_s13 + $0xa8] sm:$0x1]  ;;  %1414 = vst.msk [vmem:[%s1794_s16 + $0x3c] sm:$0x3] %vm174_vm1, %v425_v0  ;;  %v427_v4 = vsel %vm168_vm0, %v426_v61, %v1412_v58 }
  0x3d   : > { %v444_v5 = vrot.slane %v1419_v3, 7  ;;  %v1422_v6 = vld [vmem:[%s1787_s13 + $0x21] sm:$0x1]  ;;  %v1423_v7 = vld [vmem:[%s1787_s13 + $0x29] sm:$0x1] }
  0x3e   : > { %1415 = vst.msk [vmem:[%s1794_s16 + $0x3e] sm:$0x3] %vm174_vm1, %v427_v4  ;;  %v443_v8 = vsel %vm168_vm0, %v442_v1, %v1416_v62  ;;  %v459_v9 = vrot.slane %v1423_v7, 7  ;;  %v1424_v10 = vld [vmem:[%s1787_s13 + $0xa1] sm:$0x1] }
  0x3f   : > { %v1425_v11 = vld [vmem:[%s1787_s13 + $0xa9] sm:$0x1]  ;;  %1420 = vst.msk [vmem:[%s1794_s16 + $0x40] sm:$0x3] %vm174_vm1, %v443_v8  ;;  %v445_v12 = vsel %vm168_vm0, %v444_v5, %v1418_v2  ;;  %v1428_v14 = vld [vmem:[%s1787_s13 + $0x22] sm:$0x1] }
  0x40   : > { %v461_v13 = vrot.slane %v1425_v11, 7  ;;  %v1429_v15 = vld [vmem:[%s1787_s13 + $0x2a] sm:$0x1]  ;;  %1421 = vst.msk [vmem:[%s1794_s16 + $0x42] sm:$0x3] %vm174_vm1, %v445_v12  ;;  %v460_v16 = vsel %vm168_vm0, %v459_v9, %v1422_v6 }
  0x41   : > { %v476_v17 = vrot.slane %v1429_v15, 7  ;;  %v1430_v18 = vld [vmem:[%s1787_s13 + $0xa2] sm:$0x1]  ;;  %v1431_v19 = vld [vmem:[%s1787_s13 + $0xaa] sm:$0x1] }
  0x42   : > { %1426 = vst.msk [vmem:[%s1794_s16 + $0x44] sm:$0x3] %vm174_vm1, %v460_v16  ;;  %v462_v20 = vsel %vm168_vm0, %v461_v13, %v1424_v10  ;;  %v478_v21 = vrot.slane %v1431_v19, 7  ;;  %v1434_v22 = vld [vmem:[%s1787_s13 + $0x23] sm:$0x1] }
  0x43   : > { %v1435_v23 = vld [vmem:[%s1787_s13 + $0x2b] sm:$0x1]  ;;  %1427 = vst.msk [vmem:[%s1794_s16 + $0x46] sm:$0x3] %vm174_vm1, %v462_v20  ;;  %v477_v24 = vsel %vm168_vm0, %v476_v17, %v1428_v14  ;;  %v1436_v26 = vld [vmem:[%s1787_s13 + $0xa3] sm:$0x1] }
  0x44   : > { %v493_v25 = vrot.slane %v1435_v23, 7  ;;  %v1437_v27 = vld [vmem:[%s1787_s13 + $0xab] sm:$0x1]  ;;  %1432 = vst.msk [vmem:[%s1794_s16 + $0x48] sm:$0x3] %vm174_vm1, %v477_v24  ;;  %v479_v28 = vsel %vm168_vm0, %v478_v21, %v1430_v18 }
  0x45   : > { %v495_v29 = vrot.slane %v1437_v27, 7  ;;  %v1440_v30 = vld [vmem:[%s1787_s13 + $0x24] sm:$0x1]  ;;  %v1441_v31 = vld [vmem:[%s1787_s13 + $0x2c] sm:$0x1] }
  0x46   : > { %1433 = vst.msk [vmem:[%s1794_s16 + $0x4a] sm:$0x3] %vm174_vm1, %v479_v28  ;;  %v494_v32 = vsel %vm168_vm0, %v493_v25, %v1434_v22  ;;  %v510_v33 = vrot.slane %v1441_v31, 7  ;;  %v1442_v34 = vld [vmem:[%s1787_s13 + $0xa4] sm:$0x1] }
  0x47   : > { %v1443_v35 = vld [vmem:[%s1787_s13 + $0xac] sm:$0x1]  ;;  %1438 = vst.msk [vmem:[%s1794_s16 + $0x4c] sm:$0x3] %vm174_vm1, %v494_v32  ;;  %v496_v36 = vsel %vm168_vm0, %v495_v29, %v1436_v26  ;;  %v1446_v38 = vld [vmem:[%s1787_s13 + $0x25] sm:$0x1] }
  0x48   : > { %v512_v37 = vrot.slane %v1443_v35, 7  ;;  %v1447_v39 = vld [vmem:[%s1787_s13 + $0x2d] sm:$0x1]  ;;  %1439 = vst.msk [vmem:[%s1794_s16 + $0x4e] sm:$0x3] %vm174_vm1, %v496_v36  ;;  %v511_v40 = vsel %vm168_vm0, %v510_v33, %v1440_v30 }
  0x49   : > { %v527_v41 = vrot.slane %v1447_v39, 7  ;;  %v1448_v42 = vld [vmem:[%s1787_s13 + $0xa5] sm:$0x1]  ;;  %v1449_v43 = vld [vmem:[%s1787_s13 + $0xad] sm:$0x1] }
  0x4a   : > { %1444 = vst.msk [vmem:[%s1794_s16 + $0x50] sm:$0x3] %vm174_vm1, %v511_v40  ;;  %v513_v44 = vsel %vm168_vm0, %v512_v37, %v1442_v34  ;;  %v529_v45 = vrot.slane %v1449_v43, 7  ;;  %v1452_v46 = vld [vmem:[%s1787_s13 + $0x26] sm:$0x1] }
  0x4b   : > { %v1453_v47 = vld [vmem:[%s1787_s13 + $0x2e] sm:$0x1]  ;;  %1445 = vst.msk [vmem:[%s1794_s16 + $0x52] sm:$0x3] %vm174_vm1, %v513_v44  ;;  %v528_v48 = vsel %vm168_vm0, %v527_v41, %v1446_v38  ;;  %v1454_v50 = vld [vmem:[%s1787_s13 + $0xa6] sm:$0x1] }
  0x4c   : > { %v544_v49 = vrot.slane %v1453_v47, 7  ;;  %v1455_v51 = vld [vmem:[%s1787_s13 + $0xae] sm:$0x1]  ;;  %1450 = vst.msk [vmem:[%s1794_s16 + $0x54] sm:$0x3] %vm174_vm1, %v528_v48  ;;  %v530_v52 = vsel %vm168_vm0, %v529_v45, %v1448_v42 }
  0x4d   : > { %v546_v53 = vrot.slane %v1455_v51, 7  ;;  %v1458_v54 = vld [vmem:[%s1787_s13 + $0x27] sm:$0x1]  ;;  %v1459_v55 = vld [vmem:[%s1787_s13 + $0x2f] sm:$0x1] }
  0x4e   : > { %1451 = vst.msk [vmem:[%s1794_s16 + $0x56] sm:$0x3] %vm174_vm1, %v530_v52  ;;  %v545_v56 = vsel %vm168_vm0, %v544_v49, %v1452_v46  ;;  %v561_v57 = vrot.slane %v1459_v55, 7  ;;  %v1460_v58 = vld [vmem:[%s1787_s13 + $0xa7] sm:$0x1] }
  0x4f   : > { %v1461_v59 = vld [vmem:[%s1787_s13 + $0xaf] sm:$0x1]  ;;  %1456 = vst.msk [vmem:[%s1794_s16 + $0x58] sm:$0x3] %vm174_vm1, %v545_v56  ;;  %v547_v60 = vsel %vm168_vm0, %v546_v53, %v1454_v50  ;;  %v1464_v62 = vld [vmem:[%s1787_s13 + $0x30] sm:$0x1] }
  0x50   : > { %v563_v61 = vrot.slane %v1461_v59, 7  ;;  %v1465_v63 = vld [vmem:[%s1787_s13 + $0x38] sm:$0x1]  ;;  %1457 = vst.msk [vmem:[%s1794_s16 + $0x5a] sm:$0x3] %vm174_vm1, %v547_v60  ;;  %v562_v0 = vsel %vm168_vm0, %v561_v57, %v1458_v54 }
  0x51   : > { %v579_v1 = vrot.slane %v1465_v63, 7  ;;  %v1466_v2 = vld [vmem:[%s1787_s13 + $0xb0] sm:$0x1]  ;;  %v1467_v3 = vld [vmem:[%s1787_s13 + $0xb8] sm:$0x1] }
  0x52   : > { %1462 = vst.msk [vmem:[%s1794_s16 + $0x5c] sm:$0x3] %vm174_vm1, %v562_v0  ;;  %v564_v4 = vsel %vm168_vm0, %v563_v61, %v1460_v58  ;;  %v581_v5 = vrot.slane %v1467_v3, 7  ;;  %v1470_v6 = vld [vmem:[%s1787_s13 + $0x31] sm:$0x1] }
  0x53   : > { %v1471_v7 = vld [vmem:[%s1787_s13 + $0x39] sm:$0x1]  ;;  %1463 = vst.msk [vmem:[%s1794_s16 + $0x5e] sm:$0x3] %vm174_vm1, %v564_v4  ;;  %v580_v8 = vsel %vm168_vm0, %v579_v1, %v1464_v62  ;;  %v1472_v10 = vld [vmem:[%s1787_s13 + $0xb1] sm:$0x1] }
  0x54   : > { %v596_v9 = vrot.slane %v1471_v7, 7  ;;  %v1473_v11 = vld [vmem:[%s1787_s13 + $0xb9] sm:$0x1]  ;;  %1468 = vst.msk [vmem:[%s1794_s16 + $0x60] sm:$0x3] %vm174_vm1, %v580_v8  ;;  %v582_v12 = vsel %vm168_vm0, %v581_v5, %v1466_v2 }
  0x55   : > { %v598_v13 = vrot.slane %v1473_v11, 7  ;;  %v1476_v14 = vld [vmem:[%s1787_s13 + $0x32] sm:$0x1]  ;;  %v1477_v15 = vld [vmem:[%s1787_s13 + $0x3a] sm:$0x1] }
  0x56   : > { %1469 = vst.msk [vmem:[%s1794_s16 + $0x62] sm:$0x3] %vm174_vm1, %v582_v12  ;;  %v597_v16 = vsel %vm168_vm0, %v596_v9, %v1470_v6  ;;  %v613_v17 = vrot.slane %v1477_v15, 7  ;;  %v1478_v18 = vld [vmem:[%s1787_s13 + $0xb2] sm:$0x1] }
  0x57   : > { %v1479_v19 = vld [vmem:[%s1787_s13 + $0xba] sm:$0x1]  ;;  %1474 = vst.msk [vmem:[%s1794_s16 + $0x64] sm:$0x3] %vm174_vm1, %v597_v16  ;;  %v599_v20 = vsel %vm168_vm0, %v598_v13, %v1472_v10  ;;  %v1482_v22 = vld [vmem:[%s1787_s13 + $0x33] sm:$0x1] }
  0x58   : > { %v615_v21 = vrot.slane %v1479_v19, 7  ;;  %v1483_v23 = vld [vmem:[%s1787_s13 + $0x3b] sm:$0x1]  ;;  %1475 = vst.msk [vmem:[%s1794_s16 + $0x66] sm:$0x3] %vm174_vm1, %v599_v20  ;;  %v614_v24 = vsel %vm168_vm0, %v613_v17, %v1476_v14 }
  0x59   : > { %v630_v25 = vrot.slane %v1483_v23, 7  ;;  %v1484_v26 = vld [vmem:[%s1787_s13 + $0xb3] sm:$0x1]  ;;  %v1485_v27 = vld [vmem:[%s1787_s13 + $0xbb] sm:$0x1] }
  0x5a   : > { %1480 = vst.msk [vmem:[%s1794_s16 + $0x68] sm:$0x3] %vm174_vm1, %v614_v24  ;;  %v616_v28 = vsel %vm168_vm0, %v615_v21, %v1478_v18  ;;  %v632_v29 = vrot.slane %v1485_v27, 7  ;;  %v1488_v30 = vld [vmem:[%s1787_s13 + $0x34] sm:$0x1] }
  0x5b   : > { %v1489_v31 = vld [vmem:[%s1787_s13 + $0x3c] sm:$0x1]  ;;  %1481 = vst.msk [vmem:[%s1794_s16 + $0x6a] sm:$0x3] %vm174_vm1, %v616_v28  ;;  %v631_v32 = vsel %vm168_vm0, %v630_v25, %v1482_v22  ;;  %v1490_v34 = vld [vmem:[%s1787_s13 + $0xb4] sm:$0x1] }
  0x5c   : > { %v647_v33 = vrot.slane %v1489_v31, 7  ;;  %v1491_v35 = vld [vmem:[%s1787_s13 + $0xbc] sm:$0x1]  ;;  %1486 = vst.msk [vmem:[%s1794_s16 + $0x6c] sm:$0x3] %vm174_vm1, %v631_v32  ;;  %v633_v36 = vsel %vm168_vm0, %v632_v29, %v1484_v26 }
  0x5d   : > { %v649_v37 = vrot.slane %v1491_v35, 7  ;;  %v1494_v38 = vld [vmem:[%s1787_s13 + $0x35] sm:$0x1]  ;;  %v1495_v39 = vld [vmem:[%s1787_s13 + $0x3d] sm:$0x1] }
  0x5e   : > { %1487 = vst.msk [vmem:[%s1794_s16 + $0x6e] sm:$0x3] %vm174_vm1, %v633_v36  ;;  %v648_v40 = vsel %vm168_vm0, %v647_v33, %v1488_v30  ;;  %v664_v41 = vrot.slane %v1495_v39, 7  ;;  %v1496_v42 = vld [vmem:[%s1787_s13 + $0xb5] sm:$0x1] }
  0x5f   : > { %v1497_v43 = vld [vmem:[%s1787_s13 + $0xbd] sm:$0x1]  ;;  %1492 = vst.msk [vmem:[%s1794_s16 + $0x70] sm:$0x3] %vm174_vm1, %v648_v40  ;;  %v650_v44 = vsel %vm168_vm0, %v649_v37, %v1490_v34  ;;  %v1500_v46 = vld [vmem:[%s1787_s13 + $0x36] sm:$0x1] }
  0x60   : > { %v666_v45 = vrot.slane %v1497_v43, 7  ;;  %v1501_v47 = vld [vmem:[%s1787_s13 + $0x3e] sm:$0x1]  ;;  %1493 = vst.msk [vmem:[%s1794_s16 + $0x72] sm:$0x3] %vm174_vm1, %v650_v44  ;;  %v665_v48 = vsel %vm168_vm0, %v664_v41, %v1494_v38 }
  0x61   : > { %v681_v49 = vrot.slane %v1501_v47, 7  ;;  %v1502_v50 = vld [vmem:[%s1787_s13 + $0xb6] sm:$0x1]  ;;  %v1503_v51 = vld [vmem:[%s1787_s13 + $0xbe] sm:$0x1] }
  0x62   : > { %1498 = vst.msk [vmem:[%s1794_s16 + $0x74] sm:$0x3] %vm174_vm1, %v665_v48  ;;  %v667_v52 = vsel %vm168_vm0, %v666_v45, %v1496_v42  ;;  %v683_v53 = vrot.slane %v1503_v51, 7  ;;  %v1506_v54 = vld [vmem:[%s1787_s13 + $0x37] sm:$0x1] }
  0x63   : > { %v1507_v55 = vld [vmem:[%s1787_s13 + $0x3f] sm:$0x1]  ;;  %1499 = vst.msk [vmem:[%s1794_s16 + $0x76] sm:$0x3] %vm174_vm1, %v667_v52  ;;  %v682_v56 = vsel %vm168_vm0, %v681_v49, %v1500_v46  ;;  %v1508_v58 = vld [vmem:[%s1787_s13 + $0xb7] sm:$0x1] }
  0x64   : > { %v698_v57 = vrot.slane %v1507_v55, 7  ;;  %v1509_v59 = vld [vmem:[%s1787_s13 + $0xbf] sm:$0x1]  ;;  %1504 = vst.msk [vmem:[%s1794_s16 + $0x78] sm:$0x3] %vm174_vm1, %v682_v56  ;;  %v684_v60 = vsel %vm168_vm0, %v683_v53, %v1502_v50 }
  0x65   : > { %v700_v61 = vrot.slane %v1509_v59, 7  ;;  %v1512_v62 = vld [vmem:[%s1787_s13 + $0x40] sm:$0x1]  ;;  %v1513_v63 = vld [vmem:[%s1787_s13 + $0x48] sm:$0x1] }
  0x66   : > { %1505 = vst.msk [vmem:[%s1794_s16 + $0x7a] sm:$0x3] %vm174_vm1, %v684_v60  ;;  %v699_v0 = vsel %vm168_vm0, %v698_v57, %v1506_v54  ;;  %v716_v1 = vrot.slane %v1513_v63, 7  ;;  %v1514_v2 = vld [vmem:[%s1787_s13 + $0xc0] sm:$0x1] }
  0x67   : > { %v1515_v3 = vld [vmem:[%s1787_s13 + $0xc8] sm:$0x1]  ;;  %1510 = vst.msk [vmem:[%s1794_s16 + $0x7c] sm:$0x3] %vm174_vm1, %v699_v0  ;;  %v701_v4 = vsel %vm168_vm0, %v700_v61, %v1508_v58  ;;  %v1518_v6 = vld [vmem:[%s1787_s13 + $0x41] sm:$0x1] }
  0x68   : > { %v718_v5 = vrot.slane %v1515_v3, 7  ;;  %v1519_v7 = vld [vmem:[%s1787_s13 + $0x49] sm:$0x1]  ;;  %1511 = vst.msk [vmem:[%s1794_s16 + $0x7e] sm:$0x3] %vm174_vm1, %v701_v4  ;;  %v717_v8 = vsel %vm168_vm0, %v716_v1, %v1512_v62 }
  0x69   : > { %v733_v9 = vrot.slane %v1519_v7, 7  ;;  %v1520_v10 = vld [vmem:[%s1787_s13 + $0xc1] sm:$0x1]  ;;  %v1521_v11 = vld [vmem:[%s1787_s13 + $0xc9] sm:$0x1] }
  0x6a   : > { %1516 = vst.msk [vmem:[%s1794_s16 + $0x80] sm:$0x3] %vm174_vm1, %v717_v8  ;;  %v719_v12 = vsel %vm168_vm0, %v718_v5, %v1514_v2  ;;  %v735_v13 = vrot.slane %v1521_v11, 7  ;;  %v1524_v14 = vld [vmem:[%s1787_s13 + $0x42] sm:$0x1] }
  0x6b   : > { %v1525_v15 = vld [vmem:[%s1787_s13 + $0x4a] sm:$0x1]  ;;  %1517 = vst.msk [vmem:[%s1794_s16 + $0x82] sm:$0x3] %vm174_vm1, %v719_v12  ;;  %v734_v16 = vsel %vm168_vm0, %v733_v9, %v1518_v6  ;;  %v1526_v18 = vld [vmem:[%s1787_s13 + $0xc2] sm:$0x1] }
  0x6c   : > { %v750_v17 = vrot.slane %v1525_v15, 7  ;;  %v1527_v19 = vld [vmem:[%s1787_s13 + $0xca] sm:$0x1]  ;;  %1522 = vst.msk [vmem:[%s1794_s16 + $0x84] sm:$0x3] %vm174_vm1, %v734_v16  ;;  %v736_v20 = vsel %vm168_vm0, %v735_v13, %v1520_v10 }
  0x6d   : > { %v752_v21 = vrot.slane %v1527_v19, 7  ;;  %v1530_v22 = vld [vmem:[%s1787_s13 + $0x43] sm:$0x1]  ;;  %v1531_v23 = vld [vmem:[%s1787_s13 + $0x4b] sm:$0x1] }
  0x6e   : > { %1523 = vst.msk [vmem:[%s1794_s16 + $0x86] sm:$0x3] %vm174_vm1, %v736_v20  ;;  %v751_v24 = vsel %vm168_vm0, %v750_v17, %v1524_v14  ;;  %v767_v25 = vrot.slane %v1531_v23, 7  ;;  %v1532_v26 = vld [vmem:[%s1787_s13 + $0xc3] sm:$0x1] }
  0x6f   : > { %v1533_v27 = vld [vmem:[%s1787_s13 + $0xcb] sm:$0x1]  ;;  %1528 = vst.msk [vmem:[%s1794_s16 + $0x88] sm:$0x3] %vm174_vm1, %v751_v24  ;;  %v753_v28 = vsel %vm168_vm0, %v752_v21, %v1526_v18  ;;  %v1536_v30 = vld [vmem:[%s1787_s13 + $0x44] sm:$0x1] }
  0x70   : > { %v769_v29 = vrot.slane %v1533_v27, 7  ;;  %v1537_v31 = vld [vmem:[%s1787_s13 + $0x4c] sm:$0x1]  ;;  %1529 = vst.msk [vmem:[%s1794_s16 + $0x8a] sm:$0x3] %vm174_vm1, %v753_v28  ;;  %v768_v32 = vsel %vm168_vm0, %v767_v25, %v1530_v22 }
  0x71   : > { %v784_v33 = vrot.slane %v1537_v31, 7  ;;  %v1538_v34 = vld [vmem:[%s1787_s13 + $0xc4] sm:$0x1]  ;;  %v1539_v35 = vld [vmem:[%s1787_s13 + $0xcc] sm:$0x1] }
  0x72   : > { %1534 = vst.msk [vmem:[%s1794_s16 + $0x8c] sm:$0x3] %vm174_vm1, %v768_v32  ;;  %v770_v36 = vsel %vm168_vm0, %v769_v29, %v1532_v26  ;;  %v786_v37 = vrot.slane %v1539_v35, 7  ;;  %v1542_v38 = vld [vmem:[%s1787_s13 + $0x45] sm:$0x1] }
  0x73   : > { %v1543_v39 = vld [vmem:[%s1787_s13 + $0x4d] sm:$0x1]  ;;  %1535 = vst.msk [vmem:[%s1794_s16 + $0x8e] sm:$0x3] %vm174_vm1, %v770_v36  ;;  %v785_v40 = vsel %vm168_vm0, %v784_v33, %v1536_v30  ;;  %v1544_v42 = vld [vmem:[%s1787_s13 + $0xc5] sm:$0x1] }
  0x74   : > { %v801_v41 = vrot.slane %v1543_v39, 7  ;;  %v1545_v43 = vld [vmem:[%s1787_s13 + $0xcd] sm:$0x1]  ;;  %1540 = vst.msk [vmem:[%s1794_s16 + $0x90] sm:$0x3] %vm174_vm1, %v785_v40  ;;  %v787_v44 = vsel %vm168_vm0, %v786_v37, %v1538_v34 }
  0x75   : > { %v803_v45 = vrot.slane %v1545_v43, 7  ;;  %v1548_v46 = vld [vmem:[%s1787_s13 + $0x46] sm:$0x1]  ;;  %v1549_v47 = vld [vmem:[%s1787_s13 + $0x4e] sm:$0x1] }
  0x76   : > { %1541 = vst.msk [vmem:[%s1794_s16 + $0x92] sm:$0x3] %vm174_vm1, %v787_v44  ;;  %v802_v48 = vsel %vm168_vm0, %v801_v41, %v1542_v38  ;;  %v818_v49 = vrot.slane %v1549_v47, 7  ;;  %v1550_v50 = vld [vmem:[%s1787_s13 + $0xc6] sm:$0x1] }
  0x77   : > { %v1551_v51 = vld [vmem:[%s1787_s13 + $0xce] sm:$0x1]  ;;  %1546 = vst.msk [vmem:[%s1794_s16 + $0x94] sm:$0x3] %vm174_vm1, %v802_v48  ;;  %v804_v52 = vsel %vm168_vm0, %v803_v45, %v1544_v42  ;;  %v1554_v54 = vld [vmem:[%s1787_s13 + $0x47] sm:$0x1] }
  0x78   : > { %v820_v53 = vrot.slane %v1551_v51, 7  ;;  %v1555_v55 = vld [vmem:[%s1787_s13 + $0x4f] sm:$0x1]  ;;  %1547 = vst.msk [vmem:[%s1794_s16 + $0x96] sm:$0x3] %vm174_vm1, %v804_v52  ;;  %v819_v56 = vsel %vm168_vm0, %v818_v49, %v1548_v46 }
  0x79   : > { %v835_v57 = vrot.slane %v1555_v55, 7  ;;  %v1556_v58 = vld [vmem:[%s1787_s13 + $0xc7] sm:$0x1]  ;;  %v1557_v59 = vld [vmem:[%s1787_s13 + $0xcf] sm:$0x1] }
  0x7a   : > { %1552 = vst.msk [vmem:[%s1794_s16 + $0x98] sm:$0x3] %vm174_vm1, %v819_v56  ;;  %v821_v60 = vsel %vm168_vm0, %v820_v53, %v1550_v50  ;;  %v837_v61 = vrot.slane %v1557_v59, 7  ;;  %v1560_v62 = vld [vmem:[%s1787_s13 + $0x50] sm:$0x1] }
  0x7b   : > { %v1561_v63 = vld [vmem:[%s1787_s13 + $0x58] sm:$0x1]  ;;  %1553 = vst.msk [vmem:[%s1794_s16 + $0x9a] sm:$0x3] %vm174_vm1, %v821_v60  ;;  %v836_v0 = vsel %vm168_vm0, %v835_v57, %v1554_v54  ;;  %v1562_v2 = vld [vmem:[%s1787_s13 + $0xd0] sm:$0x1] }
  0x7c   : > { %v853_v1 = vrot.slane %v1561_v63, 7  ;;  %v1563_v3 = vld [vmem:[%s1787_s13 + $0xd8] sm:$0x1]  ;;  %1558 = vst.msk [vmem:[%s1794_s16 + $0x9c] sm:$0x3] %vm174_vm1, %v836_v0  ;;  %v838_v4 = vsel %vm168_vm0, %v837_v61, %v1556_v58 }
  0x7d   : > { %v855_v5 = vrot.slane %v1563_v3, 7  ;;  %v1566_v6 = vld [vmem:[%s1787_s13 + $0x51] sm:$0x1]  ;;  %v1567_v7 = vld [vmem:[%s1787_s13 + $0x59] sm:$0x1] }
  0x7e   : > { %1559 = vst.msk [vmem:[%s1794_s16 + $0x9e] sm:$0x3] %vm174_vm1, %v838_v4  ;;  %v854_v8 = vsel %vm168_vm0, %v853_v1, %v1560_v62  ;;  %v870_v9 = vrot.slane %v1567_v7, 7  ;;  %v1568_v10 = vld [vmem:[%s1787_s13 + $0xd1] sm:$0x1] }
  0x7f   : > { %v1569_v11 = vld [vmem:[%s1787_s13 + $0xd9] sm:$0x1]  ;;  %1564 = vst.msk [vmem:[%s1794_s16 + $0xa0] sm:$0x3] %vm174_vm1, %v854_v8  ;;  %v856_v12 = vsel %vm168_vm0, %v855_v5, %v1562_v2  ;;  %v1572_v14 = vld [vmem:[%s1787_s13 + $0x52] sm:$0x1] }
  0x80   : > { %v872_v13 = vrot.slane %v1569_v11, 7  ;;  %v1573_v15 = vld [vmem:[%s1787_s13 + $0x5a] sm:$0x1]  ;;  %1565 = vst.msk [vmem:[%s1794_s16 + $0xa2] sm:$0x3] %vm174_vm1, %v856_v12  ;;  %v871_v16 = vsel %vm168_vm0, %v870_v9, %v1566_v6 }
  0x81   : > { %v887_v17 = vrot.slane %v1573_v15, 7  ;;  %v1574_v18 = vld [vmem:[%s1787_s13 + $0xd2] sm:$0x1]  ;;  %v1575_v19 = vld [vmem:[%s1787_s13 + $0xda] sm:$0x1] }
  0x82   : > { %1570 = vst.msk [vmem:[%s1794_s16 + $0xa4] sm:$0x3] %vm174_vm1, %v871_v16  ;;  %v873_v20 = vsel %vm168_vm0, %v872_v13, %v1568_v10  ;;  %v889_v21 = vrot.slane %v1575_v19, 7  ;;  %v1578_v22 = vld [vmem:[%s1787_s13 + $0x53] sm:$0x1] }
  0x83   : > { %v1579_v23 = vld [vmem:[%s1787_s13 + $0x5b] sm:$0x1]  ;;  %1571 = vst.msk [vmem:[%s1794_s16 + $0xa6] sm:$0x3] %vm174_vm1, %v873_v20  ;;  %v888_v24 = vsel %vm168_vm0, %v887_v17, %v1572_v14  ;;  %v1580_v26 = vld [vmem:[%s1787_s13 + $0xd3] sm:$0x1] }
  0x84   : > { %v904_v25 = vrot.slane %v1579_v23, 7  ;;  %v1581_v27 = vld [vmem:[%s1787_s13 + $0xdb] sm:$0x1]  ;;  %1576 = vst.msk [vmem:[%s1794_s16 + $0xa8] sm:$0x3] %vm174_vm1, %v888_v24  ;;  %v890_v28 = vsel %vm168_vm0, %v889_v21, %v1574_v18 }
  0x85   : > { %v906_v29 = vrot.slane %v1581_v27, 7  ;;  %v1584_v30 = vld [vmem:[%s1787_s13 + $0x54] sm:$0x1]  ;;  %v1585_v31 = vld [vmem:[%s1787_s13 + $0x5c] sm:$0x1] }
  0x86   : > { %1577 = vst.msk [vmem:[%s1794_s16 + $0xaa] sm:$0x3] %vm174_vm1, %v890_v28  ;;  %v905_v32 = vsel %vm168_vm0, %v904_v25, %v1578_v22  ;;  %v921_v33 = vrot.slane %v1585_v31, 7  ;;  %v1586_v34 = vld [vmem:[%s1787_s13 + $0xd4] sm:$0x1] }
  0x87   : > { %v1587_v35 = vld [vmem:[%s1787_s13 + $0xdc] sm:$0x1]  ;;  %1582 = vst.msk [vmem:[%s1794_s16 + $0xac] sm:$0x3] %vm174_vm1, %v905_v32  ;;  %v907_v36 = vsel %vm168_vm0, %v906_v29, %v1580_v26  ;;  %v1590_v38 = vld [vmem:[%s1787_s13 + $0x55] sm:$0x1] }
  0x88   : > { %v923_v37 = vrot.slane %v1587_v35, 7  ;;  %v1591_v39 = vld [vmem:[%s1787_s13 + $0x5d] sm:$0x1]  ;;  %1583 = vst.msk [vmem:[%s1794_s16 + $0xae] sm:$0x3] %vm174_vm1, %v907_v36  ;;  %v922_v40 = vsel %vm168_vm0, %v921_v33, %v1584_v30 }
  0x89   : > { %v938_v41 = vrot.slane %v1591_v39, 7  ;;  %v1592_v42 = vld [vmem:[%s1787_s13 + $0xd5] sm:$0x1]  ;;  %v1593_v43 = vld [vmem:[%s1787_s13 + $0xdd] sm:$0x1] }
  0x8a   : > { %1588 = vst.msk [vmem:[%s1794_s16 + $0xb0] sm:$0x3] %vm174_vm1, %v922_v40  ;;  %v924_v44 = vsel %vm168_vm0, %v923_v37, %v1586_v34  ;;  %v940_v45 = vrot.slane %v1593_v43, 7  ;;  %v1596_v46 = vld [vmem:[%s1787_s13 + $0x56] sm:$0x1] }
  0x8b   : > { %v1597_v47 = vld [vmem:[%s1787_s13 + $0x5e] sm:$0x1]  ;;  %1589 = vst.msk [vmem:[%s1794_s16 + $0xb2] sm:$0x3] %vm174_vm1, %v924_v44  ;;  %v939_v48 = vsel %vm168_vm0, %v938_v41, %v1590_v38  ;;  %v1598_v50 = vld [vmem:[%s1787_s13 + $0xd6] sm:$0x1] }
  0x8c   : > { %v955_v49 = vrot.slane %v1597_v47, 7  ;;  %v1599_v51 = vld [vmem:[%s1787_s13 + $0xde] sm:$0x1]  ;;  %1594 = vst.msk [vmem:[%s1794_s16 + $0xb4] sm:$0x3] %vm174_vm1, %v939_v48  ;;  %v941_v52 = vsel %vm168_vm0, %v940_v45, %v1592_v42 }
  0x8d   : > { %v957_v53 = vrot.slane %v1599_v51, 7  ;;  %v1602_v54 = vld [vmem:[%s1787_s13 + $0x57] sm:$0x1]  ;;  %v1603_v55 = vld [vmem:[%s1787_s13 + $0x5f] sm:$0x1] }
  0x8e   : > { %1595 = vst.msk [vmem:[%s1794_s16 + $0xb6] sm:$0x3] %vm174_vm1, %v941_v52  ;;  %v956_v56 = vsel %vm168_vm0, %v955_v49, %v1596_v46  ;;  %v972_v57 = vrot.slane %v1603_v55, 7  ;;  %v1604_v58 = vld [vmem:[%s1787_s13 + $0xd7] sm:$0x1] }
  0x8f   : > { %v1605_v59 = vld [vmem:[%s1787_s13 + $0xdf] sm:$0x1]  ;;  %1600 = vst.msk [vmem:[%s1794_s16 + $0xb8] sm:$0x3] %vm174_vm1, %v956_v56  ;;  %v958_v60 = vsel %vm168_vm0, %v957_v53, %v1598_v50  ;;  %v1608_v62 = vld [vmem:[%s1787_s13 + $0x60] sm:$0x1] }
  0x90   : > { %v974_v61 = vrot.slane %v1605_v59, 7  ;;  %v1609_v63 = vld [vmem:[%s1787_s13 + $0x68] sm:$0x1]  ;;  %1601 = vst.msk [vmem:[%s1794_s16 + $0xba] sm:$0x3] %vm174_vm1, %v958_v60  ;;  %v973_v0 = vsel %vm168_vm0, %v972_v57, %v1602_v54 }
  0x91   : > { %v990_v1 = vrot.slane %v1609_v63, 7  ;;  %v1610_v2 = vld [vmem:[%s1787_s13 + $0xe0] sm:$0x1]  ;;  %v1611_v3 = vld [vmem:[%s1787_s13 + $0xe8] sm:$0x1] }
  0x92   : > { %1606 = vst.msk [vmem:[%s1794_s16 + $0xbc] sm:$0x3] %vm174_vm1, %v973_v0  ;;  %v975_v4 = vsel %vm168_vm0, %v974_v61, %v1604_v58  ;;  %v992_v5 = vrot.slane %v1611_v3, 7  ;;  %v1614_v6 = vld [vmem:[%s1787_s13 + $0x61] sm:$0x1] }
  0x93   : > { %v1615_v7 = vld [vmem:[%s1787_s13 + $0x69] sm:$0x1]  ;;  %1607 = vst.msk [vmem:[%s1794_s16 + $0xbe] sm:$0x3] %vm174_vm1, %v975_v4  ;;  %v991_v8 = vsel %vm168_vm0, %v990_v1, %v1608_v62  ;;  %v1616_v10 = vld [vmem:[%s1787_s13 + $0xe1] sm:$0x1] }
  0x94   : > { %v1007_v9 = vrot.slane %v1615_v7, 7  ;;  %v1617_v11 = vld [vmem:[%s1787_s13 + $0xe9] sm:$0x1]  ;;  %1612 = vst.msk [vmem:[%s1794_s16 + $0xc0] sm:$0x3] %vm174_vm1, %v991_v8  ;;  %v993_v12 = vsel %vm168_vm0, %v992_v5, %v1610_v2 }
  0x95   : > { %v1009_v13 = vrot.slane %v1617_v11, 7  ;;  %v1620_v14 = vld [vmem:[%s1787_s13 + $0x62] sm:$0x1]  ;;  %v1621_v15 = vld [vmem:[%s1787_s13 + $0x6a] sm:$0x1] }
  0x96   : > { %1613 = vst.msk [vmem:[%s1794_s16 + $0xc2] sm:$0x3] %vm174_vm1, %v993_v12  ;;  %v1008_v16 = vsel %vm168_vm0, %v1007_v9, %v1614_v6  ;;  %v1024_v17 = vrot.slane %v1621_v15, 7  ;;  %v1622_v18 = vld [vmem:[%s1787_s13 + $0xe2] sm:$0x1] }
  0x97   : > { %v1623_v19 = vld [vmem:[%s1787_s13 + $0xea] sm:$0x1]  ;;  %1618 = vst.msk [vmem:[%s1794_s16 + $0xc4] sm:$0x3] %vm174_vm1, %v1008_v16  ;;  %v1010_v20 = vsel %vm168_vm0, %v1009_v13, %v1616_v10  ;;  %v1626_v22 = vld [vmem:[%s1787_s13 + $0x63] sm:$0x1] }
  0x98   : > { %v1026_v21 = vrot.slane %v1623_v19, 7  ;;  %v1627_v23 = vld [vmem:[%s1787_s13 + $0x6b] sm:$0x1]  ;;  %1619 = vst.msk [vmem:[%s1794_s16 + $0xc6] sm:$0x3] %vm174_vm1, %v1010_v20  ;;  %v1025_v24 = vsel %vm168_vm0, %v1024_v17, %v1620_v14 }
  0x99   : > { %v1041_v25 = vrot.slane %v1627_v23, 7  ;;  %v1628_v26 = vld [vmem:[%s1787_s13 + $0xe3] sm:$0x1]  ;;  %v1629_v27 = vld [vmem:[%s1787_s13 + $0xeb] sm:$0x1] }
  0x9a   : > { %1624 = vst.msk [vmem:[%s1794_s16 + $0xc8] sm:$0x3] %vm174_vm1, %v1025_v24  ;;  %v1027_v28 = vsel %vm168_vm0, %v1026_v21, %v1622_v18  ;;  %v1043_v29 = vrot.slane %v1629_v27, 7  ;;  %v1632_v30 = vld [vmem:[%s1787_s13 + $0x64] sm:$0x1] }
  0x9b   : > { %v1633_v31 = vld [vmem:[%s1787_s13 + $0x6c] sm:$0x1]  ;;  %1625 = vst.msk [vmem:[%s1794_s16 + $0xca] sm:$0x3] %vm174_vm1, %v1027_v28  ;;  %v1042_v32 = vsel %vm168_vm0, %v1041_v25, %v1626_v22  ;;  %v1634_v34 = vld [vmem:[%s1787_s13 + $0xe4] sm:$0x1] }
  0x9c   : > { %v1058_v33 = vrot.slane %v1633_v31, 7  ;;  %v1635_v35 = vld [vmem:[%s1787_s13 + $0xec] sm:$0x1]  ;;  %1630 = vst.msk [vmem:[%s1794_s16 + $0xcc] sm:$0x3] %vm174_vm1, %v1042_v32  ;;  %v1044_v36 = vsel %vm168_vm0, %v1043_v29, %v1628_v26 }
  0x9d   : > { %v1060_v37 = vrot.slane %v1635_v35, 7  ;;  %v1638_v38 = vld [vmem:[%s1787_s13 + $0x65] sm:$0x1]  ;;  %v1639_v39 = vld [vmem:[%s1787_s13 + $0x6d] sm:$0x1] }
  0x9e   : > { %1631 = vst.msk [vmem:[%s1794_s16 + $0xce] sm:$0x3] %vm174_vm1, %v1044_v36  ;;  %v1059_v40 = vsel %vm168_vm0, %v1058_v33, %v1632_v30  ;;  %v1075_v41 = vrot.slane %v1639_v39, 7  ;;  %v1640_v42 = vld [vmem:[%s1787_s13 + $0xe5] sm:$0x1] }
  0x9f   : > { %v1641_v43 = vld [vmem:[%s1787_s13 + $0xed] sm:$0x1]  ;;  %1636 = vst.msk [vmem:[%s1794_s16 + $0xd0] sm:$0x3] %vm174_vm1, %v1059_v40  ;;  %v1061_v44 = vsel %vm168_vm0, %v1060_v37, %v1634_v34  ;;  %v1644_v46 = vld [vmem:[%s1787_s13 + $0x66] sm:$0x1] }
  0xa0   : > { %v1077_v45 = vrot.slane %v1641_v43, 7  ;;  %v1645_v47 = vld [vmem:[%s1787_s13 + $0x6e] sm:$0x1]  ;;  %1637 = vst.msk [vmem:[%s1794_s16 + $0xd2] sm:$0x3] %vm174_vm1, %v1061_v44  ;;  %v1076_v48 = vsel %vm168_vm0, %v1075_v41, %v1638_v38 }
  0xa1   : > { %v1092_v49 = vrot.slane %v1645_v47, 7  ;;  %v1646_v50 = vld [vmem:[%s1787_s13 + $0xe6] sm:$0x1]  ;;  %v1647_v51 = vld [vmem:[%s1787_s13 + $0xee] sm:$0x1] }
  0xa2   : > { %1642 = vst.msk [vmem:[%s1794_s16 + $0xd4] sm:$0x3] %vm174_vm1, %v1076_v48  ;;  %v1078_v52 = vsel %vm168_vm0, %v1077_v45, %v1640_v42  ;;  %v1094_v53 = vrot.slane %v1647_v51, 7  ;;  %v1650_v54 = vld [vmem:[%s1787_s13 + $0x67] sm:$0x1] }
  0xa3   : > { %v1651_v55 = vld [vmem:[%s1787_s13 + $0x6f] sm:$0x1]  ;;  %1643 = vst.msk [vmem:[%s1794_s16 + $0xd6] sm:$0x3] %vm174_vm1, %v1078_v52  ;;  %v1093_v56 = vsel %vm168_vm0, %v1092_v49, %v1644_v46  ;;  %v1652_v58 = vld [vmem:[%s1787_s13 + $0xe7] sm:$0x1] }
  0xa4   : > { %v1109_v57 = vrot.slane %v1651_v55, 7  ;;  %v1653_v59 = vld [vmem:[%s1787_s13 + $0xef] sm:$0x1]  ;;  %1648 = vst.msk [vmem:[%s1794_s16 + $0xd8] sm:$0x3] %vm174_vm1, %v1093_v56  ;;  %v1095_v60 = vsel %vm168_vm0, %v1094_v53, %v1646_v50 }
  0xa5   : > { %v1111_v61 = vrot.slane %v1653_v59, 7  ;;  %v1656_v62 = vld [vmem:[%s1787_s13 + $0x70] sm:$0x1]  ;;  %v1657_v63 = vld [vmem:[%s1787_s13 + $0x78] sm:$0x1] }
  0xa6   : > { %1649 = vst.msk [vmem:[%s1794_s16 + $0xda] sm:$0x3] %vm174_vm1, %v1095_v60  ;;  %v1110_v0 = vsel %vm168_vm0, %v1109_v57, %v1650_v54  ;;  %v1127_v1 = vrot.slane %v1657_v63, 7  ;;  %v1658_v2 = vld [vmem:[%s1787_s13 + $0xf0] sm:$0x1] }
  0xa7   : > { %v1659_v3 = vld [vmem:[%s1787_s13 + $0xf8] sm:$0x1]  ;;  %1654 = vst.msk [vmem:[%s1794_s16 + $0xdc] sm:$0x3] %vm174_vm1, %v1110_v0  ;;  %v1112_v4 = vsel %vm168_vm0, %v1111_v61, %v1652_v58  ;;  %v1662_v6 = vld [vmem:[%s1787_s13 + $0x71] sm:$0x1] }
  0xa8   : > { %v1129_v5 = vrot.slane %v1659_v3, 7  ;;  %v1663_v7 = vld [vmem:[%s1787_s13 + $0x79] sm:$0x1]  ;;  %1655 = vst.msk [vmem:[%s1794_s16 + $0xde] sm:$0x3] %vm174_vm1, %v1112_v4  ;;  %v1128_v8 = vsel %vm168_vm0, %v1127_v1, %v1656_v62 }
  0xa9   : > { %v1144_v9 = vrot.slane %v1663_v7, 7  ;;  %v1664_v10 = vld [vmem:[%s1787_s13 + $0xf1] sm:$0x1]  ;;  %v1665_v11 = vld [vmem:[%s1787_s13 + $0xf9] sm:$0x1] }
  0xaa   : > { %1660 = vst.msk [vmem:[%s1794_s16 + $0xe0] sm:$0x3] %vm174_vm1, %v1128_v8  ;;  %v1130_v12 = vsel %vm168_vm0, %v1129_v5, %v1658_v2  ;;  %v1146_v13 = vrot.slane %v1665_v11, 7  ;;  %v1668_v14 = vld [vmem:[%s1787_s13 + $0x72] sm:$0x1] }
  0xab   : > { %v1669_v15 = vld [vmem:[%s1787_s13 + $0x7a] sm:$0x1]  ;;  %1661 = vst.msk [vmem:[%s1794_s16 + $0xe2] sm:$0x3] %vm174_vm1, %v1130_v12  ;;  %v1145_v16 = vsel %vm168_vm0, %v1144_v9, %v1662_v6  ;;  %v1670_v18 = vld [vmem:[%s1787_s13 + $0xf2] sm:$0x1] }
  0xac   : > { %v1161_v17 = vrot.slane %v1669_v15, 7  ;;  %v1671_v19 = vld [vmem:[%s1787_s13 + $0xfa] sm:$0x1]  ;;  %1666 = vst.msk [vmem:[%s1794_s16 + $0xe4] sm:$0x3] %vm174_vm1, %v1145_v16  ;;  %v1147_v20 = vsel %vm168_vm0, %v1146_v13, %v1664_v10 }
  0xad   : > { %v1163_v21 = vrot.slane %v1671_v19, 7  ;;  %v1674_v22 = vld [vmem:[%s1787_s13 + $0x73] sm:$0x1]  ;;  %v1675_v23 = vld [vmem:[%s1787_s13 + $0x7b] sm:$0x1] }
  0xae   : > { %1667 = vst.msk [vmem:[%s1794_s16 + $0xe6] sm:$0x3] %vm174_vm1, %v1147_v20  ;;  %v1162_v24 = vsel %vm168_vm0, %v1161_v17, %v1668_v14  ;;  %v1178_v25 = vrot.slane %v1675_v23, 7  ;;  %v1676_v26 = vld [vmem:[%s1787_s13 + $0xf3] sm:$0x1] }
  0xaf   : > { %v1677_v27 = vld [vmem:[%s1787_s13 + $0xfb] sm:$0x1]  ;;  %1672 = vst.msk [vmem:[%s1794_s16 + $0xe8] sm:$0x3] %vm174_vm1, %v1162_v24  ;;  %v1164_v28 = vsel %vm168_vm0, %v1163_v21, %v1670_v18  ;;  %v1680_v30 = vld [vmem:[%s1787_s13 + $0x74] sm:$0x1] }
  0xb0   : > { %v1180_v29 = vrot.slane %v1677_v27, 7  ;;  %v1681_v31 = vld [vmem:[%s1787_s13 + $0x7c] sm:$0x1]  ;;  %1673 = vst.msk [vmem:[%s1794_s16 + $0xea] sm:$0x3] %vm174_vm1, %v1164_v28  ;;  %v1179_v32 = vsel %vm168_vm0, %v1178_v25, %v1674_v22 }
  0xb1   : > { %v1195_v33 = vrot.slane %v1681_v31, 7  ;;  %v1682_v34 = vld [vmem:[%s1787_s13 + $0xf4] sm:$0x1]  ;;  %v1683_v35 = vld [vmem:[%s1787_s13 + $0xfc] sm:$0x1] }
  0xb2   : > { %1678 = vst.msk [vmem:[%s1794_s16 + $0xec] sm:$0x3] %vm174_vm1, %v1179_v32  ;;  %v1181_v36 = vsel %vm168_vm0, %v1180_v29, %v1676_v26  ;;  %v1197_v37 = vrot.slane %v1683_v35, 7  ;;  %v1686_v38 = vld [vmem:[%s1787_s13 + $0x75] sm:$0x1] }
  0xb3   : > { %v1687_v39 = vld [vmem:[%s1787_s13 + $0x7d] sm:$0x1]  ;;  %1679 = vst.msk [vmem:[%s1794_s16 + $0xee] sm:$0x3] %vm174_vm1, %v1181_v36  ;;  %v1196_v40 = vsel %vm168_vm0, %v1195_v33, %v1680_v30  ;;  %v1688_v42 = vld [vmem:[%s1787_s13 + $0xf5] sm:$0x1] }
  0xb4   : > { %v1212_v41 = vrot.slane %v1687_v39, 7  ;;  %v1689_v43 = vld [vmem:[%s1787_s13 + $0xfd] sm:$0x1]  ;;  %1684 = vst.msk [vmem:[%s1794_s16 + $0xf0] sm:$0x3] %vm174_vm1, %v1196_v40  ;;  %v1198_v44 = vsel %vm168_vm0, %v1197_v37, %v1682_v34 }
  0xb5   : > { %v1214_v45 = vrot.slane %v1689_v43, 7  ;;  %v1692_v46 = vld [vmem:[%s1787_s13 + $0x76] sm:$0x1]  ;;  %v1693_v47 = vld [vmem:[%s1787_s13 + $0x7e] sm:$0x1] }
  0xb6   : > { %1685 = vst.msk [vmem:[%s1794_s16 + $0xf2] sm:$0x3] %vm174_vm1, %v1198_v44  ;;  %v1213_v48 = vsel %vm168_vm0, %v1212_v41, %v1686_v38  ;;  %v1229_v49 = vrot.slane %v1693_v47, 7  ;;  %v1694_v50 = vld [vmem:[%s1787_s13 + $0xf6] sm:$0x1] }
  0xb7   : > { %v1695_v51 = vld [vmem:[%s1787_s13 + $0xfe] sm:$0x1]  ;;  %1690 = vst.msk [vmem:[%s1794_s16 + $0xf4] sm:$0x3] %vm174_vm1, %v1213_v48  ;;  %v1215_v52 = vsel %vm168_vm0, %v1214_v45, %v1688_v42  ;;  %v1698_v54 = vld [vmem:[%s1787_s13 + $0x77] sm:$0x1] }
  0xb8   : > { %v1231_v53 = vrot.slane %v1695_v51, 7  ;;  %v1699_v55 = vld [vmem:[%s1787_s13 + $0x7f] sm:$0x1]  ;;  %1691 = vst.msk [vmem:[%s1794_s16 + $0xf6] sm:$0x3] %vm174_vm1, %v1215_v52  ;;  %v1230_v56 = vsel %vm168_vm0, %v1229_v49, %v1692_v46 }
  0xb9   : > { %v1246_v57 = vrot.slane %v1699_v55, 7  ;;  %v1700_v58 = vld [vmem:[%s1787_s13 + $0xf7] sm:$0x1]  ;;  %v1701_v59 = vld [vmem:[%s1787_s13 + $0xff] sm:$0x1] }
  0xba   : > { %1696 = vst.msk [vmem:[%s1794_s16 + $0xf8] sm:$0x3] %vm174_vm1, %v1230_v56  ;;  %v1232_v60 = vsel %vm168_vm0, %v1231_v53, %v1694_v50  ;;  %v1248_v61 = vrot.slane %v1701_v59, 7 }
  0xbb   : > { %1697 = vst.msk [vmem:[%s1794_s16 + $0xfa] sm:$0x3] %vm174_vm1, %v1232_v60  ;;  %v1247_v62 = vsel %vm168_vm0, %v1246_v57, %v1698_v54 }
  0xbc   : > { %1702 = vst.msk [vmem:[%s1794_s16 + $0xfc] sm:$0x3] %vm174_vm1, %v1247_v62  ;;  %v1249_v63 = vsel %vm168_vm0, %v1248_v61, %v1700_v58 }
  0xbd   : > { %1703 = vst.msk [vmem:[%s1794_s16 + $0xfe] sm:$0x3] %vm174_vm1, %v1249_v63 }
  0xbe PF: > { %s11_s8 = sadd.s32 1, %s1754_s8   ;;  %s2445_s6 = smov %s1750_s7 }
  0xbf   : > { %p8_p5 = scmp.ge.s32.totalorder %s11_s8, 4   ;;  %s2446_s7 = smov %s2448_s9 }
  0xc1   :  { %10 = sbr.rel (!%p8_p5) target bundleno = 2 (0x2), region = 124 }

</bundles_post_ra>
